<compile_context>
chip_gen: v7x
topology: tpu7x:2x2x1
jax: 0.10.0
libtpu: 0.0.40
codegen_flags: <defaults>
</compile_context>

<pallas_src>
import math
import functools

import jax
import jax.numpy as jnp
from jax import lax
from jax.experimental import pallas as pl
from jax.experimental.pallas import tpu as pltpu

NEG_INF = -1e18


# ---------------------------------------------------------------------------
# In-kernel helpers (operate on loaded jnp values, traced inside the kernel)
# ---------------------------------------------------------------------------
def _layer_norm(x, g, b, eps=1e-6):
    x = x.astype(jnp.float32)
    mu = jnp.mean(x, axis=-1, keepdims=True)
    var = jnp.mean((x - mu) ** 2, axis=-1, keepdims=True)
    return (x - mu) * lax.rsqrt(var + eps) * g + b


def _gelu(x):
    # PreSumm-style gelu (tanh approximation).
    c = math.sqrt(2.0 / math.pi)
    return 0.5 * x * (1.0 + jnp.tanh(c * (x + 0.044715 * x * x * x)))


def _matmul(x, w, b=None):
    """MXU matmul: cast the activation to the weight storage dtype, f32 accum."""
    out = jnp.dot(x.astype(w.dtype), w, preferred_element_type=jnp.float32)
    if b is not None:
        out = out + b
    return out


def _mh_attention(q, k, v, bias, *, heads, compute_dtype):
    """Scaled-dot multi-head attention. bias is an additive mask (-1e18 where
    masked, 0 elsewhere), broadcastable to (T, S)."""
    T, D = q.shape
    dh = D // heads
    # Fold the 1/sqrt(d_head) scale into q once (one (T,D) multiply) instead of
    # scaling every per-head (T,S) score tile.
    q = q * (1.0 / math.sqrt(dh))
    ctx = []
    # TODO(synk): heads are a statically-unrolled loop of 2-D MXU matmuls; a single
    # leading-batch-dim dot_general would avoid the per-head lane slices but needs
    # 3-D relayouts that do not lower reliably at small head_dim (and gives no
    # MXU-flop win since the contraction dim stays d_head), so the safe unrolled
    # form is kept (QKV projections themselves are already fused/wide).
    for h in range(heads):
        qh = q[:, h * dh:(h + 1) * dh].astype(compute_dtype)
        kh = k[:, h * dh:(h + 1) * dh].astype(compute_dtype)
        vh = v[:, h * dh:(h + 1) * dh].astype(compute_dtype)
        # scores = qh @ kh^T (contract feature dim, avoids explicit transpose)
        s = lax.dot_general(qh, kh, (((1,), (1,)), ((), ())),
                            preferred_element_type=jnp.float32)       # (T, S)
        s = s + bias
        s = s - jnp.max(s, axis=-1, keepdims=True)
        p = jnp.exp(s)
        p = p * pl.reciprocal(jnp.sum(p, axis=-1, keepdims=True), approx=True)
        ctx.append(jnp.dot(p.astype(compute_dtype), vh,
                           preferred_element_type=jnp.float32))        # (T, dh)
    return jnp.concatenate(ctx, axis=-1)                               # (T, D)


# ---------------------------------------------------------------------------
# Fused decoder-stack kernel: grid = (batch, layer); activation stays in VMEM.
# ---------------------------------------------------------------------------
def decoder_stack_kernel(
        x_ref, mem_ref, tpad_ref, spad_ref,
        wqkv_s_ref, bqkv_s_ref, wo_s_ref, bo_s_ref,
        wq_c_ref, bq_c_ref, wkv_c_ref, bkv_c_ref, wo_c_ref, bo_c_ref,
        ln_ref, w1_ref, b1_ref, w2_ref, b2_ref, fln_ref,
        out_ref, saved_ref,
        act_ref, dec_bias_ref,
        *, heads, num_layers, compute_dtype):
    l = pl.program_id(1)

    T, D = act_ref.shape
    S = mem_ref.shape[1]

    # Layer 0: load the (pre-embedded) target activation into the resident
    # scratch and build the causal + tgt-pad additive bias once per batch
    # element (reused by every subsequent layer).
    @pl.when(l == 0)
    def _():
        act_ref[...] = x_ref[0].astype(jnp.float32)
        tpad = tpad_ref[0]                                     # (1, T)  1.0 => pad
        row = lax.broadcasted_iota(jnp.int32, (T, T), 0)
        col = lax.broadcasted_iota(jnp.int32, (T, T), 1)
        dec_bias_ref[...] = jnp.where(
            jnp.logical_or(col > row, tpad > 0.0), NEG_INF, 0.0
        ).astype(jnp.float32)                                  # (T, T)

    x = act_ref[...]                         # (T, D) f32, carried across layers
    mem = mem_ref[0]                         # (S, D)
    dec_bias = dec_bias_ref[...]             # (T, T), built once per batch element
    src_bias = jnp.where(spad_ref[0] > 0.0, NEG_INF, 0.0)     # (1, S), one vreg op

    ln = ln_ref[0]                           # (6, D): ln1 g,b ; ln2 g,b ; ffn-ln g,b

    # ---- self attention block ----
    input_norm = _layer_norm(x, ln[0], ln[1])
    saved_ref[0, 0] = input_norm.astype(saved_ref.dtype)     # all_input for this layer

    qkv = _matmul(input_norm, wqkv_s_ref[0], bqkv_s_ref[0])  # (T, 3D) fused projection
    sa = _mh_attention(qkv[:, :D], qkv[:, D:2 * D], qkv[:, 2 * D:],
                       dec_bias, heads=heads, compute_dtype=compute_dtype)
    sa = _matmul(sa, wo_s_ref[0], bo_s_ref[0])
    query = sa + x                                           # dropout == identity

    # ---- context (cross) attention block ----
    query_norm = _layer_norm(query, ln[2], ln[3])
    qc = _matmul(query_norm, wq_c_ref[0], bq_c_ref[0])       # (T, D)
    kv = _matmul(mem, wkv_c_ref[0], bkv_c_ref[0])            # (S, 2D) fused K|V
    ca = _mh_attention(qc, kv[:, :D], kv[:, D:],
                       src_bias, heads=heads, compute_dtype=compute_dtype)
    ca = _matmul(ca, wo_c_ref[0], bo_c_ref[0])
    mid = ca + query

    # ---- position-wise feed forward ----
    ffn_in = _layer_norm(mid, ln[4], ln[5])
    inter = _gelu(_matmul(ffn_in, w1_ref[0], b1_ref[0]))
    new_act = _matmul(inter, w2_ref[0], b2_ref[0]) + mid

    act_ref[...] = new_act                                   # carry to next layer

    # ---- final LayerNorm fused into the last layer's epilogue ----
    @pl.when(l == num_layers - 1)
    def _():
        out_ref[0] = _layer_norm(new_act, fln_ref[0], fln_ref[1]).astype(out_ref.dtype)


# ---------------------------------------------------------------------------
# Wrapper
# ---------------------------------------------------------------------------
def _vmem_budget_bytes(T, S, D, F, param_itemsize):
    """Heuristic scoped-VMEM budget: 2x (double-buffered) per-layer weight slab
    + per-batch activation / output blocks + scratch + margin, clamped to stay
    valid on v7x (64 MiB physical per TensorCore)."""
    weight_slab = (3 * D * D + 3 * D          # fused Wqkv / bqkv (self)
                   + D * D + D                # Wo / bo (self)
                   + D * D + D                # Wq / bq (cross)
                   + 2 * D * D + 2 * D        # fused Wkv / bkv (cross)
                   + D * D + D                # Wo / bo (cross)
                   + 6 * D                    # layer norms
                   + D * F + F + F * D + D    # FFN
                   + 2 * D) * param_itemsize  # final LN
    io_blocks = (T * D + S * D + T + S) * 4       # x, memory, pad vectors (f32)
    out_blocks = 2 * T * D * 4                    # out + saved slabs (f32)
    scratch = (T * D + T * T) * 4                 # resident activation + dec bias
    est = 2 * (weight_slab + io_blocks + out_blocks) + scratch + (4 << 20)
    return int(min(56 * 1024 * 1024, max(32 * 1024 * 1024, est)))


def run_decoder_stack(x, memory, tgt_pad, src_pad, p, *, heads):
    B, T, D = x.shape
    S = memory.shape[1]
    L, _, F = p["w1"].shape

    param_dtype = p["wqkv_self"].dtype
    kernel = functools.partial(decoder_stack_kernel, heads=heads, num_layers=L,
                               compute_dtype=param_dtype)

    def lsel(b, l):                 # per-layer weight slab
        return (l, 0, 0)

    in_specs = [
        pl.BlockSpec((1, T, D), lambda b, l: (b, 0, 0)),   # x (used only at l == 0)
        pl.BlockSpec((1, S, D), lambda b, l: (b, 0, 0)),   # memory bank
        pl.BlockSpec((1, 1, T), lambda b, l: (b, 0, 0)),   # tgt pad mask (thin)
        pl.BlockSpec((1, 1, S), lambda b, l: (b, 0, 0)),   # src pad mask (thin)
        pl.BlockSpec((1, D, 3 * D), lsel),                 # self-attn fused Wqkv
        pl.BlockSpec((1, 1, 3 * D), lsel),                 # self-attn fused bqkv
        pl.BlockSpec((1, D, D), lsel),                     # self-attn Wo
        pl.BlockSpec((1, 1, D), lsel),                     # self-attn bo
        pl.BlockSpec((1, D, D), lsel),                     # cross-attn Wq
        pl.BlockSpec((1, 1, D), lsel),                     # cross-attn bq
        pl.BlockSpec((1, D, 2 * D), lsel),                 # cross-attn fused Wkv
        pl.BlockSpec((1, 1, 2 * D), lsel),                 # cross-attn fused bkv
        pl.BlockSpec((1, D, D), lsel),                     # cross-attn Wo
        pl.BlockSpec((1, 1, D), lsel),                     # cross-attn bo
        pl.BlockSpec((1, 6, D), lsel),                     # layer norms
        pl.BlockSpec((1, D, F), lsel),                     # FFN W1
        pl.BlockSpec((1, 1, F), lsel),                     # FFN b1
        pl.BlockSpec((1, F, D), lsel),                     # FFN W2
        pl.BlockSpec((1, 1, D), lsel),                     # FFN b2
        pl.BlockSpec((2, D), lambda b, l: (0, 0)),         # final LN gamma/beta
    ]

    param_itemsize = jnp.dtype(param_dtype).itemsize

    out, saved = pl.pallas_call(
        kernel,
        out_shape=(jax.ShapeDtypeStruct((B, T, D), jnp.float32),
                   jax.ShapeDtypeStruct((L, B, T, D), jnp.float32)),
        grid=(B, L),
        in_specs=in_specs,
        out_specs=(
            # final output: same block across the layer axis -> stays resident
            # in VMEM and is written back once per batch element.
            pl.BlockSpec((1, T, D), lambda b, l: (b, 0, 0)),
            # per-layer input_norm (state.previous_layer_inputs)
            pl.BlockSpec((1, 1, T, D), lambda b, l: (l, b, 0, 0)),
        ),
        scratch_shapes=[
            pltpu.VMEM((T, D), jnp.float32),   # resident activation (layer carry)
            pltpu.VMEM((T, T), jnp.float32),   # causal + pad additive bias
        ],
        compiler_params=pltpu.CompilerParams(
            dimension_semantics=("parallel", "arbitrary"),
            vmem_limit_bytes=_vmem_budget_bytes(T, S, D, F, param_itemsize)),
    )(x, memory, tgt_pad, src_pad,
      p["wqkv_self"], p["bqkv_self"], p["wo_self"], p["bo_self"],
      p["wq_ctx"], p["bq_ctx"], p["wkv_ctx"], p["bkv_ctx"], p["wo_ctx"], p["bo_ctx"],
      p["ln"], p["w1"], p["b1"], p["w2"], p["b2"], p["final_ln"])
    return out, saved


class PallasTransformerDecoder:
    """JAX/Pallas port of TransformerDecoder (embeddings=None, topic=False)."""

    def __init__(self, num_layers, d_model, heads, d_ff, key,
                 param_dtype=jnp.float32):
        assert d_model % heads == 0
        self.num_layers = num_layers
        self.d_model = d_model
        self.heads = heads
        self.d_ff = d_ff

        L, D, F = num_layers, d_model, d_ff
        scale = 0.02
        keys = jax.random.split(key, 7)

        def w(k, shape):
            return (scale * jax.random.normal(k, shape, jnp.float32)).astype(param_dtype)

        ln = jnp.zeros((L, 6, D), jnp.float32)
        ln = ln.at[:, 0].set(1.0).at[:, 2].set(1.0).at[:, 4].set(1.0)  # gammas=1

        self.params = {
            "wqkv_self": w(keys[0], (L, D, 3 * D)),
            "bqkv_self": jnp.zeros((L, 1, 3 * D), jnp.float32),
            "wo_self": w(keys[1], (L, D, D)),
            "bo_self": jnp.zeros((L, 1, D), jnp.float32),
            "wq_ctx": w(keys[2], (L, D, D)),
            "bq_ctx": jnp.zeros((L, 1, D), jnp.float32),
            "wkv_ctx": w(keys[3], (L, D, 2 * D)),
            "bkv_ctx": jnp.zeros((L, 1, 2 * D), jnp.float32),
            "wo_ctx": w(keys[4], (L, D, D)),
            "bo_ctx": jnp.zeros((L, 1, D), jnp.float32),
            "ln": ln,
            "w1": w(keys[5], (L, D, F)),
            "b1": jnp.zeros((L, 1, F), jnp.float32),
            "w2": w(keys[6], (L, F, D)),
            "b2": jnp.zeros((L, 1, D), jnp.float32),
            "final_ln": jnp.stack([jnp.ones((D,), jnp.float32),
                                   jnp.zeros((D,), jnp.float32)]),
        }

    def __call__(self, tgt, memory_bank, tgt_masks, memory_masks=None):
        # tgt: [B, T, D] (already-embedded path); tgt_masks: [B, T], 1 => pad.
        B, T, _ = tgt.shape
        S = memory_bank.shape[1]
        tgt_pad = tgt_masks.astype(jnp.float32).reshape(B, 1, T)
        if memory_masks is not None:
            src_pad = memory_masks.astype(jnp.float32).reshape(B, 1, S)
        else:
            src_pad = jnp.zeros((B, 1, S), jnp.float32)

        output, saved_inputs = run_decoder_stack(
            tgt.astype(jnp.float32), memory_bank.astype(jnp.float32),
            tgt_pad, src_pad, self.params, heads=self.heads)
        # TODO(synk): incremental-decoding cache / beam-state bookkeeping
        # (TransformerDecoderState) is host-side control flow, not kernel compute.
        return output, saved_inputs, None


if __name__ == "__main__":
    B, T, S = 2, 8, 16
    D, HEADS, D_FF, LAYERS = 128, 4, 256, 2   # lane-aligned small config

    key = jax.random.PRNGKey(0)
    k_tgt, k_mem, k_param = jax.random.split(key, 3)

    tgt = jax.random.normal(k_tgt, (B, T, D), jnp.float32)          # pre-embedded targets
    memory_bank = jax.random.normal(k_mem, (B, S, D), jnp.float32)  # encoder outputs
    # last target position of batch element 1 is padding; last source token too.
    tgt_masks = jnp.zeros((B, T), jnp.float32).at[1, T - 1].set(1.0)
    memory_masks = jnp.zeros((B, S), jnp.float32).at[1, S - 1].set(1.0)

    decoder = PallasTransformerDecoder(LAYERS, D, HEADS, D_FF, k_param)
    out, saved, att = decoder(tgt, memory_bank, tgt_masks, memory_masks=memory_masks)
    out = jax.block_until_ready(out)
    saved = jax.block_until_ready(saved)

    assert out.shape == (B, T, D)
    assert saved.shape == (LAYERS, B, T, D)
    assert bool(jnp.all(jnp.isfinite(out)))
    assert bool(jnp.all(jnp.isfinite(saved)))
    print("KERNEL_OK")
</pallas_src>

<mosaic_0001>
module attributes {stable_mosaic.version = 11 : i64} {
  func.func @decoder_stack_kernel(%arg0: i32, %arg1: i32, %arg2: memref<1x8x128xf32, #tpu.memory_space<vmem>>, %arg3: memref<1x16x128xf32, #tpu.memory_space<vmem>>, %arg4: memref<1x1x8xf32, #tpu.memory_space<vmem>>, %arg5: memref<1x1x16xf32, #tpu.memory_space<vmem>>, %arg6: memref<1x128x384xf32, #tpu.memory_space<vmem>>, %arg7: memref<1x1x384xf32, #tpu.memory_space<vmem>>, %arg8: memref<1x128x128xf32, #tpu.memory_space<vmem>>, %arg9: memref<1x1x128xf32, #tpu.memory_space<vmem>>, %arg10: memref<1x128x128xf32, #tpu.memory_space<vmem>>, %arg11: memref<1x1x128xf32, #tpu.memory_space<vmem>>, %arg12: memref<1x128x256xf32, #tpu.memory_space<vmem>>, %arg13: memref<1x1x256xf32, #tpu.memory_space<vmem>>, %arg14: memref<1x128x128xf32, #tpu.memory_space<vmem>>, %arg15: memref<1x1x128xf32, #tpu.memory_space<vmem>>, %arg16: memref<1x6x128xf32, #tpu.memory_space<vmem>>, %arg17: memref<1x128x256xf32, #tpu.memory_space<vmem>>, %arg18: memref<1x1x256xf32, #tpu.memory_space<vmem>>, %arg19: memref<1x256x128xf32, #tpu.memory_space<vmem>>, %arg20: memref<1x1x128xf32, #tpu.memory_space<vmem>>, %arg21: memref<2x128xf32, #tpu.memory_space<vmem>>, %arg22: memref<1x8x128xf32, #tpu.memory_space<vmem>>, %arg23: memref<1x1x8x128xf32, #tpu.memory_space<vmem>>, %arg24: memref<8x128xf32, #tpu.memory_space<vmem>>, %arg25: memref<8x8xf32, #tpu.memory_space<vmem>>) attributes {dimension_semantics = [#tpu.dimension_semantics<parallel>, #tpu.dimension_semantics<arbitrary>], iteration_bounds = array<i64: 2, 2>, scalar_prefetch = 0 : i64, scratch_operands = 2 : i64, tpu.core_type = #tpu.core_type<tc>, window_params = [{transform_indices = @transform_0, window_bounds = array<i64: 1, 8, 128>}, {transform_indices = @transform_1, window_bounds = array<i64: 1, 16, 128>}, {transform_indices = @transform_2, window_bounds = array<i64: 1, 1, 8>}, {transform_indices = @transform_3, window_bounds = array<i64: 1, 1, 16>}, {transform_indices = @transform_4, window_bounds = array<i64: 1, 128, 384>}, {transform_indices = @transform_5, window_bounds = array<i64: 1, 1, 384>}, {transform_indices = @transform_6, window_bounds = array<i64: 1, 128, 128>}, {transform_indices = @transform_7, window_bounds = array<i64: 1, 1, 128>}, {transform_indices = @transform_8, window_bounds = array<i64: 1, 128, 128>}, {transform_indices = @transform_9, window_bounds = array<i64: 1, 1, 128>}, {transform_indices = @transform_10, window_bounds = array<i64: 1, 128, 256>}, {transform_indices = @transform_11, window_bounds = array<i64: 1, 1, 256>}, {transform_indices = @transform_12, window_bounds = array<i64: 1, 128, 128>}, {transform_indices = @transform_13, window_bounds = array<i64: 1, 1, 128>}, {transform_indices = @transform_14, window_bounds = array<i64: 1, 6, 128>}, {transform_indices = @transform_15, window_bounds = array<i64: 1, 128, 256>}, {transform_indices = @transform_16, window_bounds = array<i64: 1, 1, 256>}, {transform_indices = @transform_17, window_bounds = array<i64: 1, 256, 128>}, {transform_indices = @transform_18, window_bounds = array<i64: 1, 1, 128>}, {pipeline_mode = #tpu.pipeline_mode<synchronous>, transform_indices = @transform_19, window_bounds = array<i64: 2, 128>}, {transform_indices = @transform_20, window_bounds = array<i64: 1, 8, 128>}, {transform_indices = @transform_21, window_bounds = array<i64: 1, 1, 8, 128>}]} {
    %c0_i32 = arith.constant 0 : i32
    %0 = arith.cmpi eq, %arg1, %c0_i32 : i32
    %1 = arith.extui %0 : i1 to i32
    %c0_i32_0 = arith.constant 0 : i32
    %2 = arith.cmpi ne, %1, %c0_i32_0 : i32
    scf.if %2 {
      %c0_124 = arith.constant 0 : index
      %c0_125 = arith.constant 0 : index
      %c0_126 = arith.constant 0 : index
      %315 = vector.load %arg2[%c0_124, %c0_125, %c0_126] : memref<1x8x128xf32, #tpu.memory_space<vmem>>, vector<1x8x128xf32>
      %316 = vector.shape_cast %315 : vector<1x8x128xf32> to vector<8x128xf32>
      %c0_127 = arith.constant 0 : index
      %c0_128 = arith.constant 0 : index
      %317 = vector.load %arg24[%c0_127, %c0_128] : memref<8x128xf32, #tpu.memory_space<vmem>>, vector<8x128xf32>
      tpu.vector_store %arg24[%c0_127, %c0_128], %316 {strides = array<i32>} : memref<8x128xf32, #tpu.memory_space<vmem>>, vector<8x128xf32>,
      %c0_129 = arith.constant 0 : index
      %c0_130 = arith.constant 0 : index
      %c0_131 = arith.constant 0 : index
      %318 = vector.load %arg4[%c0_129, %c0_130, %c0_131] : memref<1x1x8xf32, #tpu.memory_space<vmem>>, vector<1x1x8xf32>
      %319 = vector.shape_cast %318 : vector<1x1x8xf32> to vector<1x8xf32>
      %320 = tpu.iota {dimensions = array<i32: 0>} : vector<8x8xi32>
      %321 = tpu.iota {dimensions = array<i32: 1>} : vector<8x8xi32>
      %322 = arith.cmpi sgt, %321, %320 : vector<8x8xi32>
      %cst_132 = arith.constant 0.000000e+00 : f32
      %323 = vector.broadcast %cst_132 : f32 to vector<1x8xf32>
      %324 = arith.cmpf ogt, %319, %323 : vector<1x8xf32>
      %325 = vector.broadcast %324 : vector<1x8xi1> to vector<8x8xi1>
      %326 = arith.ori %322, %325 : vector<8x8xi1>
      %cst_133 = arith.constant -9.99999984E+17 : f32
      %cst_134 = arith.constant 0.000000e+00 : f32
      %327 = vector.broadcast %cst_133 : f32 to vector<8x8xf32>
      %328 = vector.broadcast %cst_134 : f32 to vector<8x8xf32>
      %329 = arith.select %326, %327, %328 : vector<8x8xi1>, vector<8x8xf32>
      %c0_135 = arith.constant 0 : index
      %c0_136 = arith.constant 0 : index
      %330 = vector.load %arg25[%c0_135, %c0_136] : memref<8x8xf32, #tpu.memory_space<vmem>>, vector<8x8xf32>
      tpu.vector_store %arg25[%c0_135, %c0_136], %329 {strides = array<i32>} : memref<8x8xf32, #tpu.memory_space<vmem>>, vector<8x8xf32>,
    } else {
    }
    %c0 = arith.constant 0 : index
    %c0_1 = arith.constant 0 : index
    %3 = vector.load %arg24[%c0, %c0_1] : memref<8x128xf32, #tpu.memory_space<vmem>>, vector<8x128xf32>
    %c0_2 = arith.constant 0 : index
    %c0_3 = arith.constant 0 : index
    %c0_4 = arith.constant 0 : index
    %4 = vector.load %arg3[%c0_2, %c0_3, %c0_4] : memref<1x16x128xf32, #tpu.memory_space<vmem>>, vector<1x16x128xf32>
    %5 = vector.shape_cast %4 : vector<1x16x128xf32> to vector<16x128xf32>
    %c0_5 = arith.constant 0 : index
    %c0_6 = arith.constant 0 : index
    %6 = vector.load %arg25[%c0_5, %c0_6] : memref<8x8xf32, #tpu.memory_space<vmem>>, vector<8x8xf32>
    %c0_7 = arith.constant 0 : index
    %c0_8 = arith.constant 0 : index
    %c0_9 = arith.constant 0 : index
    %7 = vector.load %arg5[%c0_7, %c0_8, %c0_9] : memref<1x1x16xf32, #tpu.memory_space<vmem>>, vector<1x1x16xf32>
    %8 = vector.shape_cast %7 : vector<1x1x16xf32> to vector<1x16xf32>
    %cst = arith.constant 0.000000e+00 : f32
    %9 = vector.broadcast %cst : f32 to vector<1x16xf32>
    %10 = arith.cmpf ogt, %8, %9 : vector<1x16xf32>
    %cst_10 = arith.constant -9.99999984E+17 : f32
    %cst_11 = arith.constant 0.000000e+00 : f32
    %11 = vector.broadcast %cst_10 : f32 to vector<1x16xf32>
    %12 = vector.broadcast %cst_11 : f32 to vector<1x16xf32>
    %13 = arith.select %10, %11, %12 : vector<1x16xi1>, vector<1x16xf32>
    %c0_12 = arith.constant 0 : index
    %c0_13 = arith.constant 0 : index
    %c0_14 = arith.constant 0 : index
    %14 = vector.load %arg16[%c0_12, %c0_13, %c0_14] : memref<1x6x128xf32, #tpu.memory_space<vmem>>, vector<1x6x128xf32>
    %15 = vector.shape_cast %14 : vector<1x6x128xf32> to vector<6x128xf32>
    %16 = vector.extract_strided_slice %15 {offsets = [0, 0], sizes = [1, 128], strides = [1, 1]} : vector<6x128xf32> to vector<1x128xf32>
    %17 = vector.shape_cast %16 : vector<1x128xf32> to vector<128xf32>
    %18 = vector.extract_strided_slice %15 {offsets = [1, 0], sizes = [1, 128], strides = [1, 1]} : vector<6x128xf32> to vector<1x128xf32>
    %19 = vector.shape_cast %18 : vector<1x128xf32> to vector<128xf32>
    %cst_15 = arith.constant dense<0.000000e+00> : vector<8xf32>
    %20 = vector.multi_reduction <add>, %3, %cst_15 [1] : vector<8x128xf32> to vector<8xf32>
    %21 = vector.shape_cast %20 : vector<8xf32> to vector<8x1xf32>
    %cst_16 = arith.constant 1.280000e+02 : f32
    %22 = vector.broadcast %cst_16 : f32 to vector<8x1xf32>
    %23 = arith.divf %21, %22 : vector<8x1xf32>
    %24 = vector.broadcast %23 : vector<8x1xf32> to vector<8x128xf32>
    %25 = arith.subf %3, %24 : vector<8x128xf32>
    %26 = arith.mulf %25, %25 : vector<8x128xf32>
    %cst_17 = arith.constant dense<0.000000e+00> : vector<8xf32>
    %27 = vector.multi_reduction <add>, %26, %cst_17 [1] : vector<8x128xf32> to vector<8xf32>
    %28 = vector.shape_cast %27 : vector<8xf32> to vector<8x1xf32>
    %cst_18 = arith.constant 1.280000e+02 : f32
    %29 = vector.broadcast %cst_18 : f32 to vector<8x1xf32>
    %30 = arith.divf %28, %29 : vector<8x1xf32>
    %31 = vector.broadcast %23 : vector<8x1xf32> to vector<8x128xf32>
    %32 = arith.subf %3, %31 : vector<8x128xf32>
    %cst_19 = arith.constant 9.99999997E-7 : f32
    %33 = vector.broadcast %cst_19 : f32 to vector<8x1xf32>
    %34 = arith.addf %30, %33 : vector<8x1xf32>
    %35 = math.rsqrt %34 : vector<8x1xf32>
    %36 = vector.broadcast %35 : vector<8x1xf32> to vector<8x128xf32>
    %37 = arith.mulf %32, %36 : vector<8x128xf32>
    %38 = vector.shape_cast %17 : vector<128xf32> to vector<1x128xf32>
    %39 = vector.broadcast %38 : vector<1x128xf32> to vector<8x128xf32>
    %40 = arith.mulf %37, %39 : vector<8x128xf32>
    %41 = vector.shape_cast %19 : vector<128xf32> to vector<1x128xf32>
    %42 = vector.broadcast %41 : vector<1x128xf32> to vector<8x128xf32>
    %43 = arith.addf %40, %42 : vector<8x128xf32>
    %c0_20 = arith.constant 0 : index
    %c0_21 = arith.constant 0 : index
    %c0_22 = arith.constant 0 : index
    %c0_23 = arith.constant 0 : index
    %44 = vector.load %arg23[%c0_20, %c0_21, %c0_22, %c0_23] : memref<1x1x8x128xf32, #tpu.memory_space<vmem>>, vector<1x1x8x128xf32>
    %45 = vector.shape_cast %44 : vector<1x1x8x128xf32> to vector<8x128xf32>
    %46 = vector.shape_cast %43 : vector<8x128xf32> to vector<1x1x8x128xf32>
    tpu.vector_store %arg23[%c0_20, %c0_21, %c0_22, %c0_23], %46 {strides = array<i32>} : memref<1x1x8x128xf32, #tpu.memory_space<vmem>>, vector<1x1x8x128xf32>,
    %c0_24 = arith.constant 0 : index
    %c0_25 = arith.constant 0 : index
    %c0_26 = arith.constant 0 : index
    %47 = vector.load %arg6[%c0_24, %c0_25, %c0_26] : memref<1x128x384xf32, #tpu.memory_space<vmem>>, vector<1x128x384xf32>
    %48 = vector.shape_cast %47 : vector<1x128x384xf32> to vector<128x384xf32>
    %c0_27 = arith.constant 0 : index
    %c0_28 = arith.constant 0 : index
    %c0_29 = arith.constant 0 : index
    %49 = vector.load %arg7[%c0_27, %c0_28, %c0_29] : memref<1x1x384xf32, #tpu.memory_space<vmem>>, vector<1x1x384xf32>
    %50 = vector.shape_cast %49 : vector<1x1x384xf32> to vector<1x384xf32>
    %cst_30 = arith.constant dense<0.000000e+00> : vector<8x384xf32>
    %51 = tpu.matmul %43, %48, %cst_30 {dimension_numbers = #tpu.dot_dimension_numbers<[1], [0], [0], [1], [0, 0, 1, 1], [], []>} : vector<8x128xf32>, vector<128x384xf32>, vector<8x384xf32> -> vector<8x384xf32>
    %52 = vector.broadcast %50 : vector<1x384xf32> to vector<8x384xf32>
    %53 = arith.addf %51, %52 : vector<8x384xf32>
    %54 = vector.extract_strided_slice %53 {offsets = [0, 0], sizes = [8, 128], strides = [1, 1]} : vector<8x384xf32> to vector<8x128xf32>
    %55 = vector.extract_strided_slice %53 {offsets = [0, 128], sizes = [8, 128], strides = [1, 1]} : vector<8x384xf32> to vector<8x128xf32>
    %56 = vector.extract_strided_slice %53 {offsets = [0, 256], sizes = [8, 128], strides = [1, 1]} : vector<8x384xf32> to vector<8x128xf32>
    %cst_31 = arith.constant 0.176776692 : f32
    %57 = vector.broadcast %cst_31 : f32 to vector<8x128xf32>
    %58 = arith.mulf %54, %57 : vector<8x128xf32>
    %59 = vector.extract_strided_slice %58 {offsets = [0, 0], sizes = [8, 32], strides = [1, 1]} : vector<8x128xf32> to vector<8x32xf32>
    %60 = vector.extract_strided_slice %55 {offsets = [0, 0], sizes = [8, 32], strides = [1, 1]} : vector<8x128xf32> to vector<8x32xf32>
    %61 = vector.extract_strided_slice %56 {offsets = [0, 0], sizes = [8, 32], strides = [1, 1]} : vector<8x128xf32> to vector<8x32xf32>
    %cst_32 = arith.constant dense<0.000000e+00> : vector<8x8xf32>
    %62 = tpu.matmul %59, %60, %cst_32 {dimension_numbers = #tpu.dot_dimension_numbers<[1], [1], [0], [0], [0, 0, 1, 0], [], []>} : vector<8x32xf32>, vector<8x32xf32>, vector<8x8xf32> -> vector<8x8xf32>
    %63 = arith.addf %62, %6 : vector<8x8xf32>
    %cst_33 = arith.constant dense<0xFF800000> : vector<8xf32>
    %64 = vector.multi_reduction <maximumf>, %63, %cst_33 [1] : vector<8x8xf32> to vector<8xf32>
    %65 = vector.shape_cast %64 : vector<8xf32> to vector<8x1xf32>
    %66 = vector.broadcast %65 : vector<8x1xf32> to vector<8x8xf32>
    %67 = arith.subf %63, %66 : vector<8x8xf32>
    %68 = math.exp %67 : vector<8x8xf32>
    %cst_34 = arith.constant dense<0.000000e+00> : vector<8xf32>
    %69 = vector.multi_reduction <add>, %68, %cst_34 [1] : vector<8x8xf32> to vector<8xf32>
    %70 = vector.shape_cast %69 : vector<8xf32> to vector<8x1xf32>
    %71 = tpu.reciprocal %70 {approx = true} : vector<8x1xf32> -> vector<8x1xf32>
    %72 = vector.broadcast %71 : vector<8x1xf32> to vector<8x8xf32>
    %73 = arith.mulf %68, %72 : vector<8x8xf32>
    %cst_35 = arith.constant dense<0.000000e+00> : vector<8x32xf32>
    %74 = tpu.matmul %73, %61, %cst_35 {dimension_numbers = #tpu.dot_dimension_numbers<[1], [0], [0], [1], [0, 0, 1, 1], [], []>} : vector<8x8xf32>, vector<8x32xf32>, vector<8x32xf32> -> vector<8x32xf32>
    %75 = vector.extract_strided_slice %58 {offsets = [0, 32], sizes = [8, 32], strides = [1, 1]} : vector<8x128xf32> to vector<8x32xf32>
    %76 = vector.extract_strided_slice %55 {offsets = [0, 32], sizes = [8, 32], strides = [1, 1]} : vector<8x128xf32> to vector<8x32xf32>
    %77 = vector.extract_strided_slice %56 {offsets = [0, 32], sizes = [8, 32], strides = [1, 1]} : vector<8x128xf32> to vector<8x32xf32>
    %cst_36 = arith.constant dense<0.000000e+00> : vector<8x8xf32>
    %78 = tpu.matmul %75, %76, %cst_36 {dimension_numbers = #tpu.dot_dimension_numbers<[1], [1], [0], [0], [0, 0, 1, 0], [], []>} : vector<8x32xf32>, vector<8x32xf32>, vector<8x8xf32> -> vector<8x8xf32>
    %79 = arith.addf %78, %6 : vector<8x8xf32>
    %cst_37 = arith.constant dense<0xFF800000> : vector<8xf32>
    %80 = vector.multi_reduction <maximumf>, %79, %cst_37 [1] : vector<8x8xf32> to vector<8xf32>
    %81 = vector.shape_cast %80 : vector<8xf32> to vector<8x1xf32>
    %82 = vector.broadcast %81 : vector<8x1xf32> to vector<8x8xf32>
    %83 = arith.subf %79, %82 : vector<8x8xf32>
    %84 = math.exp %83 : vector<8x8xf32>
    %cst_38 = arith.constant dense<0.000000e+00> : vector<8xf32>
    %85 = vector.multi_reduction <add>, %84, %cst_38 [1] : vector<8x8xf32> to vector<8xf32>
    %86 = vector.shape_cast %85 : vector<8xf32> to vector<8x1xf32>
    %87 = tpu.reciprocal %86 {approx = true} : vector<8x1xf32> -> vector<8x1xf32>
    %88 = vector.broadcast %87 : vector<8x1xf32> to vector<8x8xf32>
    %89 = arith.mulf %84, %88 : vector<8x8xf32>
    %cst_39 = arith.constant dense<0.000000e+00> : vector<8x32xf32>
    %90 = tpu.matmul %89, %77, %cst_39 {dimension_numbers = #tpu.dot_dimension_numbers<[1], [0], [0], [1], [0, 0, 1, 1], [], []>} : vector<8x8xf32>, vector<8x32xf32>, vector<8x32xf32> -> vector<8x32xf32>
    %91 = vector.extract_strided_slice %58 {offsets = [0, 64], sizes = [8, 32], strides = [1, 1]} : vector<8x128xf32> to vector<8x32xf32>
    %92 = vector.extract_strided_slice %55 {offsets = [0, 64], sizes = [8, 32], strides = [1, 1]} : vector<8x128xf32> to vector<8x32xf32>
    %93 = vector.extract_strided_slice %56 {offsets = [0, 64], sizes = [8, 32], strides = [1, 1]} : vector<8x128xf32> to vector<8x32xf32>
    %cst_40 = arith.constant dense<0.000000e+00> : vector<8x8xf32>
    %94 = tpu.matmul %91, %92, %cst_40 {dimension_numbers = #tpu.dot_dimension_numbers<[1], [1], [0], [0], [0, 0, 1, 0], [], []>} : vector<8x32xf32>, vector<8x32xf32>, vector<8x8xf32> -> vector<8x8xf32>
    %95 = arith.addf %94, %6 : vector<8x8xf32>
    %cst_41 = arith.constant dense<0xFF800000> : vector<8xf32>
    %96 = vector.multi_reduction <maximumf>, %95, %cst_41 [1] : vector<8x8xf32> to vector<8xf32>
    %97 = vector.shape_cast %96 : vector<8xf32> to vector<8x1xf32>
    %98 = vector.broadcast %97 : vector<8x1xf32> to vector<8x8xf32>
    %99 = arith.subf %95, %98 : vector<8x8xf32>
    %100 = math.exp %99 : vector<8x8xf32>
    %cst_42 = arith.constant dense<0.000000e+00> : vector<8xf32>
    %101 = vector.multi_reduction <add>, %100, %cst_42 [1] : vector<8x8xf32> to vector<8xf32>
    %102 = vector.shape_cast %101 : vector<8xf32> to vector<8x1xf32>
    %103 = tpu.reciprocal %102 {approx = true} : vector<8x1xf32> -> vector<8x1xf32>
    %104 = vector.broadcast %103 : vector<8x1xf32> to vector<8x8xf32>
    %105 = arith.mulf %100, %104 : vector<8x8xf32>
    %cst_43 = arith.constant dense<0.000000e+00> : vector<8x32xf32>
    %106 = tpu.matmul %105, %93, %cst_43 {dimension_numbers = #tpu.dot_dimension_numbers<[1], [0], [0], [1], [0, 0, 1, 1], [], []>} : vector<8x8xf32>, vector<8x32xf32>, vector<8x32xf32> -> vector<8x32xf32>
    %107 = vector.extract_strided_slice %58 {offsets = [0, 96], sizes = [8, 32], strides = [1, 1]} : vector<8x128xf32> to vector<8x32xf32>
    %108 = vector.extract_strided_slice %55 {offsets = [0, 96], sizes = [8, 32], strides = [1, 1]} : vector<8x128xf32> to vector<8x32xf32>
    %109 = vector.extract_strided_slice %56 {offsets = [0, 96], sizes = [8, 32], strides = [1, 1]} : vector<8x128xf32> to vector<8x32xf32>
    %cst_44 = arith.constant dense<0.000000e+00> : vector<8x8xf32>
    %110 = tpu.matmul %107, %108, %cst_44 {dimension_numbers = #tpu.dot_dimension_numbers<[1], [1], [0], [0], [0, 0, 1, 0], [], []>} : vector<8x32xf32>, vector<8x32xf32>, vector<8x8xf32> -> vector<8x8xf32>
    %111 = arith.addf %110, %6 : vector<8x8xf32>
    %cst_45 = arith.constant dense<0xFF800000> : vector<8xf32>
    %112 = vector.multi_reduction <maximumf>, %111, %cst_45 [1] : vector<8x8xf32> to vector<8xf32>
    %113 = vector.shape_cast %112 : vector<8xf32> to vector<8x1xf32>
    %114 = vector.broadcast %113 : vector<8x1xf32> to vector<8x8xf32>
    %115 = arith.subf %111, %114 : vector<8x8xf32>
    %116 = math.exp %115 : vector<8x8xf32>
    %cst_46 = arith.constant dense<0.000000e+00> : vector<8xf32>
    %117 = vector.multi_reduction <add>, %116, %cst_46 [1] : vector<8x8xf32> to vector<8xf32>
    %118 = vector.shape_cast %117 : vector<8xf32> to vector<8x1xf32>
    %119 = tpu.reciprocal %118 {approx = true} : vector<8x1xf32> -> vector<8x1xf32>
    %120 = vector.broadcast %119 : vector<8x1xf32> to vector<8x8xf32>
    %121 = arith.mulf %116, %120 : vector<8x8xf32>
    %cst_47 = arith.constant dense<0.000000e+00> : vector<8x32xf32>
    %122 = tpu.matmul %121, %109, %cst_47 {dimension_numbers = #tpu.dot_dimension_numbers<[1], [0], [0], [1], [0, 0, 1, 1], [], []>} : vector<8x8xf32>, vector<8x32xf32>, vector<8x32xf32> -> vector<8x32xf32>
    %123 = tpu.concatenate %74, %90, %106, %122 in 1 : vector<8x32xf32>, vector<8x32xf32>, vector<8x32xf32>, vector<8x32xf32> -> vector<8x128xf32>
    %c0_48 = arith.constant 0 : index
    %c0_49 = arith.constant 0 : index
    %c0_50 = arith.constant 0 : index
    %124 = vector.load %arg8[%c0_48, %c0_49, %c0_50] : memref<1x128x128xf32, #tpu.memory_space<vmem>>, vector<1x128x128xf32>
    %125 = vector.shape_cast %124 : vector<1x128x128xf32> to vector<128x128xf32>
    %c0_51 = arith.constant 0 : index
    %c0_52 = arith.constant 0 : index
    %c0_53 = arith.constant 0 : index
    %126 = vector.load %arg9[%c0_51, %c0_52, %c0_53] : memref<1x1x128xf32, #tpu.memory_space<vmem>>, vector<1x1x128xf32>
    %127 = vector.shape_cast %126 : vector<1x1x128xf32> to vector<1x128xf32>
    %cst_54 = arith.constant dense<0.000000e+00> : vector<8x128xf32>
    %128 = tpu.matmul %123, %125, %cst_54 {dimension_numbers = #tpu.dot_dimension_numbers<[1], [0], [0], [1], [0, 0, 1, 1], [], []>} : vector<8x128xf32>, vector<128x128xf32>, vector<8x128xf32> -> vector<8x128xf32>
    %129 = vector.broadcast %127 : vector<1x128xf32> to vector<8x128xf32>
    %130 = arith.addf %128, %129 : vector<8x128xf32>
    %131 = arith.addf %130, %3 : vector<8x128xf32>
    %132 = vector.extract_strided_slice %15 {offsets = [2, 0], sizes = [1, 128], strides = [1, 1]} : vector<6x128xf32> to vector<1x128xf32>
    %133 = vector.shape_cast %132 : vector<1x128xf32> to vector<128xf32>
    %134 = vector.extract_strided_slice %15 {offsets = [3, 0], sizes = [1, 128], strides = [1, 1]} : vector<6x128xf32> to vector<1x128xf32>
    %135 = vector.shape_cast %134 : vector<1x128xf32> to vector<128xf32>
    %cst_55 = arith.constant dense<0.000000e+00> : vector<8xf32>
    %136 = vector.multi_reduction <add>, %131, %cst_55 [1] : vector<8x128xf32> to vector<8xf32>
    %137 = vector.shape_cast %136 : vector<8xf32> to vector<8x1xf32>
    %cst_56 = arith.constant 1.280000e+02 : f32
    %138 = vector.broadcast %cst_56 : f32 to vector<8x1xf32>
    %139 = arith.divf %137, %138 : vector<8x1xf32>
    %140 = vector.broadcast %139 : vector<8x1xf32> to vector<8x128xf32>
    %141 = arith.subf %131, %140 : vector<8x128xf32>
    %142 = arith.mulf %141, %141 : vector<8x128xf32>
    %cst_57 = arith.constant dense<0.000000e+00> : vector<8xf32>
    %143 = vector.multi_reduction <add>, %142, %cst_57 [1] : vector<8x128xf32> to vector<8xf32>
    %144 = vector.shape_cast %143 : vector<8xf32> to vector<8x1xf32>
    %cst_58 = arith.constant 1.280000e+02 : f32
    %145 = vector.broadcast %cst_58 : f32 to vector<8x1xf32>
    %146 = arith.divf %144, %145 : vector<8x1xf32>
    %147 = vector.broadcast %139 : vector<8x1xf32> to vector<8x128xf32>
    %148 = arith.subf %131, %147 : vector<8x128xf32>
    %cst_59 = arith.constant 9.99999997E-7 : f32
    %149 = vector.broadcast %cst_59 : f32 to vector<8x1xf32>
    %150 = arith.addf %146, %149 : vector<8x1xf32>
    %151 = math.rsqrt %150 : vector<8x1xf32>
    %152 = vector.broadcast %151 : vector<8x1xf32> to vector<8x128xf32>
    %153 = arith.mulf %148, %152 : vector<8x128xf32>
    %154 = vector.shape_cast %133 : vector<128xf32> to vector<1x128xf32>
    %155 = vector.broadcast %154 : vector<1x128xf32> to vector<8x128xf32>
    %156 = arith.mulf %153, %155 : vector<8x128xf32>
    %157 = vector.shape_cast %135 : vector<128xf32> to vector<1x128xf32>
    %158 = vector.broadcast %157 : vector<1x128xf32> to vector<8x128xf32>
    %159 = arith.addf %156, %158 : vector<8x128xf32>
    %c0_60 = arith.constant 0 : index
    %c0_61 = arith.constant 0 : index
    %c0_62 = arith.constant 0 : index
    %160 = vector.load %arg10[%c0_60, %c0_61, %c0_62] : memref<1x128x128xf32, #tpu.memory_space<vmem>>, vector<1x128x128xf32>
    %161 = vector.shape_cast %160 : vector<1x128x128xf32> to vector<128x128xf32>
    %c0_63 = arith.constant 0 : index
    %c0_64 = arith.constant 0 : index
    %c0_65 = arith.constant 0 : index
    %162 = vector.load %arg11[%c0_63, %c0_64, %c0_65] : memref<1x1x128xf32, #tpu.memory_space<vmem>>, vector<1x1x128xf32>
    %163 = vector.shape_cast %162 : vector<1x1x128xf32> to vector<1x128xf32>
    %cst_66 = arith.constant dense<0.000000e+00> : vector<8x128xf32>
    %164 = tpu.matmul %159, %161, %cst_66 {dimension_numbers = #tpu.dot_dimension_numbers<[1], [0], [0], [1], [0, 0, 1, 1], [], []>} : vector<8x128xf32>, vector<128x128xf32>, vector<8x128xf32> -> vector<8x128xf32>
    %165 = vector.broadcast %163 : vector<1x128xf32> to vector<8x128xf32>
    %166 = arith.addf %164, %165 : vector<8x128xf32>
    %c0_67 = arith.constant 0 : index
    %c0_68 = arith.constant 0 : index
    %c0_69 = arith.constant 0 : index
    %167 = vector.load %arg12[%c0_67, %c0_68, %c0_69] : memref<1x128x256xf32, #tpu.memory_space<vmem>>, vector<1x128x256xf32>
    %168 = vector.shape_cast %167 : vector<1x128x256xf32> to vector<128x256xf32>
    %c0_70 = arith.constant 0 : index
    %c0_71 = arith.constant 0 : index
    %c0_72 = arith.constant 0 : index
    %169 = vector.load %arg13[%c0_70, %c0_71, %c0_72] : memref<1x1x256xf32, #tpu.memory_space<vmem>>, vector<1x1x256xf32>
    %170 = vector.shape_cast %169 : vector<1x1x256xf32> to vector<1x256xf32>
    %cst_73 = arith.constant dense<0.000000e+00> : vector<16x256xf32>
    %171 = tpu.matmul %5, %168, %cst_73 {dimension_numbers = #tpu.dot_dimension_numbers<[1], [0], [0], [1], [0, 0, 1, 1], [], []>} : vector<16x128xf32>, vector<128x256xf32>, vector<16x256xf32> -> vector<16x256xf32>
    %172 = vector.broadcast %170 : vector<1x256xf32> to vector<16x256xf32>
    %173 = arith.addf %171, %172 : vector<16x256xf32>
    %174 = vector.extract_strided_slice %173 {offsets = [0, 0], sizes = [16, 128], strides = [1, 1]} : vector<16x256xf32> to vector<16x128xf32>
    %175 = vector.extract_strided_slice %173 {offsets = [0, 128], sizes = [16, 128], strides = [1, 1]} : vector<16x256xf32> to vector<16x128xf32>
    %cst_74 = arith.constant 0.176776692 : f32
    %176 = vector.broadcast %cst_74 : f32 to vector<8x128xf32>
    %177 = arith.mulf %166, %176 : vector<8x128xf32>
    %178 = vector.extract_strided_slice %177 {offsets = [0, 0], sizes = [8, 32], strides = [1, 1]} : vector<8x128xf32> to vector<8x32xf32>
    %179 = vector.extract_strided_slice %174 {offsets = [0, 0], sizes = [16, 32], strides = [1, 1]} : vector<16x128xf32> to vector<16x32xf32>
    %180 = vector.extract_strided_slice %175 {offsets = [0, 0], sizes = [16, 32], strides = [1, 1]} : vector<16x128xf32> to vector<16x32xf32>
    %cst_75 = arith.constant dense<0.000000e+00> : vector<8x16xf32>
    %181 = tpu.matmul %178, %179, %cst_75 {dimension_numbers = #tpu.dot_dimension_numbers<[1], [1], [0], [0], [0, 0, 1, 0], [], []>} : vector<8x32xf32>, vector<16x32xf32>, vector<8x16xf32> -> vector<8x16xf32>
    %182 = vector.broadcast %13 : vector<1x16xf32> to vector<8x16xf32>
    %183 = arith.addf %181, %182 : vector<8x16xf32>
    %cst_76 = arith.constant dense<0xFF800000> : vector<8xf32>
    %184 = vector.multi_reduction <maximumf>, %183, %cst_76 [1] : vector<8x16xf32> to vector<8xf32>
    %185 = vector.shape_cast %184 : vector<8xf32> to vector<8x1xf32>
    %186 = vector.broadcast %185 : vector<8x1xf32> to vector<8x16xf32>
    %187 = arith.subf %183, %186 : vector<8x16xf32>
    %188 = math.exp %187 : vector<8x16xf32>
    %cst_77 = arith.constant dense<0.000000e+00> : vector<8xf32>
    %189 = vector.multi_reduction <add>, %188, %cst_77 [1] : vector<8x16xf32> to vector<8xf32>
    %190 = vector.shape_cast %189 : vector<8xf32> to vector<8x1xf32>
    %191 = tpu.reciprocal %190 {approx = true} : vector<8x1xf32> -> vector<8x1xf32>
    %192 = vector.broadcast %191 : vector<8x1xf32> to vector<8x16xf32>
    %193 = arith.mulf %188, %192 : vector<8x16xf32>
    %cst_78 = arith.constant dense<0.000000e+00> : vector<8x32xf32>
    %194 = tpu.matmul %193, %180, %cst_78 {dimension_numbers = #tpu.dot_dimension_numbers<[1], [0], [0], [1], [0, 0, 1, 1], [], []>} : vector<8x16xf32>, vector<16x32xf32>, vector<8x32xf32> -> vector<8x32xf32>
    %195 = vector.extract_strided_slice %177 {offsets = [0, 32], sizes = [8, 32], strides = [1, 1]} : vector<8x128xf32> to vector<8x32xf32>
    %196 = vector.extract_strided_slice %174 {offsets = [0, 32], sizes = [16, 32], strides = [1, 1]} : vector<16x128xf32> to vector<16x32xf32>
    %197 = vector.extract_strided_slice %175 {offsets = [0, 32], sizes = [16, 32], strides = [1, 1]} : vector<16x128xf32> to vector<16x32xf32>
    %cst_79 = arith.constant dense<0.000000e+00> : vector<8x16xf32>
    %198 = tpu.matmul %195, %196, %cst_79 {dimension_numbers = #tpu.dot_dimension_numbers<[1], [1], [0], [0], [0, 0, 1, 0], [], []>} : vector<8x32xf32>, vector<16x32xf32>, vector<8x16xf32> -> vector<8x16xf32>
    %199 = vector.broadcast %13 : vector<1x16xf32> to vector<8x16xf32>
    %200 = arith.addf %198, %199 : vector<8x16xf32>
    %cst_80 = arith.constant dense<0xFF800000> : vector<8xf32>
    %201 = vector.multi_reduction <maximumf>, %200, %cst_80 [1] : vector<8x16xf32> to vector<8xf32>
    %202 = vector.shape_cast %201 : vector<8xf32> to vector<8x1xf32>
    %203 = vector.broadcast %202 : vector<8x1xf32> to vector<8x16xf32>
    %204 = arith.subf %200, %203 : vector<8x16xf32>
    %205 = math.exp %204 : vector<8x16xf32>
    %cst_81 = arith.constant dense<0.000000e+00> : vector<8xf32>
    %206 = vector.multi_reduction <add>, %205, %cst_81 [1] : vector<8x16xf32> to vector<8xf32>
    %207 = vector.shape_cast %206 : vector<8xf32> to vector<8x1xf32>
    %208 = tpu.reciprocal %207 {approx = true} : vector<8x1xf32> -> vector<8x1xf32>
    %209 = vector.broadcast %208 : vector<8x1xf32> to vector<8x16xf32>
    %210 = arith.mulf %205, %209 : vector<8x16xf32>
    %cst_82 = arith.constant dense<0.000000e+00> : vector<8x32xf32>
    %211 = tpu.matmul %210, %197, %cst_82 {dimension_numbers = #tpu.dot_dimension_numbers<[1], [0], [0], [1], [0, 0, 1, 1], [], []>} : vector<8x16xf32>, vector<16x32xf32>, vector<8x32xf32> -> vector<8x32xf32>
    %212 = vector.extract_strided_slice %177 {offsets = [0, 64], sizes = [8, 32], strides = [1, 1]} : vector<8x128xf32> to vector<8x32xf32>
    %213 = vector.extract_strided_slice %174 {offsets = [0, 64], sizes = [16, 32], strides = [1, 1]} : vector<16x128xf32> to vector<16x32xf32>
    %214 = vector.extract_strided_slice %175 {offsets = [0, 64], sizes = [16, 32], strides = [1, 1]} : vector<16x128xf32> to vector<16x32xf32>
    %cst_83 = arith.constant dense<0.000000e+00> : vector<8x16xf32>
    %215 = tpu.matmul %212, %213, %cst_83 {dimension_numbers = #tpu.dot_dimension_numbers<[1], [1], [0], [0], [0, 0, 1, 0], [], []>} : vector<8x32xf32>, vector<16x32xf32>, vector<8x16xf32> -> vector<8x16xf32>
    %216 = vector.broadcast %13 : vector<1x16xf32> to vector<8x16xf32>
    %217 = arith.addf %215, %216 : vector<8x16xf32>
    %cst_84 = arith.constant dense<0xFF800000> : vector<8xf32>
    %218 = vector.multi_reduction <maximumf>, %217, %cst_84 [1] : vector<8x16xf32> to vector<8xf32>
    %219 = vector.shape_cast %218 : vector<8xf32> to vector<8x1xf32>
    %220 = vector.broadcast %219 : vector<8x1xf32> to vector<8x16xf32>
    %221 = arith.subf %217, %220 : vector<8x16xf32>
    %222 = math.exp %221 : vector<8x16xf32>
    %cst_85 = arith.constant dense<0.000000e+00> : vector<8xf32>
    %223 = vector.multi_reduction <add>, %222, %cst_85 [1] : vector<8x16xf32> to vector<8xf32>
    %224 = vector.shape_cast %223 : vector<8xf32> to vector<8x1xf32>
    %225 = tpu.reciprocal %224 {approx = true} : vector<8x1xf32> -> vector<8x1xf32>
    %226 = vector.broadcast %225 : vector<8x1xf32> to vector<8x16xf32>
    %227 = arith.mulf %222, %226 : vector<8x16xf32>
    %cst_86 = arith.constant dense<0.000000e+00> : vector<8x32xf32>
    %228 = tpu.matmul %227, %214, %cst_86 {dimension_numbers = #tpu.dot_dimension_numbers<[1], [0], [0], [1], [0, 0, 1, 1], [], []>} : vector<8x16xf32>, vector<16x32xf32>, vector<8x32xf32> -> vector<8x32xf32>
    %229 = vector.extract_strided_slice %177 {offsets = [0, 96], sizes = [8, 32], strides = [1, 1]} : vector<8x128xf32> to vector<8x32xf32>
    %230 = vector.extract_strided_slice %174 {offsets = [0, 96], sizes = [16, 32], strides = [1, 1]} : vector<16x128xf32> to vector<16x32xf32>
    %231 = vector.extract_strided_slice %175 {offsets = [0, 96], sizes = [16, 32], strides = [1, 1]} : vector<16x128xf32> to vector<16x32xf32>
    %cst_87 = arith.constant dense<0.000000e+00> : vector<8x16xf32>
    %232 = tpu.matmul %229, %230, %cst_87 {dimension_numbers = #tpu.dot_dimension_numbers<[1], [1], [0], [0], [0, 0, 1, 0], [], []>} : vector<8x32xf32>, vector<16x32xf32>, vector<8x16xf32> -> vector<8x16xf32>
    %233 = vector.broadcast %13 : vector<1x16xf32> to vector<8x16xf32>
    %234 = arith.addf %232, %233 : vector<8x16xf32>
    %cst_88 = arith.constant dense<0xFF800000> : vector<8xf32>
    %235 = vector.multi_reduction <maximumf>, %234, %cst_88 [1] : vector<8x16xf32> to vector<8xf32>
    %236 = vector.shape_cast %235 : vector<8xf32> to vector<8x1xf32>
    %237 = vector.broadcast %236 : vector<8x1xf32> to vector<8x16xf32>
    %238 = arith.subf %234, %237 : vector<8x16xf32>
    %239 = math.exp %238 : vector<8x16xf32>
    %cst_89 = arith.constant dense<0.000000e+00> : vector<8xf32>
    %240 = vector.multi_reduction <add>, %239, %cst_89 [1] : vector<8x16xf32> to vector<8xf32>
    %241 = vector.shape_cast %240 : vector<8xf32> to vector<8x1xf32>
    %242 = tpu.reciprocal %241 {approx = true} : vector<8x1xf32> -> vector<8x1xf32>
    %243 = vector.broadcast %242 : vector<8x1xf32> to vector<8x16xf32>
    %244 = arith.mulf %239, %243 : vector<8x16xf32>
    %cst_90 = arith.constant dense<0.000000e+00> : vector<8x32xf32>
    %245 = tpu.matmul %244, %231, %cst_90 {dimension_numbers = #tpu.dot_dimension_numbers<[1], [0], [0], [1], [0, 0, 1, 1], [], []>} : vector<8x16xf32>, vector<16x32xf32>, vector<8x32xf32> -> vector<8x32xf32>
    %246 = tpu.concatenate %194, %211, %228, %245 in 1 : vector<8x32xf32>, vector<8x32xf32>, vector<8x32xf32>, vector<8x32xf32> -> vector<8x128xf32>
    %c0_91 = arith.constant 0 : index
    %c0_92 = arith.constant 0 : index
    %c0_93 = arith.constant 0 : index
    %247 = vector.load %arg14[%c0_91, %c0_92, %c0_93] : memref<1x128x128xf32, #tpu.memory_space<vmem>>, vector<1x128x128xf32>
    %248 = vector.shape_cast %247 : vector<1x128x128xf32> to vector<128x128xf32>
    %c0_94 = arith.constant 0 : index
    %c0_95 = arith.constant 0 : index
    %c0_96 = arith.constant 0 : index
    %249 = vector.load %arg15[%c0_94, %c0_95, %c0_96] : memref<1x1x128xf32, #tpu.memory_space<vmem>>, vector<1x1x128xf32>
    %250 = vector.shape_cast %249 : vector<1x1x128xf32> to vector<1x128xf32>
    %cst_97 = arith.constant dense<0.000000e+00> : vector<8x128xf32>
    %251 = tpu.matmul %246, %248, %cst_97 {dimension_numbers = #tpu.dot_dimension_numbers<[1], [0], [0], [1], [0, 0, 1, 1], [], []>} : vector<8x128xf32>, vector<128x128xf32>, vector<8x128xf32> -> vector<8x128xf32>
    %252 = vector.broadcast %250 : vector<1x128xf32> to vector<8x128xf32>
    %253 = arith.addf %251, %252 : vector<8x128xf32>
    %254 = arith.addf %253, %131 : vector<8x128xf32>
    %255 = vector.extract_strided_slice %15 {offsets = [4, 0], sizes = [1, 128], strides = [1, 1]} : vector<6x128xf32> to vector<1x128xf32>
    %256 = vector.shape_cast %255 : vector<1x128xf32> to vector<128xf32>
    %257 = vector.extract_strided_slice %15 {offsets = [5, 0], sizes = [1, 128], strides = [1, 1]} : vector<6x128xf32> to vector<1x128xf32>
    %258 = vector.shape_cast %257 : vector<1x128xf32> to vector<128xf32>
    %cst_98 = arith.constant dense<0.000000e+00> : vector<8xf32>
    %259 = vector.multi_reduction <add>, %254, %cst_98 [1] : vector<8x128xf32> to vector<8xf32>
    %260 = vector.shape_cast %259 : vector<8xf32> to vector<8x1xf32>
    %cst_99 = arith.constant 1.280000e+02 : f32
    %261 = vector.broadcast %cst_99 : f32 to vector<8x1xf32>
    %262 = arith.divf %260, %261 : vector<8x1xf32>
    %263 = vector.broadcast %262 : vector<8x1xf32> to vector<8x128xf32>
    %264 = arith.subf %254, %263 : vector<8x128xf32>
    %265 = arith.mulf %264, %264 : vector<8x128xf32>
    %cst_100 = arith.constant dense<0.000000e+00> : vector<8xf32>
    %266 = vector.multi_reduction <add>, %265, %cst_100 [1] : vector<8x128xf32> to vector<8xf32>
    %267 = vector.shape_cast %266 : vector<8xf32> to vector<8x1xf32>
    %cst_101 = arith.constant 1.280000e+02 : f32
    %268 = vector.broadcast %cst_101 : f32 to vector<8x1xf32>
    %269 = arith.divf %267, %268 : vector<8x1xf32>
    %270 = vector.broadcast %262 : vector<8x1xf32> to vector<8x128xf32>
    %271 = arith.subf %254, %270 : vector<8x128xf32>
    %cst_102 = arith.constant 9.99999997E-7 : f32
    %272 = vector.broadcast %cst_102 : f32 to vector<8x1xf32>
    %273 = arith.addf %269, %272 : vector<8x1xf32>
    %274 = math.rsqrt %273 : vector<8x1xf32>
    %275 = vector.broadcast %274 : vector<8x1xf32> to vector<8x128xf32>
    %276 = arith.mulf %271, %275 : vector<8x128xf32>
    %277 = vector.shape_cast %256 : vector<128xf32> to vector<1x128xf32>
    %278 = vector.broadcast %277 : vector<1x128xf32> to vector<8x128xf32>
    %279 = arith.mulf %276, %278 : vector<8x128xf32>
    %280 = vector.shape_cast %258 : vector<128xf32> to vector<1x128xf32>
    %281 = vector.broadcast %280 : vector<1x128xf32> to vector<8x128xf32>
    %282 = arith.addf %279, %281 : vector<8x128xf32>
    %c0_103 = arith.constant 0 : index
    %c0_104 = arith.constant 0 : index
    %c0_105 = arith.constant 0 : index
    %283 = vector.load %arg17[%c0_103, %c0_104, %c0_105] : memref<1x128x256xf32, #tpu.memory_space<vmem>>, vector<1x128x256xf32>
    %284 = vector.shape_cast %283 : vector<1x128x256xf32> to vector<128x256xf32>
    %c0_106 = arith.constant 0 : index
    %c0_107 = arith.constant 0 : index
    %c0_108 = arith.constant 0 : index
    %285 = vector.load %arg18[%c0_106, %c0_107, %c0_108] : memref<1x1x256xf32, #tpu.memory_space<vmem>>, vector<1x1x256xf32>
    %286 = vector.shape_cast %285 : vector<1x1x256xf32> to vector<1x256xf32>
    %cst_109 = arith.constant dense<0.000000e+00> : vector<8x256xf32>
    %287 = tpu.matmul %282, %284, %cst_109 {dimension_numbers = #tpu.dot_dimension_numbers<[1], [0], [0], [1], [0, 0, 1, 1], [], []>} : vector<8x128xf32>, vector<128x256xf32>, vector<8x256xf32> -> vector<8x256xf32>
    %288 = vector.broadcast %286 : vector<1x256xf32> to vector<8x256xf32>
    %289 = arith.addf %287, %288 : vector<8x256xf32>
    %cst_110 = arith.constant 5.000000e-01 : f32
    %290 = vector.broadcast %cst_110 : f32 to vector<8x256xf32>
    %291 = arith.mulf %290, %289 : vector<8x256xf32>
    %cst_111 = arith.constant 4.471500e-02 : f32
    %292 = vector.broadcast %cst_111 : f32 to vector<8x256xf32>
    %293 = arith.mulf %292, %289 : vector<8x256xf32>
    %294 = arith.mulf %293, %289 : vector<8x256xf32>
    %295 = arith.mulf %294, %289 : vector<8x256xf32>
    %296 = arith.addf %289, %295 : vector<8x256xf32>
    %cst_112 = arith.constant 0.797884583 : f32
    %297 = vector.broadcast %cst_112 : f32 to vector<8x256xf32>
    %298 = arith.mulf %297, %296 : vector<8x256xf32>
    %299 = math.tanh %298 : vector<8x256xf32>
    %cst_113 = arith.constant 1.000000e+00 : f32
    %300 = vector.broadcast %cst_113 : f32 to vector<8x256xf32>
    %301 = arith.addf %300, %299 : vector<8x256xf32>
    %302 = arith.mulf %291, %301 : vector<8x256xf32>
    %c0_114 = arith.constant 0 : index
    %c0_115 = arith.constant 0 : index
    %c0_116 = arith.constant 0 : index
    %303 = vector.load %arg19[%c0_114, %c0_115, %c0_116] : memref<1x256x128xf32, #tpu.memory_space<vmem>>, vector<1x256x128xf32>
    %304 = vector.shape_cast %303 : vector<1x256x128xf32> to vector<256x128xf32>
    %c0_117 = arith.constant 0 : index
    %c0_118 = arith.constant 0 : index
    %c0_119 = arith.constant 0 : index
    %305 = vector.load %arg20[%c0_117, %c0_118, %c0_119] : memref<1x1x128xf32, #tpu.memory_space<vmem>>, vector<1x1x128xf32>
    %306 = vector.shape_cast %305 : vector<1x1x128xf32> to vector<1x128xf32>
    %cst_120 = arith.constant dense<0.000000e+00> : vector<8x128xf32>
    %307 = tpu.matmul %302, %304, %cst_120 {dimension_numbers = #tpu.dot_dimension_numbers<[1], [0], [0], [1], [0, 0, 1, 1], [], []>} : vector<8x256xf32>, vector<256x128xf32>, vector<8x128xf32> -> vector<8x128xf32>
    %308 = vector.broadcast %306 : vector<1x128xf32> to vector<8x128xf32>
    %309 = arith.addf %307, %308 : vector<8x128xf32>
    %310 = arith.addf %309, %254 : vector<8x128xf32>
    %c0_121 = arith.constant 0 : index
    %c0_122 = arith.constant 0 : index
    %311 = vector.load %arg24[%c0_121, %c0_122] : memref<8x128xf32, #tpu.memory_space<vmem>>, vector<8x128xf32>
    tpu.vector_store %arg24[%c0_121, %c0_122], %310 {strides = array<i32>} : memref<8x128xf32, #tpu.memory_space<vmem>>, vector<8x128xf32>,
    %c1_i32 = arith.constant 1 : i32
    %312 = arith.cmpi eq, %arg1, %c1_i32 : i32
    %313 = arith.extui %312 : i1 to i32
    %c0_i32_123 = arith.constant 0 : i32
    %314 = arith.cmpi ne, %313, %c0_i32_123 : i32
    scf.if %314 {
      %c0_124 = arith.constant 0 : index
      %c0_125 = arith.constant 0 : index
      %315 = vector.load %arg21[%c0_124, %c0_125] : memref<2x128xf32, #tpu.memory_space<vmem>>, vector<1x128xf32>
      %316 = vector.shape_cast %315 : vector<1x128xf32> to vector<128xf32>
      %c1 = arith.constant 1 : index
      %c0_126 = arith.constant 0 : index
      %317 = vector.load %arg21[%c1, %c0_126] : memref<2x128xf32, #tpu.memory_space<vmem>>, vector<1x128xf32>
      %318 = vector.shape_cast %317 : vector<1x128xf32> to vector<128xf32>
      %cst_127 = arith.constant dense<0.000000e+00> : vector<8xf32>
      %319 = vector.multi_reduction <add>, %310, %cst_127 [1] : vector<8x128xf32> to vector<8xf32>
      %320 = vector.shape_cast %319 : vector<8xf32> to vector<8x1xf32>
      %cst_128 = arith.constant 1.280000e+02 : f32
      %321 = vector.broadcast %cst_128 : f32 to vector<8x1xf32>
      %322 = arith.divf %320, %321 : vector<8x1xf32>
      %323 = vector.broadcast %322 : vector<8x1xf32> to vector<8x128xf32>
      %324 = arith.subf %310, %323 : vector<8x128xf32>
      %325 = arith.mulf %324, %324 : vector<8x128xf32>
      %cst_129 = arith.constant dense<0.000000e+00> : vector<8xf32>
      %326 = vector.multi_reduction <add>, %325, %cst_129 [1] : vector<8x128xf32> to vector<8xf32>
      %327 = vector.shape_cast %326 : vector<8xf32> to vector<8x1xf32>
      %cst_130 = arith.constant 1.280000e+02 : f32
      %328 = vector.broadcast %cst_130 : f32 to vector<8x1xf32>
      %329 = arith.divf %327, %328 : vector<8x1xf32>
      %330 = vector.broadcast %322 : vector<8x1xf32> to vector<8x128xf32>
      %331 = arith.subf %310, %330 : vector<8x128xf32>
      %cst_131 = arith.constant 9.99999997E-7 : f32
      %332 = vector.broadcast %cst_131 : f32 to vector<8x1xf32>
      %333 = arith.addf %329, %332 : vector<8x1xf32>
      %334 = math.rsqrt %333 : vector<8x1xf32>
      %335 = vector.broadcast %334 : vector<8x1xf32> to vector<8x128xf32>
      %336 = arith.mulf %331, %335 : vector<8x128xf32>
      %337 = vector.shape_cast %316 : vector<128xf32> to vector<1x128xf32>
      %338 = vector.broadcast %337 : vector<1x128xf32> to vector<8x128xf32>
      %339 = arith.mulf %336, %338 : vector<8x128xf32>
      %340 = vector.shape_cast %318 : vector<128xf32> to vector<1x128xf32>
      %341 = vector.broadcast %340 : vector<1x128xf32> to vector<8x128xf32>
      %342 = arith.addf %339, %341 : vector<8x128xf32>
      %c0_132 = arith.constant 0 : index
      %c0_133 = arith.constant 0 : index
      %c0_134 = arith.constant 0 : index
      %343 = vector.load %arg22[%c0_132, %c0_133, %c0_134] : memref<1x8x128xf32, #tpu.memory_space<vmem>>, vector<1x8x128xf32>
      %344 = vector.shape_cast %343 : vector<1x8x128xf32> to vector<8x128xf32>
      %345 = vector.shape_cast %342 : vector<8x128xf32> to vector<1x8x128xf32>
      tpu.vector_store %arg22[%c0_132, %c0_133, %c0_134], %345 {strides = array<i32>} : memref<1x8x128xf32, #tpu.memory_space<vmem>>, vector<1x8x128xf32>,
    } else {
    }
    return
  }
  func.func @transform_0(%arg0: i32, %arg1: i32) -> (i32, i32, i32) {
    %c0_i32 = arith.constant 0 : i32
    %c0_i32_0 = arith.constant 0 : i32
    %c0_i32_1 = arith.constant 0 : i32
    return %arg0, %c0_i32, %c0_i32_0 : i32, i32, i32
  }
  func.func @transform_1(%arg0: i32, %arg1: i32) -> (i32, i32, i32) {
    %c0_i32 = arith.constant 0 : i32
    %c0_i32_0 = arith.constant 0 : i32
    %c0_i32_1 = arith.constant 0 : i32
    return %arg0, %c0_i32, %c0_i32_0 : i32, i32, i32
  }
  func.func @transform_2(%arg0: i32, %arg1: i32) -> (i32, i32, i32) {
    %c0_i32 = arith.constant 0 : i32
    %c0_i32_0 = arith.constant 0 : i32
    %c0_i32_1 = arith.constant 0 : i32
    return %arg0, %c0_i32, %c0_i32_0 : i32, i32, i32
  }
  func.func @transform_3(%arg0: i32, %arg1: i32) -> (i32, i32, i32) {
    %c0_i32 = arith.constant 0 : i32
    %c0_i32_0 = arith.constant 0 : i32
    %c0_i32_1 = arith.constant 0 : i32
    return %arg0, %c0_i32, %c0_i32_0 : i32, i32, i32
  }
  func.func @transform_4(%arg0: i32, %arg1: i32) -> (i32, i32, i32) {
    %c0_i32 = arith.constant 0 : i32
    %c0_i32_0 = arith.constant 0 : i32
    %c0_i32_1 = arith.constant 0 : i32
    return %arg1, %c0_i32, %c0_i32_0 : i32, i32, i32
  }
  func.func @transform_5(%arg0: i32, %arg1: i32) -> (i32, i32, i32) {
    %c0_i32 = arith.constant 0 : i32
    %c0_i32_0 = arith.constant 0 : i32
    %c0_i32_1 = arith.constant 0 : i32
    return %arg1, %c0_i32, %c0_i32_0 : i32, i32, i32
  }
  func.func @transform_6(%arg0: i32, %arg1: i32) -> (i32, i32, i32) {
    %c0_i32 = arith.constant 0 : i32
    %c0_i32_0 = arith.constant 0 : i32
    %c0_i32_1 = arith.constant 0 : i32
    return %arg1, %c0_i32, %c0_i32_0 : i32, i32, i32
  }
  func.func @transform_7(%arg0: i32, %arg1: i32) -> (i32, i32, i32) {
    %c0_i32 = arith.constant 0 : i32
    %c0_i32_0 = arith.constant 0 : i32
    %c0_i32_1 = arith.constant 0 : i32
    return %arg1, %c0_i32, %c0_i32_0 : i32, i32, i32
  }
  func.func @transform_8(%arg0: i32, %arg1: i32) -> (i32, i32, i32) {
    %c0_i32 = arith.constant 0 : i32
    %c0_i32_0 = arith.constant 0 : i32
    %c0_i32_1 = arith.constant 0 : i32
    return %arg1, %c0_i32, %c0_i32_0 : i32, i32, i32
  }
  func.func @transform_9(%arg0: i32, %arg1: i32) -> (i32, i32, i32) {
    %c0_i32 = arith.constant 0 : i32
    %c0_i32_0 = arith.constant 0 : i32
    %c0_i32_1 = arith.constant 0 : i32
    return %arg1, %c0_i32, %c0_i32_0 : i32, i32, i32
  }
  func.func @transform_10(%arg0: i32, %arg1: i32) -> (i32, i32, i32) {
    %c0_i32 = arith.constant 0 : i32
    %c0_i32_0 = arith.constant 0 : i32
    %c0_i32_1 = arith.constant 0 : i32
    return %arg1, %c0_i32, %c0_i32_0 : i32, i32, i32
  }
  func.func @transform_11(%arg0: i32, %arg1: i32) -> (i32, i32, i32) {
    %c0_i32 = arith.constant 0 : i32
    %c0_i32_0 = arith.constant 0 : i32
    %c0_i32_1 = arith.constant 0 : i32
    return %arg1, %c0_i32, %c0_i32_0 : i32, i32, i32
  }
  func.func @transform_12(%arg0: i32, %arg1: i32) -> (i32, i32, i32) {
    %c0_i32 = arith.constant 0 : i32
    %c0_i32_0 = arith.constant 0 : i32
    %c0_i32_1 = arith.constant 0 : i32
    return %arg1, %c0_i32, %c0_i32_0 : i32, i32, i32
  }
  func.func @transform_13(%arg0: i32, %arg1: i32) -> (i32, i32, i32) {
    %c0_i32 = arith.constant 0 : i32
    %c0_i32_0 = arith.constant 0 : i32
    %c0_i32_1 = arith.constant 0 : i32
    return %arg1, %c0_i32, %c0_i32_0 : i32, i32, i32
  }
  func.func @transform_14(%arg0: i32, %arg1: i32) -> (i32, i32, i32) {
    %c0_i32 = arith.constant 0 : i32
    %c0_i32_0 = arith.constant 0 : i32
    %c0_i32_1 = arith.constant 0 : i32
    return %arg1, %c0_i32, %c0_i32_0 : i32, i32, i32
  }
  func.func @transform_15(%arg0: i32, %arg1: i32) -> (i32, i32, i32) {
    %c0_i32 = arith.constant 0 : i32
    %c0_i32_0 = arith.constant 0 : i32
    %c0_i32_1 = arith.constant 0 : i32
    return %arg1, %c0_i32, %c0_i32_0 : i32, i32, i32
  }
  func.func @transform_16(%arg0: i32, %arg1: i32) -> (i32, i32, i32) {
    %c0_i32 = arith.constant 0 : i32
    %c0_i32_0 = arith.constant 0 : i32
    %c0_i32_1 = arith.constant 0 : i32
    return %arg1, %c0_i32, %c0_i32_0 : i32, i32, i32
  }
  func.func @transform_17(%arg0: i32, %arg1: i32) -> (i32, i32, i32) {
    %c0_i32 = arith.constant 0 : i32
    %c0_i32_0 = arith.constant 0 : i32
    %c0_i32_1 = arith.constant 0 : i32
    return %arg1, %c0_i32, %c0_i32_0 : i32, i32, i32
  }
  func.func @transform_18(%arg0: i32, %arg1: i32) -> (i32, i32, i32) {
    %c0_i32 = arith.constant 0 : i32
    %c0_i32_0 = arith.constant 0 : i32
    %c0_i32_1 = arith.constant 0 : i32
    return %arg1, %c0_i32, %c0_i32_0 : i32, i32, i32
  }
  func.func @transform_19(%arg0: i32, %arg1: i32) -> (i32, i32) {
    %c0_i32 = arith.constant 0 : i32
    %c0_i32_0 = arith.constant 0 : i32
    %c0_i32_1 = arith.constant 0 : i32
    return %c0_i32, %c0_i32_0 : i32, i32
  }
  func.func @transform_20(%arg0: i32, %arg1: i32) -> (i32, i32, i32) {
    %c0_i32 = arith.constant 0 : i32
    %c0_i32_0 = arith.constant 0 : i32
    %c0_i32_1 = arith.constant 0 : i32
    return %arg0, %c0_i32, %c0_i32_0 : i32, i32, i32
  }
  func.func @transform_21(%arg0: i32, %arg1: i32) -> (i32, i32, i32, i32) {
    %c0_i32 = arith.constant 0 : i32
    %c0_i32_0 = arith.constant 0 : i32
    %c0_i32_1 = arith.constant 0 : i32
    return %arg1, %arg0, %c0_i32, %c0_i32_0 : i32, i32, i32, i32
  }
}

</mosaic_0001>

<bundles_post_ra>
// kernel: tpu_custom_call.1
= control target key start
LH: loop header
LB: loop body
LE: loop exit
PB: predicated region body
PF: predicated region fallthrough
CT: control target
= control target key end

     0   :  { %s6676_s0 = inlined_call_operand.vmem [shape: f32[2,8,128], index: 0, kind: input, shape index: {}]   ;;  %s6677_s1 = inlined_call_operand.hbm [shape: f32[2,16,128], index: 1, kind: input, shape index: {}]   ;;  %s6678_s2 = inlined_call_operand.vmem [shape: f32[2,1,8], index: 2, kind: input, shape index: {}]   ;;  %s6679_s3 = inlined_call_operand.vmem [shape: f32[2,1,16], index: 3, kind: input, shape index: {}]   ;;  %s6680_s4 = inlined_call_operand.hbm [shape: f32[2,128,384], index: 4, kind: input, shape index: {}]   ;;  %s6681_s5 = inlined_call_operand.vmem [shape: f32[2,1,384], index: 5, kind: input, shape index: {}]   ;;  %s6682_s6 = inlined_call_operand.hbm [shape: f32[2,128,128], index: 6, kind: input, shape index: {}]   ;;  %s6683_s7 = inlined_call_operand.vmem [shape: f32[2,1,128], index: 7, kind: input, shape index: {}]   ;;  %s6684_s8 = inlined_call_operand.hbm [shape: f32[2,128,128], index: 8, kind: input, shape index: {}]   ;;  %s6685_s9 = inlined_call_operand.vmem [shape: f32[2,1,128], index: 9, kind: input, shape index: {}]   ;;  %s6686_s10 = inlined_call_operand.hbm [shape: f32[2,128,256], index: 10, kind: input, shape index: {}]   ;;  %s6687_s11 = inlined_call_operand.vmem [shape: f32[2,1,256], index: 11, kind: input, shape index: {}]   ;;  %s6688_s12 = inlined_call_operand.hbm [shape: f32[2,128,128], index: 12, kind: input, shape index: {}]   ;;  %s6689_s13 = inlined_call_operand.vmem [shape: f32[2,1,128], index: 13, kind: input, shape index: {}]   ;;  %s6690_s14 = inlined_call_operand.vmem [shape: f32[2,6,128], index: 14, kind: input, shape index: {}]   ;;  %s6691_s15 = inlined_call_operand.hbm [shape: f32[2,128,256], index: 15, kind: input, shape index: {}]   ;;  %s6692_s16 = inlined_call_operand.vmem [shape: f32[2,1,256], index: 16, kind: input, shape index: {}]   ;;  %s6693_s17 = inlined_call_operand.hbm [shape: f32[2,256,128], index: 17, kind: input, shape index: {}]   ;;  %s6694_s18 = inlined_call_operand.vmem [shape: f32[2,1,128], index: 18, kind: input, shape index: {}]   ;;  %s6695_s19 = inlined_call_operand.vmem [shape: f32[2,128], index: 19, kind: input, shape index: {}]   ;;  %s6696_s20 = inlined_call_operand.hbm [shape: f32[2,8,128], index: 20, kind: output, shape index: {0}]   ;;  %s6697_s21 = inlined_call_operand.hbm [shape: f32[2,2,8,128], index: 21, kind: output, shape index: {1}]  }
   0x1   :  { %6761 = sst [smem:[#allocation59_spill]] %s6676_s0 }
   0x2   :  { %6762 = sst [smem:[#allocation60_spill]] %s6677_s1 }
   0x3   :  { %6763 = sst [smem:[#allocation61_spill]] %s6678_s2 }
   0x4   :  { %6764 = sst [smem:[#allocation62_spill]] %s6679_s3 }
   0x5   :  { %6765 = sst [smem:[#allocation63_spill]] %s6680_s4 }
   0x6   :  { %6766 = sst [smem:[#allocation64_spill]] %s6681_s5 }
   0x7   :  { %6767 = sst [smem:[#allocation65_spill]] %s6682_s6 }
   0x8   :  { %6768 = sst [smem:[#allocation66_spill]] %s6683_s7 }
   0x9   :  { %6769 = sst [smem:[#allocation67_spill]] %s6684_s8 }
   0xa   :  { %6770 = sst [smem:[#allocation68_spill]] %s6685_s9 }
   0xb   :  { %6771 = sst [smem:[#allocation69_spill]] %s6686_s10 }
   0xc   :  { %6772 = sst [smem:[#allocation70_spill]] %s6687_s11 }
   0xd   :  { %6773 = sst [smem:[#allocation71_spill]] %s6688_s12 }
   0xe   :  { %6774 = sst [smem:[#allocation72_spill]] %s6689_s13 }
   0xf   :  { %6775 = sst [smem:[#allocation73_spill]] %s6690_s14 }
  0x10   :  { %6776 = sst [smem:[#allocation74_spill]] %s6691_s15 }
  0x11   :  { %6777 = sst [smem:[#allocation75_spill]] %s6692_s16 }
  0x12   :  { %6778 = sst [smem:[#allocation76_spill]] %s6693_s17 }
  0x13   :  { %6779 = sst [smem:[#allocation77_spill]] %s6694_s18 }
  0x14   :  { %6780 = sst [smem:[#allocation78_spill]] %s6695_s19 }
  0x15   :  { %6781 = sst [smem:[#allocation79_spill]] %s6696_s20 }
  0x16   :  { %6782 = sst [smem:[#allocation80_spill]] %s6697_s21 }
  0x17   :  { %27 = vsyncpa [#allocation5], 0 }
  0x18   :  { %29 = vsyncpa [#allocation5 + $0x1], 0 }
  0x19   :  { %30 = vsyncpa [#allocation8], 0 }
  0x1a   :  { %32 = vsyncpa [#allocation8 + $0x1], 0 }
  0x1b   :  { %33 = vsyncpa [#allocation11], 0 }
  0x1c   :  { %35 = vsyncpa [#allocation11 + $0x1], 0 }
  0x1d   :  { %36 = vsyncpa [#allocation14], 0 }
  0x1e   :  { %38 = vsyncpa [#allocation14 + $0x1], 0 }
  0x1f   :  { %39 = vsyncpa [#allocation17], 0 }
  0x20   :  { %41 = vsyncpa [#allocation17 + $0x1], 0 }
  0x21   :  { %42 = vsyncpa [#allocation6], 0 }
  0x22   :  { %44 = vsyncpa [#allocation6 + $0x1], 0 }
  0x23   :  { %45 = vsyncpa [#allocation20], 0 }
  0x24   :  { %47 = vsyncpa [#allocation20 + $0x1], 0  ;;  %s5461_s2 = smov 0   ;;  %s5463_s25 = smov 0  }
  0x25   :  { %s5465_s26 = smov 0   ;;  %s5467_s27 = smov 0  }
  0x26   :  { %s5469_s3 = smov 0   ;;  %s5471_s28 = smov 0  }
  0x27   :  { %s5473_s29 = smov 0   ;;  %s5475_s0 = smov 0  }
  0x28   :  { %s5477_s4 = smov 0   ;;  %s5479_s30 = smov 0  }
  0x29   :  { %s5481_s5 = smov 0   ;;  %s5483_s22 = smov 0  }
  0x2a   :  { %s5485_s23 = smov 0   ;;  %s5487_s1 = smov 0  }
  0x2b LB: > { %6783 = sst [smem:[#allocation28_spill]] %s5273_s2  ;;  %p6708_p0 = scmp.eq.s32.totalorder %s5325_s1, 0  ;;  %s5325_s1 = sphi %s5487_s1, %s53_s1   ;;  %s5321_s23 = sphi %s5485_s23, %s6917_s23   ;;  %s5317_s22 = sphi %s5483_s22, %s6916_s22   ;;  %s5313_s5 = sphi %s5481_s5, %s6915_s5   ;;  %s5309_s30 = sphi %s5479_s30, %s6914_s30   ;;  %s5305_s4 = sphi %s5477_s4, %s6913_s4   ;;  %s5301_s0 = sphi %s5475_s0, %s6912_s0   ;;  %s5297_s29 = sphi %s5473_s29, %s6919_s29   ;;  %s5293_s28 = sphi %s5471_s28, %s6910_s28   ;;  %s5289_s3 = sphi %s5469_s3, %s6909_s3   ;;  %s5285_s27 = sphi %s5467_s27, %s6908_s27   ;;  %s5281_s26 = sphi %s5465_s26, %s6907_s26   ;;  %s5277_s25 = sphi %s5463_s25, %s6906_s25   ;;  %s5273_s2 = sphi %s5461_s2, %s6905_s2  }
  0x2c   : > { %6784 = sst [smem:[#allocation29_spill]] %s5277_s25  ;;  %p183_p1 = scmp.ne.s32.totalorder %s5293_s28, %s5289_s3 }
  0x2d   : > { %6785 = sst [smem:[#allocation30_spill]] %s5281_s26  ;;  %p6707_p4 = scmp.lt.s32.totalorder %s5325_s1, 4 }
  0x2e   : > { %6786 = sst [smem:[#allocation31_spill]] %s5289_s3  ;;  %p185_p3 = por %p183_p1, %p6708_p0 }
  0x2f   : > { %6787 = sst [smem:[#allocation32_spill]] %s5293_s28  ;;  %s5542_s20 = sand.u32 1, %s5325_s1  }
  0x30   : > { %6788 = sst [smem:[#allocation33_spill]] %s5297_s29  ;;  %s5545_s19 = sand.u32 1, %s5293_s28  }
  0x31   : > { %6789 = sst [smem:[#allocation34_spill]] %s5301_s0  ;;  %s4632_s18 = smul.u32 384, %s5545_s19 }
  0x32   : > { %6790 = sst [smem:[#allocation35_spill]] %s5305_s4  ;;  %s4633_s16 = smul.u32 6144, %s5317_s22 }
  0x33   : > { %6791 = sst [smem:[#allocation36_spill]] %s5309_s30  ;;  %p5551_p5 = pnand %p6707_p4, %p185_p3 }
  0x34   : > { %6792 = sst [smem:[#allocation37_spill]] %s5313_s5  ;;  %s6797_s13 = sld [smem:[#allocation63_spill]] }
  0x35   : > { %6793 = sst [smem:[#allocation38_spill]] %s5317_s22  ;;  %s699_s9 = scalar_lea.vmem [#allocation7], %s4632_s18 }
  0x36   : > { %6794 = sst [smem:[#allocation39_spill]] %s5321_s23  ;;  %s706_s7 = sshll.u32 %s699_s9, 4  ;;  %s5560_s7 = int_to_ptr.vmem [resolvable:$true] %s706_s7 }
  0x37   : > { %6795 = sst [smem:[#allocation40_spill]] %s5325_s1  ;;  %p5568_p8 = pneg %p5551_p5 }
  0x38   : > { %s6796_s14 = scalar_select %p5551_p5, 1, 0 }
  0x3a   : > { %s5558_s11 = scalar_lea.hbm %s6797_s13, %s4633_s16  ;;  %s4896_s18 = scalar_lea.hbm %s6797_s13, 12288 }
  0x3b   : > { %s4891_s5 = scalar_lea.hbm %s5558_s11, 6144  ;;  %p4897_p11 = scmp.lt.u32.totalorder %s5558_s11, %s6797_s13 }
  0x3c   : > { %p4892_p7 = scmp.ne.s32.totalorder %s5558_s11, %s4891_s5  ;;  %p4898_p12 = scmp.lt.u32.totalorder %s4896_s18, %s4891_s5 }
  0x3d   : > { %p4900_p1 = scmp.lt.u32.totalorder %s4891_s5, %s5558_s11 }
  0x3e   : > { %p4894_p9 = pnand %p5568_p8, %p4892_p7  ;;  %p4899_p13 = por %p4898_p12, %p4897_p11 }
  0x40   : > { %p4895_p10 = pneg %p4894_p9  ;;  %p4901_p3 = por %p4900_p1, %p4899_p13 }
  0x42   : > { %p4902_p4 = pnand %p4901_p3, %p4895_p10 }
  0x44   : > { %4905 = shalt.err (!%p4902_p4)
}
  0x45   : > { %s4906_s30 = scalar_lea.vmem %s5560_s7, 6144  ;;  %s5327_s16 = smov [#allocation7]  }
  0x46   : > { %p4907_p7 = scmp.ne.s32.totalorder %s5560_s7, %s4906_s30  ;;  %s4911_s21 = sshll.u32 %s5327_s16, 4  ;;  %s4912_s21 = int_to_ptr.vmem [resolvable:$false] %s4911_s21 }
  0x47   : > { %s4913_s9 = scalar_lea.vmem %s4912_s21, 12288  ;;  %p4914_p0 = scmp.lt.s32.totalorder %s5560_s7, %s4912_s21 }
  0x48   : > { %p4909_p9 = pnand %p4907_p7, %p5568_p8  ;;  %p4915_p6 = scmp.lt.s32.totalorder %s4913_s9, %s4906_s30 }
  0x4a   : > { %p4910_p2 = pneg %p4909_p9  ;;  %p4916_p11 = por %p4915_p6, %p4914_p0 }
  0x4c   : > { %p4917_p12 = pnand %p4916_p11, %p4910_p2 }
  0x4e   : > { %4920 = shalt.err (!%p4917_p12)
}
  0x4f   : > { %s5328_s5 = smov 384   ;;  %s5329_s18 = smov 24  }
  0x50   : > { %s6799_s24 = scalar_lea.sflag [#allocation8], %s5542_s20  ;;  %p892_p4 = scmp.lt.s32.totalorder %s5325_s1, 5 }
  0x51   : > { %4662 = dma.hbm_to_vmem [thread:$0]  (!%p5551_p5), %s5558_s11, 6144, %s5560_s7, %s6799_s24, %s5328_s5, %s5328_s5, %s5329_s18  }
  0x52   : > { %s5595_s30 = sshll.u32 %s5545_s19, 7  ;;  %p6800_p0 = scmp.ge.s32.totalorder %s5325_s1, 1 }
  0x53   : > { %s5604_s21 = sshll.u32 %s5317_s22, 11  ;;  %s6803_s8 = sld [smem:[#allocation67_spill]] }
  0x54   : > { %p5599_p2 = pnand %p6800_p0, %p892_p4  ;;  %s754_s7 = scalar_lea.vmem [#allocation10], %s5595_s30 }
  0x55   : > { %s761_s11 = sshll.u32 %s754_s7, 4  ;;  %s6714_s5 = scalar_lea.sflag [#allocation11], %s5542_s20  ;;  %s5613_s11 = int_to_ptr.vmem [resolvable:$true] %s761_s11 }
  0x56   : > { %s6801_s16 = scalar_select %p5599_p2, 1, 0 }
  0x58   : > { %6802 = sst [smem:[#allocation41_spill]] %s6801_s16 }
  0x59   : > { %s5610_s15 = scalar_lea.hbm %s6803_s8, %s5604_s21  ;;  %s4926_s13 = scalar_lea.hbm %s6803_s8, 4096 }
  0x5a   : > { %s4921_s18 = scalar_lea.hbm %s5610_s15, 2048  ;;  %p4927_p1 = scmp.lt.u32.totalorder %s5610_s15, %s6803_s8 }
  0x5b   : > { %p4922_p6 = scmp.ne.s32.totalorder %s5610_s15, %s4921_s18  ;;  %p4928_p3 = scmp.lt.u32.totalorder %s4926_s13, %s4921_s18 }
  0x5c   : > { %p4930_p9 = scmp.lt.u32.totalorder %s4921_s18, %s5610_s15 }
  0x5d   : > { %p4924_p10 = pnand %p4922_p6, %p5568_p8  ;;  %p4929_p7 = por %p4928_p3, %p4927_p1 }
  0x5f   : > { %p4925_p13 = pneg %p4924_p10  ;;  %p4931_p11 = por %p4930_p9, %p4929_p7 }
  0x61   : > { %p4932_p12 = pnand %p4931_p11, %p4925_p13 }
  0x63   : > { %4935 = shalt.err (!%p4932_p12)
}
  0x64   : > { %s4936_s7 = scalar_lea.vmem %s5613_s11, 2048  ;;  %s5330_s16 = smov [#allocation10]  }
  0x65   : > { %p4937_p4 = scmp.ne.s32.totalorder %s5613_s11, %s4936_s7  ;;  %s4941_s24 = sshll.u32 %s5330_s16, 4  ;;  %s4942_s24 = int_to_ptr.vmem [resolvable:$false] %s4941_s24 }
  0x66   : > { %s4943_s10 = scalar_lea.vmem %s4942_s24, 4096  ;;  %p4944_p10 = scmp.lt.s32.totalorder %s5613_s11, %s4942_s24 }
  0x67   : > { %p4939_p0 = pnand %p4937_p4, %p5568_p8  ;;  %p4945_p2 = scmp.lt.s32.totalorder %s4943_s10, %s4936_s7 }
  0x69   : > { %p4940_p6 = pneg %p4939_p0  ;;  %p4946_p1 = por %p4945_p2, %p4944_p10 }
  0x6b   : > { %p4947_p3 = pnand %p4946_p1, %p4940_p6 }
  0x6d   : > { %4950 = shalt.err (!%p4947_p3)
}
  0x6e   : > { %s6716_s18 = smov 128   ;;  %s6718_s13 = smov 8  }
  0x6f   : > { %4668 = dma.hbm_to_vmem [thread:$0]  (!%p5551_p5), %s5610_s15, 2048, %s5613_s11, %s6714_s5, %s6716_s18, %s6716_s18, %s6718_s13  }
  0x70   : > { %s6804_s12 = sld [smem:[#allocation71_spill]]  ;;  %s809_s24 = scalar_lea.vmem [#allocation13], %s5595_s30 }
  0x71   : > { %s816_s10 = sshll.u32 %s809_s24, 4  ;;  %s6715_s8 = scalar_lea.sflag [#allocation14], %s5542_s20  ;;  %s5649_s10 = int_to_ptr.vmem [resolvable:$true] %s816_s10 }
  0x76   : > { %s5646_s16 = scalar_lea.hbm %s6804_s12, %s5604_s21  ;;  %s4956_s9 = scalar_lea.hbm %s6804_s12, 4096 }
  0x77   : > { %s4951_s6 = scalar_lea.hbm %s5646_s16, 2048  ;;  %p4957_p9 = scmp.lt.u32.totalorder %s5646_s16, %s6804_s12 }
  0x78   : > { %p4952_p2 = scmp.ne.s32.totalorder %s5646_s16, %s4951_s6  ;;  %p4958_p11 = scmp.lt.u32.totalorder %s4956_s9, %s4951_s6 }
  0x79   : > { %p4960_p4 = scmp.lt.u32.totalorder %s4951_s6, %s5646_s16 }
  0x7a   : > { %p4954_p13 = pnand %p4952_p2, %p5568_p8  ;;  %p4959_p12 = por %p4958_p11, %p4957_p9 }
  0x7c   : > { %p4955_p7 = pneg %p4954_p13  ;;  %p4961_p0 = por %p4960_p4, %p4959_p12 }
  0x7e   : > { %p4962_p6 = pnand %p4961_p0, %p4955_p7 }
  0x80   : > { %4965 = shalt.err (!%p4962_p6)
}
  0x81   : > { %s4966_s24 = scalar_lea.vmem %s5649_s10, 2048  ;;  %s5333_s15 = smov [#allocation13]  }
  0x82   : > { %p4967_p10 = scmp.ne.s32.totalorder %s5649_s10, %s4966_s24  ;;  %s4971_s11 = sshll.u32 %s5333_s15, 4  ;;  %s4972_s11 = int_to_ptr.vmem [resolvable:$false] %s4971_s11 }
  0x83   : > { %s4973_s5 = scalar_lea.vmem %s4972_s11, 4096  ;;  %p4974_p2 = scmp.lt.s32.totalorder %s5649_s10, %s4972_s11 }
  0x84   : > { %p4969_p1 = pnand %p4967_p10, %p5568_p8  ;;  %p4975_p13 = scmp.lt.s32.totalorder %s4973_s5, %s4966_s24 }
  0x86   : > { %p4970_p3 = pneg %p4969_p1  ;;  %p4976_p9 = por %p4975_p13, %p4974_p2 }
  0x88   : > { %p4977_p11 = pnand %p4976_p9, %p4970_p3 }
  0x8a   : > { %4980 = shalt.err (!%p4977_p11)
}
  0x8b   : > { %4674 = dma.hbm_to_vmem [thread:$0]  (!%p5551_p5), %s5646_s16, 2048, %s5649_s10, %s6715_s8, %s6716_s18, %s6716_s18, %s6718_s13  }
  0x8c   : > { %s5679_s6 = sadd.s32 4294967295, %s5325_s1   ;;  %s3912_s9 = sadd.s32 4294967294, %s5325_s1  }
  0x8d   : > { %s6805_s7 = sadd.s32 1, %s5317_s22  ;;  %s65_s24 = sadd.s32 1, %s5321_s23 }
  0x8e   : > { %p63_p7 = scmp.ge.s32.totalorder %s6805_s7, 2  ;;  %s98_s15 = sadd.s32 1, %s5305_s4 }
  0x8f   : > { %p105_p12 = scmp.ne.s32.totalorder %s5305_s4, %s5301_s0  ;;  %s6806_s11 = smov %s6805_s7 }
  0x90   : > { %s6921_s11 = smov (%p63_p7, %s6806_s11), 0  ;;  %s6923_s24 = smov (!%p63_p7, %s65_s24), %s5321_s23 }
  0x91   : > { %6807 = sst [smem:[#allocation42_spill]] %s6921_s11  ;;  %p6808_p4 = scmp.eq.s32.totalorder %s5325_s1, 0 }
  0x92   : > { %p111_p6 = scmp.ne.s32.totalorder %s5301_s0, %s5297_s29  ;;  %p67_p10 = scmp.ge.s32.totalorder %s6923_s24, 2 }
  0x93   : > { %p5698_p0 = por %p6808_p4, %p105_p12  ;;  %p112_p1 = scmp.eq.s32.totalorder %s5679_s6, 0 }
  0x94   : > { %s173_s10 = ssub.s32 %s5317_s22, %s6921_s11  ;;  %p598_p3 = scmp.eq.s32.totalorder %s5679_s6, 3 }
  0x95   : > { %s6925_s24 = smov (%p67_p10, %s6923_s24), 0  ;;  %p5713_p2 = por %p112_p1, %p111_p6 }
  0x96   : > { %6810 = sst [smem:[#allocation43_spill]] %s6925_s24  ;;  %p174_p13 = scmp.eq.s32.totalorder %s173_s10, 0 }
  0x97   : > { %s6811_s5 = scalar_select %p5713_p2, 1, 0 }
  0x98   : > { %s95_s7 = ssub.s32 %s5321_s23, %s6925_s24  ;;  %p6812_p9 = scmp.ne.s32.totalorder %s5289_s3, %s5285_s27 }
  0x99   : > { %p96_p7 = scmp.eq.s32.totalorder %s95_s7, 0  ;;  %p5731_p4 = por %p598_p3, %p105_p12 }
  0x9a   : > { %p5722_p11 = por %p6812_p9, %p112_p1  ;;  %s6817_s13 = sadd.s32 1, %s5293_s28 }
  0x9b   : > { %s6815_s18 = scalar_select %p5731_p4, 1, 0 }
  0x9c   : > { %s6813_s8 = scalar_select %p5722_p11, 1, 0 }
  0x9d   : > { %6816 = sst [smem:[#allocation45_spill]] %s6815_s18  ;;  %p604_p10 = scmp.eq.s32.totalorder %s3912_s9, 3 }
  0x9e   : > { %6814 = sst [smem:[#allocation44_spill]] %s6813_s8  ;;  %s612_s27 = sor.u32 %s173_s10, %s95_s7 }
  0x9f   : > { %s5738_s12 = scalar_select %p174_p13, %s5293_s28, %s6817_s13  }
  0xa0   : > { %s5741_s11 = scalar_select %p96_p7, %s5305_s4, %s98_s15  }
  0xa1   : > { %6818 = sst [smem:[#allocation46_spill]] %s5738_s12  ;;  %p613_p1 = scmp.eq.s32.totalorder %s612_s27, 0 }
  0xa2   : > { %6819 = sst [smem:[#allocation47_spill]] %s5741_s11  ;;  %s615_s24 = sadd.s32 1, %s5281_s26 }
  0xa3   : > { %p5747_p9 = por %p604_p10, %p111_p6  ;;  %p625_p12 = scmp.ne.s32.totalorder %s5281_s26, %s5277_s25 }
  0xa4   : > { %s5754_s3 = scalar_select %p613_p1, %s5281_s26, %s615_s24  }
  0xa5   : > { %s6820_s8 = scalar_select %p5747_p9, 1, 0 }
  0xa6   : > { %6822 = sst [smem:[#allocation49_spill]] %s5754_s3  ;;  %p5758_p4 = por %p625_p12, %p598_p3 }
  0xa7   : > { %6821 = sst [smem:[#allocation48_spill]] %s6820_s8  ;;  %p631_p13 = scmp.ne.s32.totalorder %s5277_s25, %s5273_s2 }
  0xa8   : > { %s6823_s13 = scalar_select %p5758_p4, 1, 0 }
  0xa9   : > { %s662_s15 = sand.u32 1, %s5305_s4   ;;  %s3994_s11 = sshll.u32 %s5321_s23, 8 }
  0xaa   : > { %6824 = sst [smem:[#allocation50_spill]] %s6823_s13  ;;  %p5766_p7 = por %p631_p13, %p604_p10 }
  0xab   : > { %s3915_s10 = sshll.u32 %s662_s15, 4  ;;  %s6827_s12 = sld [smem:[#allocation60_spill]] }
  0xac   : > { %s6825_s9 = scalar_select %p5766_p7, 1, 0 }
  0xad   : > { %p6828_p6 = scmp.lt.s32.totalorder %s5325_s1, 4  ;;  %s666_s23 = scalar_lea.vmem [#allocation4], %s3915_s10 }
  0xae   : > { %6826 = sst [smem:[#allocation51_spill]] %s6825_s9  ;;  %s673_s4 = sshll.u32 %s666_s23, 4  ;;  %s5783_s4 = int_to_ptr.vmem [resolvable:$true] %s673_s4 }
  0xaf   : > { %p5779_p3 = pnand %p6828_p6, %p5698_p0  ;;  %s5785_s3 = scalar_lea.sflag [#allocation5], %s662_s15 }
  0xb1   : > { %s5773_s28 = scalar_lea.hbm %s6827_s12, %s3994_s11  ;;  %p4983_p1 = pneg %p5779_p3 }
  0xb2   : > { %s4981_s11 = scalar_lea.hbm %s5773_s28, 256  ;;  %s4986_s27 = scalar_lea.hbm %s6827_s12, 512 }
  0xb3   : > { %p4982_p10 = scmp.ne.s32.totalorder %s5773_s28, %s4981_s11  ;;  %p4987_p0 = scmp.lt.u32.totalorder %s5773_s28, %s6827_s12 }
  0xb4   : > { %p4988_p6 = scmp.lt.u32.totalorder %s4986_s27, %s4981_s11  ;;  %p4990_p9 = scmp.lt.u32.totalorder %s4981_s11, %s5773_s28 }
  0xb5   : > { %p4984_p12 = pnand %p4983_p1, %p4982_p10 }
  0xb6   : > { %p4989_p7 = por %p4988_p6, %p4987_p0 }
  0xb7   : > { %p4985_p13 = pneg %p4984_p12 }
  0xb8   : > { %p4991_p4 = por %p4990_p9, %p4989_p7 }
  0xba   : > { %p4992_p11 = pnand %p4991_p4, %p4985_p13 }
  0xbc   : > { %4995 = shalt.err (!%p4992_p11)
}
  0xbd   : > { %s4996_s23 = scalar_lea.vmem %s5783_s4, 256  ;;  %s5334_s15 = smov [#allocation4]  }
  0xbe   : > { %p4997_p10 = scmp.ne.s32.totalorder %s5783_s4, %s4996_s23  ;;  %s5001_s10 = sshll.u32 %s5334_s15, 4  ;;  %s5002_s10 = int_to_ptr.vmem [resolvable:$false] %s5001_s10 }
  0xbf   : > { %s5003_s26 = scalar_lea.vmem %s5002_s10, 512  ;;  %p5004_p5 = scmp.lt.s32.totalorder %s5783_s4, %s5002_s10 }
  0xc0   : > { %p4999_p12 = pnand %p4997_p10, %p4983_p1  ;;  %p5005_p0 = scmp.lt.s32.totalorder %s5003_s26, %s4996_s23 }
  0xc2   : > { %p5000_p2 = pneg %p4999_p12  ;;  %p5006_p6 = por %p5005_p0, %p5004_p5 }
  0xc4   : > { %p5007_p9 = pnand %p5006_p6, %p5000_p2 }
  0xc6   : > { %5010 = shalt.err (!%p5007_p9)
}
  0xc7   : > { %s6830_s9 = smov 8   ;;  %s6831_s11 = smov 128  }
  0xc8   : > { %4659 = dma.hbm_to_vmem [thread:$0]  (!%p5779_p3), %s5773_s28, 256, %s5783_s4, %s5785_s3, %s6831_s11, %s6831_s11, %s6830_s9  }
  0xc9   : > { %s6832_s27 = sld [smem:[#allocation65_spill]]  ;;  %s727_s24 = scalar_lea.vmem [#allocation9], %s5595_s30 }
  0xca   : > { %s734_s10 = sshll.u32 %s727_s24, 4  ;;  %s5826_s26 = sshll.u32 %s5545_s19, 8  ;;  %s5823_s10 = int_to_ptr.vmem [resolvable:$true] %s734_s10 }
  0xcf   : > { %s6833_s15 = smov %s6832_s27  ;;  %s5820_s23 = scalar_lea.hbm %s6832_s27, %s5604_s21 }
  0xd0   : > { %s5011_s12 = scalar_lea.hbm %s5820_s23, 2048  ;;  %s5016_s4 = scalar_lea.hbm %s6833_s15, 4096 }
  0xd1   : > { %p5012_p5 = scmp.ne.s32.totalorder %s5820_s23, %s5011_s12  ;;  %p5017_p4 = scmp.lt.u32.totalorder %s5820_s23, %s6833_s15 }
  0xd2   : > { %p5018_p7 = scmp.lt.u32.totalorder %s5016_s4, %s5011_s12  ;;  %p5020_p1 = scmp.lt.u32.totalorder %s5011_s12, %s5820_s23 }
  0xd3   : > { %p5014_p2 = pnand %p5012_p5, %p5568_p8 }
  0xd4   : > { %p5019_p3 = por %p5018_p7, %p5017_p4 }
  0xd5   : > { %p5015_p11 = pneg %p5014_p2 }
  0xd6   : > { %p5021_p13 = por %p5020_p1, %p5019_p3 }
  0xd8   : > { %p5022_p10 = pnand %p5021_p13, %p5015_p11 }
  0xda   : > { %5025 = shalt.err (!%p5022_p10)
}
  0xdb   : > { %s5026_s30 = scalar_lea.vmem %s5823_s10, 2048  ;;  %s5335_s7 = smov [#allocation9]  }
  0xdc   : > { %p5027_p12 = scmp.ne.s32.totalorder %s5823_s10, %s5026_s30  ;;  %s5031_s27 = sshll.u32 %s5335_s7, 4  ;;  %s5032_s27 = int_to_ptr.vmem [resolvable:$false] %s5031_s27 }
  0xdd   : > { %s5033_s24 = scalar_lea.vmem %s5032_s27, 4096  ;;  %p5034_p9 = scmp.lt.s32.totalorder %s5823_s10, %s5032_s27 }
  0xde   : > { %p5029_p0 = pnand %p5027_p12, %p5568_p8  ;;  %p5035_p5 = scmp.lt.s32.totalorder %s5033_s24, %s5026_s30 }
  0xe0   : > { %p5030_p6 = pneg %p5029_p0  ;;  %p5036_p2 = por %p5035_p5, %p5034_p9 }
  0xe2   : > { %p5037_p4 = pnand %p5036_p2, %p5030_p6 }
  0xe4   : > { %5040 = shalt.err (!%p5037_p4)
}
  0xe5   : > { %p6834_p11 = scmp.ne.s32.totalorder %s6796_s14, 0  ;;  %s6835_s12 = scalar_lea.sflag [#allocation8], %s5542_s20 }
  0xe6   : > { %s5855_s3 = sshll.u32 %s5317_s22, 12  ;;  %s6836_s21 = sld [smem:[#allocation69_spill]] }
  0xe7   : > { %4665 = dma.hbm_to_vmem [thread:$0]  (!%p6834_p11), %s5820_s23, 2048, %s5823_s10, %s6835_s12, %s6831_s11, %s6831_s11, %s6830_s9  }
  0xe8   : > { %s781_s30 = scalar_lea.vmem [#allocation12], %s5826_s26 }
  0xe9   : > { %s788_s7 = sshll.u32 %s781_s30, 4  ;;  %s5864_s7 = int_to_ptr.vmem [resolvable:$true] %s788_s7 }
  0xec   : > { %s5861_s16 = scalar_lea.hbm %s6836_s21, %s5855_s3  ;;  %s5046_s24 = scalar_lea.hbm %s6836_s21, 8192 }
  0xed   : > { %s5041_s27 = scalar_lea.hbm %s5861_s16, 4096  ;;  %p5047_p13 = scmp.lt.u32.totalorder %s5861_s16, %s6836_s21 }
  0xee   : > { %p5042_p7 = scmp.ne.s32.totalorder %s5861_s16, %s5041_s27  ;;  %p5048_p10 = scmp.lt.u32.totalorder %s5046_s24, %s5041_s27 }
  0xef   : > { %p5050_p0 = scmp.lt.u32.totalorder %s5041_s27, %s5861_s16 }
  0xf0   : > { %p5044_p3 = pnand %p5042_p7, %p5568_p8  ;;  %p5049_p12 = por %p5048_p10, %p5047_p13 }
  0xf2   : > { %p5045_p1 = pneg %p5044_p3  ;;  %p5051_p6 = por %p5050_p0, %p5049_p12 }
  0xf4   : > { %p5052_p9 = pnand %p5051_p6, %p5045_p1 }
  0xf6   : > { %5055 = shalt.err (!%p5052_p9)
}
  0xf7   : > { %s5056_s4 = scalar_lea.vmem %s5864_s7, 4096  ;;  %s5336_s30 = smov [#allocation12]  }
  0xf8   : > { %p5057_p5 = scmp.ne.s32.totalorder %s5864_s7, %s5056_s4  ;;  %s5061_s23 = sshll.u32 %s5336_s30, 4  ;;  %s5062_s23 = int_to_ptr.vmem [resolvable:$false] %s5061_s23 }
  0xf9   : > { %s5063_s10 = scalar_lea.vmem %s5062_s23, 8192  ;;  %p5064_p7 = scmp.lt.s32.totalorder %s5864_s7, %s5062_s23 }
  0xfa   : > { %p5059_p2 = pnand %p5057_p5, %p5568_p8  ;;  %p5065_p3 = scmp.lt.s32.totalorder %s5063_s10, %s5056_s4 }
  0xfc   : > { %p5060_p4 = pneg %p5059_p2  ;;  %p5066_p13 = por %p5065_p3, %p5064_p7 }
  0xfe   : > { %p5067_p10 = pnand %p5066_p13, %p5060_p4 }
 0x100   : > { %5070 = shalt.err (!%p5067_p10)
}
 0x101   : > { %s5337_s27 = smov 256   ;;  %s5338_s24 = smov 16  }
 0x102   : > { %s6837_s12 = scalar_lea.sflag [#allocation11], %s5542_s20  ;;  %s6838_s30 = sld [smem:[#allocation74_spill]] }
 0x103   : > { %4671 = dma.hbm_to_vmem [thread:$0]  (!%p6834_p11), %s5861_s16, 4096, %s5864_s7, %s6837_s12, %s5337_s27, %s5337_s27, %s5338_s24  }
 0x104   : > { %s843_s15 = scalar_lea.vmem [#allocation15], %s5826_s26 }
 0x105   : > { %s850_s21 = sshll.u32 %s843_s15, 4  ;;  %s5899_s21 = int_to_ptr.vmem [resolvable:$true] %s850_s21 }
 0x108   : > { %s6839_s10 = smov %s6838_s30  ;;  %s5896_s23 = scalar_lea.hbm %s6838_s30, %s5855_s3 }
 0x109   : > { %s5071_s22 = scalar_lea.hbm %s5896_s23, 4096  ;;  %s5076_s7 = scalar_lea.hbm %s6839_s10, 8192 }
 0x10a   : > { %p5072_p1 = scmp.ne.s32.totalorder %s5896_s23, %s5071_s22  ;;  %p5077_p6 = scmp.lt.u32.totalorder %s5896_s23, %s6839_s10 }
 0x10b   : > { %p5078_p9 = scmp.lt.u32.totalorder %s5076_s7, %s5071_s22  ;;  %p5080_p2 = scmp.lt.u32.totalorder %s5071_s22, %s5896_s23 }
 0x10c   : > { %p5074_p12 = pnand %p5072_p1, %p5568_p8 }
 0x10d   : > { %p5079_p5 = por %p5078_p9, %p5077_p6 }
 0x10e   : > { %p5075_p0 = pneg %p5074_p12 }
 0x10f   : > { %p5081_p4 = por %p5080_p2, %p5079_p5 }
 0x111   : > { %p5082_p7 = pnand %p5081_p4, %p5075_p0 }
 0x113   : > { %5085 = shalt.err (!%p5082_p7)
}
 0x114   : > { %s5086_s15 = scalar_lea.vmem %s5899_s21, 4096  ;;  %s5339_s2 = smov [#allocation15]  }
 0x115   : > { %p5087_p3 = scmp.ne.s32.totalorder %s5899_s21, %s5086_s15  ;;  %s5091_s4 = sshll.u32 %s5339_s2, 4  ;;  %s5092_s4 = int_to_ptr.vmem [resolvable:$false] %s5091_s4 }
 0x116   : > { %s5093_s30 = scalar_lea.vmem %s5092_s4, 8192  ;;  %p5094_p1 = scmp.lt.s32.totalorder %s5899_s21, %s5092_s4 }
 0x117   : > { %p5089_p13 = pnand %p5087_p3, %p5568_p8  ;;  %p5095_p12 = scmp.lt.s32.totalorder %s5093_s30, %s5086_s15 }
 0x119   : > { %p5090_p10 = pneg %p5089_p13  ;;  %p5096_p6 = por %p5095_p12, %p5094_p1 }
 0x11b   : > { %p5097_p9 = pnand %p5096_p6, %p5090_p10 }
 0x11d   : > { %5100 = shalt.err (!%p5097_p9)
}
 0x11e   : > { %s6840_s22 = scalar_lea.sflag [#allocation14], %s5542_s20  ;;  %s6841_s12 = sld [smem:[#allocation76_spill]] }
 0x11f   : > { %4677 = dma.hbm_to_vmem [thread:$0]  (!%p6834_p11), %s5896_s23, 4096, %s5899_s21, %s6840_s22, %s5337_s27, %s5337_s27, %s5338_s24  }
 0x120   : > { %s871_s15 = scalar_lea.vmem [#allocation16], %s5826_s26  ;;  %s868_s20 = scalar_lea.sflag [#allocation17], %s5545_s19 }
 0x121   : > { %s878_s2 = sshll.u32 %s871_s15, 4  ;;  %s5934_s2 = int_to_ptr.vmem [resolvable:$true] %s878_s2 }
 0x124   : > { %s5931_s28 = scalar_lea.hbm %s6841_s12, %s5855_s3  ;;  %s5106_s24 = scalar_lea.hbm %s6841_s12, 8192 }
 0x125   : > { %s5101_s4 = scalar_lea.hbm %s5931_s28, 4096  ;;  %p5107_p4 = scmp.lt.u32.totalorder %s5931_s28, %s6841_s12 }
 0x126   : > { %p5102_p0 = scmp.ne.s32.totalorder %s5931_s28, %s5101_s4  ;;  %p5108_p7 = scmp.lt.u32.totalorder %s5106_s24, %s5101_s4 }
 0x127   : > { %p5110_p13 = scmp.lt.u32.totalorder %s5101_s4, %s5931_s28 }
 0x128   : > { %p5104_p5 = pnand %p5102_p0, %p5568_p8  ;;  %p5109_p3 = por %p5108_p7, %p5107_p4 }
 0x12a   : > { %p5105_p2 = pneg %p5104_p5  ;;  %p5111_p10 = por %p5110_p13, %p5109_p3 }
 0x12c   : > { %p5112_p1 = pnand %p5111_p10, %p5105_p2 }
 0x12e   : > { %5115 = shalt.err (!%p5112_p1)
}
 0x12f   : > { %s5116_s26 = scalar_lea.vmem %s5934_s2, 4096  ;;  %s5340_s30 = smov [#allocation16]  }
 0x130   : > { %p5117_p12 = scmp.ne.s32.totalorder %s5934_s2, %s5116_s26  ;;  %s5121_s22 = sshll.u32 %s5340_s30, 4  ;;  %s5122_s22 = int_to_ptr.vmem [resolvable:$false] %s5121_s22 }
 0x131   : > { %s5123_s16 = scalar_lea.vmem %s5122_s22, 8192  ;;  %p5124_p0 = scmp.lt.s32.totalorder %s5934_s2, %s5122_s22 }
 0x132   : > { %p5119_p6 = pnand %p5117_p12, %p5568_p8  ;;  %p5125_p5 = scmp.lt.s32.totalorder %s5123_s16, %s5116_s26 }
 0x134   : > { %p5120_p9 = pneg %p5119_p6  ;;  %p5126_p4 = por %p5125_p5, %p5124_p0 }
 0x136   : > { %p5127_p7 = pnand %p5126_p4, %p5120_p9 }
 0x138   : > { %5130 = shalt.err (!%p5127_p7)
}
 0x139   : > { %4680 = dma.hbm_to_vmem [thread:$0]  (!%p6834_p11), %s5931_s28, 4096, %s5934_s2, %s868_s20, %s6831_s11, %s6831_s11, %s6830_s9  }
 0x13a   : > { %s6842_s17 = sld [smem:[#allocation41_spill]] }
 0x140   : > { %p6843_p8 = scmp.ne.s32.totalorder %s6842_s17, 0 }
 0x142   : > { %896 = sbr.rel (%p6843_p8) target bundleno = 6875 (0x1adb), region = 100 }
 0x149   : > { %s5966_s7 = sand.u32 1, %s5301_s0   ;;  %p6846_p2 = scmp.ne.s32.totalorder %s6811_s5, 0 }
 0x14a   : > { %6844 = sst [smem:[#allocation52_spill]] %s5966_s7  ;;  %s3938_s15 = sshll.u32 %s5966_s7, 4 }
 0x14b   : > { %s899_s4 = scalar_lea.sflag [#allocation5], %s5966_s7  ;;  %s5970_s14 = scalar_lea.vmem [#allocation4], %s3938_s15 }
 0x14c   : > { %6845 = sst [smem:[#allocation53_spill]] %s5970_s14 }
 0x14d   : > { %5244 = dma.done.wait (%p6846_p2), %s899_s4, 256  }
 0x14e   : > { %5246 = vsyncadd (%p6846_p2), %s899_s4, 4294967040  ;;  %s6847_s19 = sld [smem:[#allocation31_spill]]  ;;  %s6848_s9 = sld [smem:[#allocation44_spill]] }
 0x14f   : > { %s907_s11 = sand.u32 1, %s5679_s6  }
 0x150   : > { %s908_s20 = scalar_lea.sflag [#allocation8], %s907_s11 }
 0x154   : > { %s909_s28 = sand.u32 1, %s6847_s19   ;;  %p6849_p11 = scmp.ne.s32.totalorder %s6848_s9, 0 }
 0x155   : > { %s4634_s2 = smul.u32 384, %s909_s28 }
 0x157   : > { %s5978_s21 = scalar_lea.vmem [#allocation7], %s4634_s2 }
 0x158   : > { %5248 = dma.done.wait (%p6849_p11), %s908_s20, 8192  }
 0x159   : > { %5250 = vsyncadd (%p6849_p11), %s908_s20, 4294959104  ;;  %s3939_s27 = sshll.u32 %s909_s28, 7  ;;  %s926_s5 = scalar_lea.sflag [#allocation11], %s907_s11 }
 0x15a   : > { %s5984_s24 = scalar_lea.vmem [#allocation9], %s3939_s27  ;;  %s5986_s3 = scalar_lea.vmem [#allocation10], %s3939_s27 }
 0x15b   : > { %6850 = sst [smem:[#allocation54_spill]] %s5986_s3 }
 0x15c   : > { %5252 = dma.done.wait (%p6849_p11), %s926_s5, 6144  }
 0x15d   : > { %5254 = vsyncadd (%p6849_p11), %s926_s5, 4294961152  ;;  %s3941_s6 = sshll.u32 %s909_s28, 8  ;;  %s944_s26 = scalar_lea.sflag [#allocation14], %s907_s11 }
 0x15e   : > { %s5992_s23 = scalar_lea.vmem [#allocation12], %s3941_s6  ;;  %s5994_s30 = scalar_lea.vmem [#allocation13], %s3939_s27 }
 0x15f   : > { %6851 = sst [smem:[#allocation55_spill]] %s5992_s23 }
 0x160   : > { %6852 = sst [smem:[#allocation56_spill]] %s5994_s30 }
 0x161   : > { %5256 = dma.done.wait (%p6849_p11), %s944_s26, 6144  }
 0x162   : > { %5258 = vsyncadd (%p6849_p11), %s944_s26, 4294961152  ;;  %s6000_s22 = scalar_lea.vmem [#allocation15], %s3941_s6  ;;  %s962_s16 = scalar_lea.sflag [#allocation17], %s909_s28 }
 0x163   : > { %6853 = sst [smem:[#allocation57_spill]] %s6000_s22  ;;  %s6002_s17 = scalar_lea.vmem [#allocation16], %s3941_s6 }
 0x164   : > { %6854 = sst [smem:[#allocation58_spill]] %s6002_s17 }
 0x165   : > { %5260 = dma.done.wait (%p6849_p11), %s962_s16, 4096  }
 0x166   : > { %5262 = vsyncadd (%p6849_p11), %s962_s16, 4294963200  ;;  %s6855_s15 = sld [smem:[#allocation37_spill]]  ;;  %s6856_s4 = sld [smem:[#allocation36_spill]] }
 0x167   : > { %s3945_s19 = sshll.u32 %s5966_s7, 3  ;;  %s6741_s11 = sand.u32 1, %s5277_s25  }
 0x168   : > { %s6012_s2 = sshll.u32 %s6741_s11, 3  ;;  %s6857_s5 = sld [smem:[#allocation61_spill]] }
 0x169   : > { %s6858_s11 = sld [smem:[#allocation59_spill]]  ;;  %s6862_s3 = sld [smem:[#allocation64_spill]] }
 0x16a   : > { %s6863_s26 = sld [smem:[#allocation70_spill]]  ;;  %s6864_s16 = sld [smem:[#allocation72_spill]] }
 0x16b   : > { %s6865_s22 = sld [smem:[#allocation73_spill]]  ;;  %s6866_s27 = sld [smem:[#allocation75_spill]] }
 0x16c   : > { %p1102_p3 = scmp.lt.s32.totalorder %s6855_s15, 1  ;;  %p1112_p13 = scmp.lt.s32.totalorder %s6856_s4, 1 }
 0x16d   : > { %s1101_s7 = scalar_lea.vmem [#allocation19], %s6012_s2  ;;  %p3951_p10 = scmp.ne.s32.totalorder %s6856_s4, 0 }
 0x16e   : > { %s6927_s15 = smov (!%p1102_p3, %s6855_s15), 1  ;;  %v1147_v2 = vlaneseq (!%p3951_p10)  ;;  %v5341_v5 = vmov (!%p3951_p10), 0   ;;  %vm1161_vm3 = vcmask (!%p3951_p10), 64512   ;;  %v5342_v9 = vmov (!%p3951_p10), 0.0  }
 0x16f   : > { %s6020_s9 = scalar_select %p1112_p13, %s6856_s4, 1 }
 0x170   : > { %s3947_s28 = sshll.u32 %s6927_s15, 3  ;;  %s1108_s6 = scalar_lea.vmem %s6857_s5, %s6927_s15  ;;  %v1148_v3 = vshrl.u32 (!%p3951_p10), %v1147_v2, 7  ;;  %v1150_v4 = vand.u32 (!%p3951_p10), 127, %v1147_v2 }
 0x171   : > { %s1105_s10 = scalar_lea.vmem %s6858_s11, %s3947_s28  ;;  %s4635_s1 = smul.u32 3, %s6020_s9  ;;  %v1146_v1 = vld [vmem:[%s1108_s6] sm:$0x1] (!%p3951_p10) }
 0x172   : > { %s3948_s20 = sshll.u32 %s6020_s9, 1  ;;  %s1128_s25 = scalar_lea.vmem %s6864_s16, %s6020_s9  ;;  %v1144_v0 = vld [vmem:[%s1105_s10] sm:$0xff] (!%p3951_p10)  ;;  %vm1152_vm0 = vcmp.gt.f32.partialorder (!%p3951_p10), %v1146_v1, 0.0  ;;  %v1156_v7 = vsub.s32 (!%p3951_p10), 0, %v1148_v3  ;;  %vm1151_vm1 = vcmp.gt.s32.totalorder (!%p3951_p10), %v1150_v4, %v1148_v3 }
 0x173   : > { %s6047_s23 = scalar_lea.vmem %s6862_s3, %s4635_s1  ;;  %s6052_s0 = scalar_lea.vmem %s6863_s26, %s3948_s20  ;;  %1145 = vst [vmem:[#allocation2] sm:$0xff] (!%p3951_p10), %v1144_v0  ;;  %v1153_v6 = vsel (!%p3951_p10), %vm1152_vm0, 1, %v5341_v5 }
 0x174   : > { %s3949_s18 = sshll.u32 %s6020_s9, 3  ;;  %s6067_s1 = scalar_lea.vmem %s6866_s27, %s3948_s20  ;;  %v1157_v8 = vrot.slane (!%p3951_p10), %v1153_v6, %v1156_v7 }
 0x175   : > { %s6062_s30 = scalar_lea.vmem %s6865_s22, %s3949_s18  ;;  %s6867_s11 = sld [smem:[#allocation77_spill]] }
 0x176   : > { %s6073_s26 = scalar_lea.vmem [#allocation18], %s3945_s19  ;;  %1143 = sbr.rel (%p3951_p10) target bundleno = 381 (0x17d), region = 136  ;;  %vm1158_vm2 = vcmp.eq.s32.totalorder (!%p3951_p10), %v1157_v8, 1 }
 0x177   : > { %vm1159_vm4 = vmor (!%p3951_p10), %vm1151_vm1, %vm1158_vm2 }
 0x178   : > { %v1160_v10 = vsel (!%p3951_p10), %vm1159_vm4, -1e+18, %v5342_v9 }
 0x179   : > { %1162 = vst.msk [vmem:[#allocation3] sm:$0xff] (!%p3951_p10), %vm1161_vm3, %v1160_v10 }
 0x17b   : > { %s1139_s28 = scalar_lea.vmem %s6867_s11, %s6020_s9 }
 0x17d PF: > { %v6077_v11 = vld [vmem:[#allocation2] sm:$0xff]  ;;  %v1195_v12 = vld [vmem:[%s5978_s21 + $0x8] sm:$0xff]  ;;  %v1198_v13 = vld [vmem:[%s5978_s21 + $0x20] sm:$0xff]  ;;  %v5343_v16 = vmov 0.0|0.0   ;;  %v5344_v4 = vmov 0.0   ;;  %vm5345_vm5 = vmmov 0  }
 0x17e   : > { %1171 = vadd.xlane.f32.xlu0 %v6077_v11  ;;  %v1194_v14 = vld [vmem:[%s5978_s21] sm:$0xff]  ;;  %v4380_v15 = vpack.c.bf16 %v1198_v13, %v1195_v12  ;;  %4412 = vmatprep.subr.bf16.mxu1 %v5343_v16  ;;  %v1197_v17 = vld [vmem:[%s5978_s21 + $0x18] sm:$0xff]  ;;  %v1196_v18 = vld [vmem:[%s5978_s21 + $0x10] sm:$0xff]  ;;  %vm1401_vm6 = vcmask 261120   ;;  %s5346_s29 = smov 96   ;;  %s5347_s10 = smov 32  }
 0x17f   : > { %v1199_v19 = vld [vmem:[%s5978_s21 + $0x28] sm:$0xff]  ;;  %v4382_v20 = vpack.c.bf16 %v1197_v17, %v1194_v14  ;;  %v1201_v22 = vld [vmem:[%s5978_s21 + $0x38] sm:$0xff]  ;;  %v1204_v23 = vld [vmem:[%s5978_s21 + $0x50] sm:$0xff]  ;;  %1323 = vmatprep.mubr.f32.mxu0 %v5344_v4  ;;  %4176 = vmatprep.mubr.msk.f32.mxu1 %vm5345_vm5, %v5344_v4  ;;  %vm1478_vm7 = vcmask 64512   ;;  %s5348_s14 = smov 64   ;;  %vm2072_vm8 = vcmask 523264  }
 0x180   : > { %v4413_v21 = vpack.c.bf16 %v1199_v19, %v1196_v18  ;;  %v1200_v24 = vld [vmem:[%s5978_s21 + $0x30] sm:$0xff]  ;;  %4381 = vmatprep.subr.bf16.mxu0 %v4380_v15  ;;  %v4384_v25 = vpack.c.bf16 %v1204_v23, %v1201_v22  ;;  %v1203_v26 = vld [vmem:[%s5978_s21 + $0x48] sm:$0xff]  ;;  %v1202_v27 = vld [vmem:[%s5978_s21 + $0x40] sm:$0xff]  ;;  %vm2074_vm9 = vcmask 785408   ;;  %s6869_s4 = sld [smem:[#allocation66_spill]]  ;;  %s6871_s6 = sld [smem:[#allocation54_spill]] }
 0x181   : > { %v1205_v28 = vld [vmem:[%s5978_s21 + $0x58] sm:$0xff]  ;;  %4383 = vmatpush1.bf16.msra.mxu0 %v4382_v20  ;;  %v4386_v29 = vpack.c.bf16 %v1203_v26, %v1200_v24  ;;  %v1207_v31 = vld [vmem:[%s5978_s21 + $0x68] sm:$0xff]  ;;  %v1210_v32 = vld [vmem:[%s5978_s21 + $0x80] sm:$0xff]  ;;  %s6872_s20 = sld [smem:[#allocation53_spill]]  ;;  %s6875_s12 = sld [smem:[#allocation68_spill]]  ;;  %vm2491_vm12 = vcmask 130048  }
 0x182   : > { %4414 = vmatpush3.bf16.msra.mxu1 %v4413_v21  ;;  %v4416_v30 = vpack.c.bf16 %v1205_v28, %v1202_v27  ;;  %v1206_v33 = vld [vmem:[%s5978_s21 + $0x60] sm:$0xff]  ;;  %4385 = vmatprep.subr.bf16.mxu0 %v4384_v25  ;;  %v4388_v34 = vpack.c.bf16 %v1210_v32, %v1207_v31  ;;  %v1209_v35 = vld [vmem:[%s5978_s21 + $0x78] sm:$0xff]  ;;  %v1208_v36 = vld [vmem:[%s5978_s21 + $0x70] sm:$0xff]  ;;  %s6877_s22 = sld [smem:[#allocation62_spill]] }
 0x183   : > { %4415 = vmatprep.subr.bf16.mxu1 %v5343_v16  ;;  %v1211_v37 = vld [vmem:[%s5978_s21 + $0x88] sm:$0xff]  ;;  %v4390_v38 = vpack.c.bf16 %v1209_v35, %v1206_v33  ;;  %v1213_v44 = vld [vmem:[%s5978_s21 + $0x98] sm:$0xff]  ;;  %v1216_v45 = vld [vmem:[%s5978_s21 + $0xb0] sm:$0xff]  ;;  %s6880_s27 = sld [smem:[#allocation57_spill]] }
 0x184   : > { %v4419_v39 = vpack.c.bf16 %v1211_v37, %v1208_v36  ;;  %v4392_v46 = vpack.c.bf16 %v1216_v45, %v1213_v44  ;;  %v1212_v47 = vld [vmem:[%s5978_s21 + $0x90] sm:$0xff]  ;;  %v1215_v48 = vld [vmem:[%s5978_s21 + $0xa8] sm:$0xff]  ;;  %v1214_v49 = vld [vmem:[%s5978_s21 + $0xa0] sm:$0xff] }
 0x185   : > { %4387 = vmatpush1.bf16.msra.mxu0 %v4386_v29  ;;  %v4394_v50 = vpack.c.bf16 %v1215_v48, %v1212_v47  ;;  %v1217_v51 = vld [vmem:[%s5978_s21 + $0xb8] sm:$0xff]  ;;  %v1219_v53 = vld [vmem:[%s5978_s21 + $0xc8] sm:$0xff]  ;;  %v1222_v54 = vld [vmem:[%s5978_s21 + $0xe0] sm:$0xff] }
 0x186   : > { %4417 = vmatpush3.bf16.msra.mxu1 %v4416_v30  ;;  %4389 = vmatprep.subr.bf16.mxu0 %v4388_v34  ;;  %v4422_v52 = vpack.c.bf16 %v1217_v51, %v1214_v49  ;;  %v4396_v55 = vpack.c.bf16 %v1222_v54, %v1219_v53  ;;  %v1218_v56 = vld [vmem:[%s5978_s21 + $0xc0] sm:$0xff]  ;;  %v1221_v57 = vld [vmem:[%s5978_s21 + $0xd8] sm:$0xff]  ;;  %v1220_v58 = vld [vmem:[%s5978_s21 + $0xd0] sm:$0xff]  ;;  %v1183_v30 = vlaneseq  ;;  %s6870_s19 = scalar_lea.vmem %s6869_s4, %s6020_s9 }
 0x187   : > { %4418 = vmatprep.subr.bf16.mxu1 %v5343_v16  ;;  %v4398_v59 = vpack.c.bf16 %v1221_v57, %v1218_v56  ;;  %v1223_v60 = vld [vmem:[%s5978_s21 + $0xe8] sm:$0xff]  ;;  %v1225_v61 = vld [vmem:[%s5978_s21 + $0xf8] sm:$0xff]  ;;  %v1228_v62 = vld [vmem:[%s5978_s21 + $0x110] sm:$0xff]  ;;  %s6876_s16 = scalar_lea.vmem %s6875_s12, %s6020_s9 }
 0x188   : > { %v4425_v63 = vpack.c.bf16 %v1223_v60, %v1220_v58  ;;  %v4400_v0 = vpack.c.bf16 %v1228_v62, %v1225_v61  ;;  %v1224_v1 = vld [vmem:[%s5978_s21 + $0xf0] sm:$0xff]  ;;  %v1227_v2 = vld [vmem:[%s5978_s21 + $0x108] sm:$0xff]  ;;  %v1226_v3 = vld [vmem:[%s5978_s21 + $0x100] sm:$0xff]  ;;  %v6146_v32 = vshrl.u32 %v1183_v30, 7  ;;  %s6878_s17 = scalar_lea.vmem %s6877_s22, %s6927_s15  ;;  %s6879_s15 = sld [smem:[#allocation56_spill]] }
 0x189   : > { %4391 = vmatpush1.bf16.msra.mxu0 %v4390_v38  ;;  %v4402_v5 = vpack.c.bf16 %v1227_v2, %v1224_v1  ;;  %v1229_v6 = vld [vmem:[%s5978_s21 + $0x118] sm:$0xff]  ;;  %v1231_v7 = vld [vmem:[%s5978_s21 + $0x128] sm:$0xff]  ;;  %v1234_v8 = vld [vmem:[%s5978_s21 + $0x140] sm:$0xff] }
 0x18a   : > { %4420 = vmatpush3.bf16.msra.mxu1 %v4419_v39  ;;  %4393 = vmatprep.subr.bf16.mxu0 %v4392_v46  ;;  %v4428_v9 = vpack.c.bf16 %v1229_v6, %v1226_v3  ;;  %v4404_v10 = vpack.c.bf16 %v1234_v8, %v1231_v7  ;;  %v1230_v12 = vld [vmem:[%s5978_s21 + $0x120] sm:$0xff]  ;;  %v1233_v13 = vld [vmem:[%s5978_s21 + $0x138] sm:$0xff]  ;;  %v1232_v14 = vld [vmem:[%s5978_s21 + $0x130] sm:$0xff]  ;;  %v6149_v33 = vsub.s32 0, %v6146_v32  ;;  %v6155_v35 = vsub.s32 1, %v6146_v32 }
 0x18b   : > { %4421 = vmatprep.subr.bf16.mxu1 %v5343_v16  ;;  %v1235_v15 = vld [vmem:[%s5978_s21 + $0x148] sm:$0xff]  ;;  %v1237_v17 = vld [vmem:[%s5978_s21 + $0x158] sm:$0xff]  ;;  %v1240_v18 = vld [vmem:[%s5978_s21 + $0x170] sm:$0xff]  ;;  %v4406_v19 = vpack.c.bf16 %v1233_v13, %v1230_v12 }
 0x18c   : > { %v4431_v20 = vpack.c.bf16 %v1235_v15, %v1232_v14  ;;  %v4408_v21 = vpack.c.bf16 %v1240_v18, %v1237_v17  ;;  %v1236_v22 = vld [vmem:[%s5978_s21 + $0x150] sm:$0xff]  ;;  %v1239_v23 = vld [vmem:[%s5978_s21 + $0x168] sm:$0xff]  ;;  %v1238_v24 = vld [vmem:[%s5978_s21 + $0x160] sm:$0xff] }
 0x18d   : > { %4395 = vmatpush1.bf16.msra.mxu0 %v4394_v50  ;;  %v1241_v25 = vld [vmem:[%s5978_s21 + $0x178] sm:$0xff]  ;;  %v4410_v26 = vpack.c.bf16 %v1239_v23, %v1236_v22  ;;  %v6152_v34 = vld [vmem:[%s6062_s30] sm:$0x3f]  ;;  %s6868_s21 = sld [smem:[#allocation55_spill]]  ;;  %vm6350_vm10 = vmpackc.low %vm1401_vm6, %vm1401_vm6 }
 0x18e   : > { %4423 = vmatpush3.bf16.msra.mxu1 %v4422_v52  ;;  %4397 = vmatprep.subr.bf16.mxu0 %v4396_v55  ;;  %v4434_v27 = vpack.c.bf16 %v1241_v25, %v1238_v24  ;;  %v1186_v36 = vrot.slane %v6152_v34, %v6149_v33  ;;  %v1191_v39 = vrot.slane %v6152_v34, %v6155_v35  ;;  %v1166_v55 = vld [vmem:[#allocation3] sm:$0xff] }
 0x18f   : > { %4424 = vmatprep.subr.bf16.mxu1 %v5343_v16 }
 0x191   : > { %4399 = vmatpush1.bf16.msra.mxu0 %v4398_v59 }
 0x192   : > { %4426 = vmatpush3.bf16.msra.mxu1 %v4425_v63  ;;  %4401 = vmatprep.subr.bf16.mxu0 %v4400_v0 }
 0x193   : > { %4427 = vmatprep.subr.bf16.mxu1 %v5343_v16 }
 0x195   : > { %4403 = vmatpush1.bf16.msra.mxu0 %v4402_v5 }
 0x196   : > { %4429 = vmatpush3.bf16.msra.mxu1 %v4428_v9  ;;  %4405 = vmatprep.subr.bf16.mxu0 %v4404_v10 }
 0x197   : > { %4430 = vmatprep.subr.bf16.mxu1 %v5343_v16 }
 0x199   : > { %4407 = vmatpush1.bf16.msra.mxu0 %v4406_v19 }
 0x19a   : > { %4432 = vmatpush3.bf16.msra.mxu1 %v4431_v20  ;;  %4409 = vmatprep.subr.bf16.mxu0 %v4408_v21 }
 0x19b   : > { %4433 = vmatprep.subr.bf16.mxu1 %v5343_v16 }
 0x19d   : > { %4411 = vmatpush1.bf16.msra.mxu0 %v4410_v26 }
 0x19e   : > { %4435 = vmatpush3.bf16.msra.mxu1 %v4434_v27  ;;  %4199 = vmatprep.subr.mxu0 %v5344_v4 }
 0x19f   : > { %4179 = vmatprep.subr.mxu1 %v5344_v4 }
 0x20b   : > { %v1172_v40 = vpop.xlane.xlu0 %1171 }
 0x20c   : > { %v1174_v41 = vmul.f32 0.0078125, %v1172_v40 }
 0x20e   : > { %v6103_v42 = vsub.f32 %v6077_v11, %v1174_v41 }
 0x210   : > { %v1176_v43 = vmul.f32 %v6103_v42, %v6103_v42 }
 0x212   : > { %1177 = vadd.xlane.f32.xlu0 %v1176_v43  ;;  %v1242_v43 = vld [vmem:[%s6047_s23] sm:$0x7] }
 0x213   : > { %v1247_v44 = vrot.slane %v1242_v43, %v6149_v33  ;;  %v1251_v45 = vrot.slane %v1242_v43, %v6155_v35 }
 0x29f   : > { %v1178_v28 = vpop.xlane.xlu0 %1177 }
 0x2a0   : > { %v1179_v29 = vmul.f32 0.0078125, %v1178_v28 }
 0x2a2   : > { %v1180_v31 = vadd.f32 1e-06, %v1179_v29 }
 0x2a4   : > { %4846 = vrsqrt.f32 %v1180_v31 }
 0x2ae   : > { %v4847_v37 = vpop.eup %4846 }
 0x2af   : > { %v1182_v38 = vmul.f32 %v4847_v37, %v6103_v42  ;;  %v1254_v42 = vsub.s32 2, %v6146_v32 }
 0x2b1   : > { %v1187_v40 = vmul.f32 %v1186_v36, %v1182_v38  ;;  %v1255_v51 = vrot.slane %v1242_v43, %v1254_v42 }
 0x2b3   : > { %v1192_v41 = vadd.f32 %v1191_v39, %v1187_v40 }
 0x2b5   : > { %1193 = vst [vmem:[%s1101_s7] sm:$0xff] %v1192_v41  ;;  %1324 = vmatmul.mubr.f32.vlgmr.msra.gmra.mrb[0].mxu0 %v1192_v41  ;;  %4177 = vmatmul.mubr.f32.vlgmr.msra.gmra.mrb[0].mxu1 %v1192_v41 }
 0x2b6   : > { %4181 = vmatprep.mubr.msk.f32.mxu1 %vm5345_vm5, %v5344_v4  ;;  %4201 = vmatprep.mubr.msk.f32.mxu0 %vm5345_vm5, %v5344_v4 }
 0x388   : > { %v1325_v46 = vpop.f32.mrb[0].mxu0  ;;  %v1396_v47 = vpop.f32.mrb[0].mxu1 }
 0x389   : > { %v1326_v48 = vadd.f32 %v1325_v46, %v1247_v44  ;;  %v1327_v49 = vpop.f32.mrb[1].mxu0  ;;  %v4178_v50 = vpop.f32.mrb[1].mxu1  ;;  %v6177_v54 = vadd.f32 %v1396_v47, %v1255_v51 }
 0x38a   : > { %v1328_v52 = vadd.f32 %v1327_v49, %v1251_v45 }
 0x38b   : > { %v1400_v53 = vmul.f32 0.17677669, %v1326_v48 }
 0x38c   : > { %1565 = vrot.lane.b32.xlu0 %v1328_v52, %s5346_s29  ;;  %4180 = vmatpush3.xpose.msk.msra.mxu1 %vm1401_vm6, %v1328_v52 }
 0x38d   : > { %4184 = vmatprep.subr.mxu1 %v5344_v4 }
 0x38f   : > { %4182 = vmatmul.mubr.msk.f32.vlgmr.msra.gmra.mrb[2].mxu1 %vm1401_vm6, %v1400_v53 }
 0x390   : > { %1896 = vrot.lane.b32.xlu0 %v1328_v52, %s5347_s10  ;;  %4185 = vmatpush3.msra.mxu1 %v6177_v54 }
 0x391   : > { %4186 = vmatprep.mubr.msk.f32.mxu1 %vm5345_vm5, %v5344_v4  ;;  %4189 = vmatprep.subr.mxu1 %v5344_v4 }
 0x3fe   : > { %v1566_v3 = vpop.permute.xlu0 %1565 }
 0x402   : > { %v1897_v7 = vpop.permute.xlu0 %1896 }
 0x462   : > { %v1474_v56 = vpop.f32.mrb[2].mxu1 }
 0x463   : > { %v1475_v57 = vadd.f32 %v1474_v56, %v1166_v55  ;;  %v4183_v58 = vpop.f32.mrb[3].mxu1 }
 0x465   : > { %v1479_v59 = vsel %vm1478_vm7, %v1475_v57, -inf }
 0x466   : > { %1480 = vmax.xlane.f32.xlu1 %v1479_v59  ;;  %v2076_v59 = vld [vmem:[%s5984_s24] sm:$0xff] }
 0x477   : > { %1563 = vrot.lane.b32.xlu1 %v1400_v53, %s5346_s29 }
 0x47b   : > { %1731 = vrot.lane.b32.xlu1 %v1328_v52, %s5348_s14 }
 0x4f3   : > { %v1481_v60 = vpop.xlane.xlu1 %1480 }
 0x4f4   : > { %v1482_v61 = vsub.f32 %v1475_v57, %v1481_v60  ;;  %v2077_v60 = vld [vmem:[%s5984_s24 + $0x8] sm:$0xff] }
 0x4f6   : > { %v1483_v62 = vmul.f32 1.442695, %v1482_v61  ;;  %v2078_v61 = vld [vmem:[%s5984_s24 + $0x10] sm:$0xff] }
 0x4f7   : > { %v1564_v63 = vpop.permute.xlu1 %1563 }
 0x4f8   : > { %4848 = vpow2.f32 %v1483_v62  ;;  %v4437_v62 = vpack.c.bf16 %v2077_v60, %v2076_v59  ;;  %v2294_v59 = vld [vmem:[%s6868_s21 + $0x50] sm:$0xff]  ;;  %v2191_v60 = vld [vmem:[%s6871_s6] sm:$0xff] }
 0x4fb   : > { %v1732_v0 = vpop.permute.xlu1 %1731 }
 0x4fc   : > { %4200 = vmatpush3.xpose.msk.msra.mxu0 %vm1401_vm6, %v1732_v0 }
 0x4fd   : > { %4209 = vmatprep.subr.mxu0 %v5344_v4 }
 0x502   : > { %v4849_v1 = vpop.eup %4848 }
 0x503   : > { %v1485_v2 = vsel %vm1478_vm7, %v4849_v1, 0.0 }
 0x504   : > { %1486 = vadd.xlane.f32.xlu1 %v1485_v2  ;;  %v2081_v2 = vld [vmem:[%s5984_s24 + $0x28] sm:$0xff] }
 0x515   : > { %1729 = vrot.lane.b32.xlu1 %v1400_v53, %s5348_s14 }
 0x519   : > { %1894 = vrot.lane.b32.xlu1 %v1400_v53, %s5347_s10 }
 0x591   : > { %v1487_v5 = vpop.xlane.xlu1 %1486 }
 0x592   : > { %4850 = vrcp.f32 %v1487_v5  ;;  %v2082_v5 = vld [vmem:[%s5984_s24 + $0x30] sm:$0xff] }
 0x595   : > { %v1730_v6 = vpop.permute.xlu1 %1729 }
 0x596   : > { %4202 = vmatmul.mubr.msk.f32.vlgmr.msra.gmra.mrb[2].mxu0 %vm1401_vm6, %v1730_v6  ;;  %v2083_v6 = vld [vmem:[%s5984_s24 + $0x38] sm:$0xff] }
 0x597   : > { %4210 = vmatpush3.xpose.msk.msra.mxu0 %vm1401_vm6, %v1897_v7  ;;  %4211 = vmatprep.mubr.msk.f32.mxu0 %vm5345_vm5, %v5344_v4  ;;  %v4446_v7 = vpack.c.bf16 %v2083_v6, %v2082_v5  ;;  %v2296_v5 = vld [vmem:[%s6868_s21 + $0x60] sm:$0xff] }
 0x598   : > { %4436 = vmatprep.subr.bf16.mxu0 %v5343_v16 }
 0x599   : > { %v1895_v8 = vpop.permute.xlu1 %1894 }
 0x59a   : > { %4212 = vmatmul.mubr.msk.f32.vlgmr.msra.gmra.mrb[4].mxu0 %vm1401_vm6, %v1895_v8  ;;  %v2084_v8 = vld [vmem:[%s5984_s24 + $0x40] sm:$0xff] }
 0x59b   : > { %4251 = vmatprep.mubr.msk.f32.mxu0 %vm5345_vm5, %v5344_v4  ;;  %4438 = vmatpush3.bf16.msra.mxu0 %v4437_v62  ;;  %v2297_v62 = vld [vmem:[%s6868_s21 + $0x68] sm:$0xff] }
 0x59c   : > { %v4851_v9 = vpop.eup %4850  ;;  %4439 = vmatprep.subr.bf16.mxu0 %v5343_v16 }
 0x59d   : > { %v1489_v10 = vmul.f32 %v4851_v9, %v4849_v1  ;;  %v2080_v1 = vld [vmem:[%s5984_s24 + $0x20] sm:$0xff]  ;;  %v2085_v9 = vld [vmem:[%s5984_s24 + $0x48] sm:$0xff] }
 0x59f   : > { %4187 = vmatmul.mubr.msk.f32.vlgmr.msra.gmra.mrb[4].mxu1 %vm1478_vm7, %v1489_v10  ;;  %v4449_v10 = vpack.c.bf16 %v2085_v9, %v2084_v8  ;;  %v2298_v8 = vld [vmem:[%s6868_s21 + $0x70] sm:$0xff]  ;;  %v2195_v9 = vld [vmem:[%s6871_s6 + $0x20] sm:$0xff] }
 0x5a0   : > { %4190 = vmatpush3.xpose.msk.msra.mxu1 %vm1401_vm6, %v1566_v3  ;;  %4191 = vmatprep.mubr.msk.f32.mxu1 %vm5345_vm5, %v5344_v4  ;;  %v4443_v3 = vpack.c.bf16 %v2081_v2, %v2080_v1  ;;  %v2193_v1 = vld [vmem:[%s6871_s6 + $0x10] sm:$0xff]  ;;  %v2194_v2 = vld [vmem:[%s6871_s6 + $0x18] sm:$0xff] }
 0x5a1   : > { %4194 = vmatprep.subr.mxu1 %v5344_v4  ;;  %v4464_v6 = vpack.c.bf16 %v2194_v2, %v2193_v1 }
 0x5a3   : > { %4192 = vmatmul.mubr.msk.f32.vlgmr.msra.gmra.mrb[6].mxu1 %vm1401_vm6, %v1564_v63  ;;  %v2079_v63 = vld [vmem:[%s5984_s24 + $0x18] sm:$0xff] }
 0x5a4   : > { %4196 = vmatprep.mubr.msk.f32.mxu1 %vm5345_vm5, %v5344_v4  ;;  %v4440_v0 = vpack.c.bf16 %v2079_v63, %v2078_v61  ;;  %v2192_v61 = vld [vmem:[%s6871_s6 + $0x8] sm:$0xff]  ;;  %v2299_v63 = vld [vmem:[%s6868_s21 + $0x78] sm:$0xff] }
 0x5a6   : > { %4441 = vmatpush3.bf16.msra.mxu0 %v4440_v0  ;;  %v4461_v0 = vpack.c.bf16 %v2192_v61, %v2191_v60  ;;  %v2204_v60 = vld [vmem:[%s6871_s6 + $0x68] sm:$0xff] }
 0x5a7   : > { %4442 = vmatprep.subr.bf16.mxu0 %v5343_v16 }
 0x5aa   : > { %4444 = vmatpush3.bf16.msra.mxu0 %v4443_v3 }
 0x5ab   : > { %4445 = vmatprep.subr.bf16.mxu0 %v5343_v16 }
 0x5ae   : > { %4447 = vmatpush3.bf16.msra.mxu0 %v4446_v7  ;;  %v4496_v7 = vpack.c.bf16 %v2299_v63, %v2297_v62  ;;  %v2205_v62 = vld [vmem:[%s6871_s6 + $0x70] sm:$0xff]  ;;  %v2206_v63 = vld [vmem:[%s6871_s6 + $0x78] sm:$0xff] }
 0x5af   : > { %4448 = vmatprep.subr.bf16.mxu0 %v5343_v16 }
 0x5b2   : > { %4450 = vmatpush3.bf16.msra.mxu0 %v4449_v10  ;;  %v2196_v10 = vld [vmem:[%s6871_s6 + $0x28] sm:$0xff] }
 0x5b3   : > { %4451 = vmatprep.subr.bf16.mxu0 %v5343_v16 }
 0x669   : > { %v1803_v12 = vpop.f32.mrb[2].mxu0 }
 0x66a   : > { %v1804_v13 = vadd.f32 %v1803_v12, %v1166_v55  ;;  %v4203_v14 = vpop.f32.mrb[3].mxu0  ;;  %v2086_v12 = vld [vmem:[%s5984_s24 + $0x50] sm:$0xff] }
 0x66c   : > { %v1807_v15 = vsel %vm1478_vm7, %v1804_v13, -inf }
 0x66d   : > { %1808 = vmax.xlane.f32.xlu1 %v1807_v15  ;;  %v1968_v17 = vpop.f32.mrb[4].mxu0  ;;  %v2088_v15 = vld [vmem:[%s5984_s24 + $0x60] sm:$0xff] }
 0x66e   : > { %v4213_v18 = vpop.f32.mrb[5].mxu0  ;;  %v1969_v24 = vadd.f32 %v1968_v17, %v1166_v55  ;;  %v2089_v17 = vld [vmem:[%s5984_s24 + $0x68] sm:$0xff] }
 0x66f   : > { %v4455_v18 = vpack.c.bf16 %v2089_v17, %v2088_v15  ;;  %v4467_v15 = vpack.c.bf16 %v2196_v10, %v2195_v9 }
 0x670   : > { %v1972_v26 = vsel %vm1478_vm7, %v1969_v24, -inf }
 0x672   : > { %v6210_v19 = vpop.f32.mrb[4].mxu1 }
 0x673   : > { %v4188_v20 = vpop.f32.mrb[5].mxu1 }
 0x674   : > { %v2090_v20 = vld [vmem:[%s5984_s24 + $0x70] sm:$0xff] }
 0x676   : > { %v1637_v21 = vpop.f32.mrb[6].mxu1 }
 0x677   : > { %v1638_v22 = vadd.f32 %v1637_v21, %v1166_v55  ;;  %v4193_v23 = vpop.f32.mrb[7].mxu1  ;;  %v2091_v21 = vld [vmem:[%s5984_s24 + $0x78] sm:$0xff] }
 0x679   : > { %v1641_v25 = vsel %vm1478_vm7, %v1638_v22, -inf }
 0x67a   : > { %1642 = vmax.xlane.f32.xlu0 %v1641_v25 }
 0x67e   : > { %1973 = vmax.xlane.f32.xlu0 %v1972_v26 }
 0x6fa   : > { %v1809_v27 = vpop.xlane.xlu1 %1808 }
 0x6fb   : > { %v1810_v28 = vsub.f32 %v1804_v13, %v1809_v27  ;;  %v2087_v13 = vld [vmem:[%s5984_s24 + $0x58] sm:$0xff] }
 0x6fc   : > { %v4452_v14 = vpack.c.bf16 %v2087_v13, %v2086_v12  ;;  %v2301_v12 = vld [vmem:[%s6868_s21 + $0x88] sm:$0xff]  ;;  %v2303_v13 = vld [vmem:[%s6868_s21 + $0x98] sm:$0xff] }
 0x6fd   : > { %v1811_v29 = vmul.f32 1.442695, %v1810_v28  ;;  %v4500_v17 = vpack.c.bf16 %v2303_v13, %v2301_v12  ;;  %v2316_v13 = vld [vmem:[%s6052_s0] sm:$0x3] }
 0x6fe   : > { %4453 = vmatpush3.bf16.msra.mxu0 %v4452_v14  ;;  %v4498_v14 = vpack.c.bf16 %v2298_v8, %v2296_v5  ;;  %v2188_v5 = vsub.s32 3, %v6146_v32 }
 0x6ff   : > { %4852 = vpow2.f32 %v1811_v29  ;;  %4454 = vmatprep.subr.bf16.mxu0 %v5343_v16 }
 0x700   : > { %v2189_v9 = vrot.slane %v6152_v34, %v2188_v5 }
 0x702   : > { %4456 = vmatpush3.bf16.msra.mxu0 %v4455_v18  ;;  %v2300_v18 = vld [vmem:[%s6868_s21 + $0x80] sm:$0xff] }
 0x703   : > { %4457 = vmatprep.subr.bf16.mxu0 %v5343_v16 }
 0x707   : > { %v1643_v30 = vpop.xlane.xlu0 %1642 }
 0x708   : > { %v1644_v31 = vsub.f32 %v1638_v22, %v1643_v30  ;;  %v4458_v22 = vpack.c.bf16 %v2091_v21, %v2090_v20  ;;  %v2302_v20 = vld [vmem:[%s6868_s21 + $0x90] sm:$0xff]  ;;  %v2305_v21 = vld [vmem:[%s6868_s21 + $0xa8] sm:$0xff] }
 0x709   : > { %v4853_v36 = vpop.eup %4852 }
 0x70a   : > { %v1645_v37 = vmul.f32 1.442695, %v1644_v31  ;;  %v1813_v38 = vsel %vm1478_vm7, %v4853_v36, 0.0  ;;  %4459 = vmatpush3.bf16.msra.mxu0 %v4458_v22  ;;  %v2307_v22 = vld [vmem:[%s6868_s21 + $0xb8] sm:$0xff] }
 0x70b   : > { %1814 = vadd.xlane.f32.xlu0 %v1813_v38  ;;  %v1974_v39 = vpop.xlane.xlu0 %1973 }
 0x70c   : > { %4854 = vpow2.f32 %v1645_v37  ;;  %v1975_v40 = vsub.f32 %v1969_v24, %v1974_v39  ;;  %v3964_v39 = vld [vmem:[%s6870_s19] ss:$0 sm:$0xff] }
 0x70e   : > { %v1976_v41 = vmul.f32 1.442695, %v1975_v40 }
 0x710   : > { %4856 = vpow2.f32 %v1976_v41 }
 0x716   : > { %v4855_v43 = vpop.eup %4854 }
 0x717   : > { %v1647_v44 = vsel %vm1478_vm7, %v4855_v43, 0.0 }
 0x718   : > { %1648 = vadd.xlane.f32.xlu0 %v1647_v44  ;;  %v2285_v44 = vld [vmem:[%s6868_s21 + $0x8] sm:$0xff] }
 0x71a   : > { %v4857_v45 = vpop.eup %4856 }
 0x71b   : > { %v1978_v46 = vsel %vm1478_vm7, %v4857_v45, 0.0 }
 0x71c   : > { %1979 = vadd.xlane.f32.xlu1 %v1978_v46  ;;  %v2284_v46 = vld [vmem:[%s6868_s21] sm:$0xff] }
 0x72d   : > { %1818 = vrot.lane.b32.xlu1 %v6177_v54, %s5348_s14 }
 0x72e   : > { %1653 = vrot.lane.b32.xlu0 %v6177_v54, %s5346_s29 }
 0x731   : > { %1983 = vrot.lane.b32.xlu1 %v6177_v54, %s5347_s10 }
 0x798   : > { %v1815_v47 = vpop.xlane.xlu0 %1814 }
 0x7a5   : > { %v1649_v48 = vpop.xlane.xlu0 %1648 }
 0x7a6   : > { %4858 = vrcp.f32 %v1649_v48  ;;  %v2286_v48 = vld [vmem:[%s6868_s21 + $0x10] sm:$0xff] }
 0x7a7   : > { %4860 = vrcp.f32 %v1815_v47 }
 0x7a9   : > { %v1980_v49 = vpop.xlane.xlu1 %1979  ;;  %v1654_v50 = vpop.permute.xlu0 %1653 }
 0x7aa   : > { %4195 = vmatpush3.msra.mxu1 %v1654_v50  ;;  %4862 = vrcp.f32 %v1980_v49  ;;  %v2289_v49 = vld [vmem:[%s6868_s21 + $0x28] sm:$0xff]  ;;  %v2291_v50 = vld [vmem:[%s6868_s21 + $0x38] sm:$0xff] }
 0x7ab   : > { %4204 = vmatprep.subr.mxu1 %v5344_v4 }
 0x7ad   : > { %v1819_v53 = vpop.permute.xlu1 %1818 }
 0x7b0   : > { %v4859_v51 = vpop.eup %4858 }
 0x7b1   : > { %v1651_v52 = vmul.f32 %v4859_v51, %v4855_v43  ;;  %v4861_v55 = vpop.eup %4860  ;;  %v1984_v57 = vpop.permute.xlu1 %1983  ;;  %v4486_v51 = vpack.c.bf16 %v2286_v48, %v2284_v46  ;;  %v2198_v46 = vld [vmem:[%s6871_s6 + $0x38] sm:$0xff]  ;;  %v2312_v48 = vld [vmem:[%s6868_s21 + $0xe0] sm:$0xff] }
 0x7b2   : > { %v1817_v54 = vmul.f32 %v4861_v55, %v4853_v36  ;;  %v2293_v55 = vld [vmem:[%s6868_s21 + $0x48] sm:$0xff] }
 0x7b3   : > { %4197 = vmatmul.mubr.msk.f32.vlgmr.msra.gmra.mrb[8].mxu1 %vm1478_vm7, %v1651_v52  ;;  %v4488_v52 = vpack.c.bf16 %v2291_v50, %v2289_v49  ;;  %v2314_v50 = vld [vmem:[%s6868_s21 + $0xf0] sm:$0xff] }
 0x7b4   : > { %4205 = vmatpush3.msra.mxu1 %v1819_v53  ;;  %4206 = vmatprep.mubr.msk.f32.mxu1 %vm5345_vm5, %v5344_v4  ;;  %v4863_v56 = vpop.eup %4862  ;;  %v2288_v53 = vld [vmem:[%s6868_s21 + $0x20] sm:$0xff] }
 0x7b5   : > { %4214 = vmatprep.subr.mxu1 %v5344_v4  ;;  %v1982_v58 = vmul.f32 %v4863_v56, %v4857_v45  ;;  %v2287_v45 = vld [vmem:[%s6868_s21 + $0x18] sm:$0xff] }
 0x7b6   : > { %v4484_v47 = vpack.c.bf16 %v2287_v45, %v2285_v44  ;;  %v2315_v44 = vld [vmem:[%s6868_s21 + $0xf8] sm:$0xff]  ;;  %v2197_v45 = vld [vmem:[%s6871_s6 + $0x30] sm:$0xff] }
 0x7b7   : > { %4207 = vmatmul.mubr.msk.f32.vlgmr.msra.gmra.mrb[10].mxu1 %vm1478_vm7, %v1817_v54  ;;  %v2295_v54 = vld [vmem:[%s6868_s21 + $0x58] sm:$0xff]  ;;  %v4470_v49 = vpack.c.bf16 %v2198_v46, %v2197_v45 }
 0x7b8   : > { %4215 = vmatpush3.msra.mxu1 %v1984_v57  ;;  %4216 = vmatprep.mubr.msk.f32.mxu1 %vm5345_vm5, %v5344_v4  ;;  %v2292_v57 = vld [vmem:[%s6868_s21 + $0x40] sm:$0xff] }
 0x7b9   : > { %4460 = vmatprep.subr.bf16.mxu1 %v5343_v16  ;;  %4485 = vmatprep.subr.bf16.mxu0 %v4484_v47  ;;  %v4494_v3 = vpack.c.bf16 %v2294_v59, %v2292_v57  ;;  %v2203_v59 = vld [vmem:[%s6871_s6 + $0x60] sm:$0xff] }
 0x7ba   : > { %v4479_v61 = vpack.c.bf16 %v2204_v60, %v2203_v59 }
 0x7bb   : > { %4217 = vmatmul.mubr.msk.f32.vlgmr.msra.gmra.mrb[12].mxu1 %vm1478_vm7, %v1982_v58  ;;  %v4492_v58 = vpack.c.bf16 %v2295_v54, %v2293_v55  ;;  %v2201_v54 = vld [vmem:[%s6871_s6 + $0x50] sm:$0xff] }
 0x7bc   : > { %4286 = vmatprep.mubr.msk.f32.mxu1 %vm5345_vm5, %v5344_v4  ;;  %4462 = vmatpush3.bf16.msra.mxu1 %v4461_v0  ;;  %v4482_v0 = vpack.c.bf16 %v2206_v63, %v2205_v62 }
 0x7bd   : > { %4463 = vmatprep.subr.bf16.mxu1 %v5343_v16 }
 0x7c0   : > { %4465 = vmatpush3.bf16.msra.mxu1 %v4464_v6  ;;  %v2184_v6 = vrot.slane %v6152_v34, %v1254_v42 }
 0x7c1   : > { %4466 = vmatprep.subr.bf16.mxu1 %v5343_v16 }
 0x7c4   : > { %4468 = vmatpush3.bf16.msra.mxu1 %v4467_v15 }
 0x7c5   : > { %4469 = vmatprep.subr.bf16.mxu1 %v5343_v16 }
 0x7c8   : > { %4471 = vmatpush3.bf16.msra.mxu1 %v4470_v49 }
 0x7c9   : > { %4472 = vmatprep.subr.bf16.mxu1 %v5343_v16 }
 0x886   : > { %v1725_v23 = vpop.f32.mrb[8].mxu1 }
 0x887   : > { %2060 = vrot.lane.b32.xlu1 %v1725_v23, %s5347_s10  ;;  %v4198_v24 = vpop.f32.mrb[9].mxu1  ;;  %v4502_v23 = vpack.c.bf16 %v2302_v20, %v2300_v18 }
 0x888   : > { %v4504_v24 = vpack.c.bf16 %v2307_v22, %v2305_v21 }
 0x88a   : > { %v1890_v25 = vpop.f32.mrb[10].mxu1 }
 0x88b   : > { %2064 = vrot.lane.b32.xlu0 %v1890_v25, %s5348_s14  ;;  %v4208_v26 = vpop.f32.mrb[11].mxu1  ;;  %v2304_v25 = vld [vmem:[%s6868_s21 + $0xa0] sm:$0xff] }
 0x88c   : > { %v2306_v26 = vld [vmem:[%s6868_s21 + $0xb0] sm:$0xff] }
 0x88e   : > { %v2055_v27 = vpop.f32.mrb[12].mxu1 }
 0x88f   : > { %2068 = vrot.lane.b32.xlu1 %v2055_v27, %s5346_s29  ;;  %v4218_v28 = vpop.f32.mrb[13].mxu1  ;;  %v2309_v27 = vld [vmem:[%s6868_s21 + $0xc8] sm:$0xff] }
 0x890   : > { %v2311_v28 = vld [vmem:[%s6868_s21 + $0xd8] sm:$0xff] }
 0x8f9   : > { %v2061_v29 = vpop.permute.xlu1 %2060 }
 0x8fa   : > { %v2071_v31 = vsel %vm1401_vm6, %v6210_v19, %v2061_v29  ;;  %v4506_v29 = vpack.c.bf16 %v2306_v26, %v2304_v25 }
 0x8fd   : > { %v2065_v30 = vpop.permute.xlu0 %2064 }
 0x8fe   : > { %v2073_v36 = vsel %vm2072_vm8, %v2071_v31, %v2065_v30  ;;  %v4508_v30 = vpack.c.bf16 %v2311_v28, %v2309_v27  ;;  %v2308_v31 = vld [vmem:[%s6868_s21 + $0xc0] sm:$0xff] }
 0x901   : > { %v2069_v37 = vpop.permute.xlu1 %2068 }
 0x902   : > { %v2075_v38 = vsel %vm2074_vm9, %v2073_v36, %v2069_v37  ;;  %v2310_v36 = vld [vmem:[%s6868_s21 + $0xd0] sm:$0xff] }
 0x903   : > { %4252 = vmatmul.mubr.f32.vlgmr.msra.gmra.mrb[6].mxu0 %v2075_v38  ;;  %v4510_v37 = vpack.c.bf16 %v2310_v36, %v2308_v31 }
 0x904   : > { %2392 = vmatprep.mubr.f32.mxu0 %v5344_v4  ;;  %4487 = vmatpush1.bf16.msra.mxu0 %v4486_v51  ;;  %v4514_v51 = vpack.c.bf16 %v2314_v50, %v2312_v48 }
 0x905   : > { %4489 = vmatprep.subr.bf16.mxu0 %v4488_v52  ;;  %v2199_v52 = vld [vmem:[%s6871_s6 + $0x40] sm:$0xff] }
 0x9d6   : > { %v2165_v40 = vpop.f32.mrb[6].mxu0 }
 0x9d7   : > { %v2166_v19 = vadd.f32 %v3964_v39, %v2165_v40  ;;  %v4253_v41 = vpop.f32.mrb[7].mxu0 }
 0x9d8   : > { %v2313_v41 = vld [vmem:[%s6868_s21 + $0xe8] sm:$0xff] }
 0x9d9   : > { %v6272_v43 = vadd.f32 %v2166_v19, %v6077_v11  ;;  %v2290_v11 = vld [vmem:[%s6868_s21 + $0x30] sm:$0xff]  ;;  %v4512_v47 = vpack.c.bf16 %v2315_v44, %v2313_v41 }
 0x9da   : > { %v4490_v56 = vpack.c.bf16 %v2290_v11, %v2288_v53  ;;  %v2200_v53 = vld [vmem:[%s6871_s6 + $0x48] sm:$0xff]  ;;  %v1164_v11 = vld [vmem:[%s6872_s20] sm:$0xff] }
 0x9db   : > { %2170 = vadd.xlane.f32.xlu0 %v6272_v43  ;;  %v4473_v55 = vpack.c.bf16 %v2200_v53, %v2199_v52 }
 0x9dc   : > { %4491 = vmatpush1.bf16.msra.mxu0 %v4490_v56  ;;  %v2202_v56 = vld [vmem:[%s6871_s6 + $0x58] sm:$0xff] }
 0x9dd   : > { %4493 = vmatprep.subr.bf16.mxu0 %v4492_v58  ;;  %4474 = vmatpush3.bf16.msra.mxu1 %v4473_v55  ;;  %v4476_v57 = vpack.c.bf16 %v2202_v56, %v2201_v54  ;;  %v1165_v58 = vld [vmem:[%s6872_s20 + $0x8] sm:$0xff] }
 0x9de   : > { %4475 = vmatprep.subr.bf16.mxu1 %v5343_v16 }
 0x9e0   : > { %4495 = vmatpush1.bf16.msra.mxu0 %v4494_v3 }
 0x9e1   : > { %4497 = vmatprep.subr.bf16.mxu0 %v4496_v7  ;;  %4477 = vmatpush3.bf16.msra.mxu1 %v4476_v57 }
 0x9e2   : > { %4478 = vmatprep.subr.bf16.mxu1 %v5343_v16 }
 0x9e4   : > { %4499 = vmatpush1.bf16.msra.mxu0 %v4498_v14  ;;  %v2321_v14 = vrot.slane %v2316_v13, %v6149_v33 }
 0x9e5   : > { %4501 = vmatprep.subr.bf16.mxu0 %v4500_v17  ;;  %4480 = vmatpush3.bf16.msra.mxu1 %v4479_v61  ;;  %v2325_v17 = vrot.slane %v2316_v13, %v6155_v35 }
 0x9e6   : > { %4481 = vmatprep.subr.bf16.mxu1 %v5343_v16 }
 0x9e8   : > { %4503 = vmatpush1.bf16.msra.mxu0 %v4502_v23 }
 0x9e9   : > { %4505 = vmatprep.subr.bf16.mxu0 %v4504_v24  ;;  %4483 = vmatpush3.bf16.msra.mxu1 %v4482_v0 }
 0x9ea   : > { %4516 = vmatprep.subr.bf16.mxu1 %v5343_v16 }
 0x9ec   : > { %4507 = vmatpush1.bf16.msra.mxu0 %v4506_v29  ;;  %v3965_v29 = vld [vmem:[%s6876_s16] ss:$0 sm:$0xff] }
 0x9ed   : > { %4509 = vmatprep.subr.bf16.mxu0 %v4508_v30 }
 0x9f0   : > { %4511 = vmatpush1.bf16.msra.mxu0 %v4510_v37 }
 0x9f1   : > { %4513 = vmatprep.subr.bf16.mxu0 %v4512_v47 }
 0x9f4   : > { %4515 = vmatpush1.bf16.msra.mxu0 %v4514_v51 }
 0x9f5   : > { %4544 = vmatprep.subr.bf16.mxu0 %v5343_v16 }
 0x9f7   : > { %2393 = vmatmul.mubr.f32.vlgmr.msra.gmra.mrb[8].mxu0 %v1164_v11 }
 0x9f8   : > { %2398 = vmatprep.mubr.f32.mxu0 %v5344_v4 }
 0x9fb   : > { %2399 = vmatmul.mubr.f32.gmra.mrb[10].mxu0 %v1165_v58 }
 0x9fc   : > { %4377 = vmatprep.mubr.msk.f32.mxu0 %vm5345_vm5, %v5344_v4 }
 0xa68   : > { %v2171_v38 = vpop.xlane.xlu0 %2170 }
 0xa69   : > { %v2172_v39 = vmul.f32 0.0078125, %v2171_v38  ;;  %v1167_v38 = vld [vmem:[%s6878_s17] sm:$0x1] }
 0xa6a   : > { %vm1168_vm11 = vcmp.gt.f32.partialorder %v1167_v38, 0.0 }
 0xa6b   : > { %v2173_v40 = vsub.f32 %v6272_v43, %v2172_v39  ;;  %v1169_v39 = vsel %vm1168_vm11, -1e+18, %v5344_v4 }
 0xa6d   : > { %v2174_v19 = vmul.f32 %v2173_v40, %v2173_v40 }
 0xa6f   : > { %2175 = vadd.xlane.f32.xlu1 %v2174_v19 }
 0xaca   : > { %v2394_v15 = vpop.f32.mrb[8].mxu0 }
 0xacb   : > { %v2396_v18 = vpop.f32.mrb[9].mxu0  ;;  %v2395_v20 = vadd.f32 %v2394_v15, %v2321_v14 }
 0xacc   : > { %v2397_v42 = vadd.f32 %v2396_v18, %v2325_v17 }
 0xace   : > { %v2400_v21 = vpop.f32.mrb[10].mxu0 }
 0xacf   : > { %v2401_v22 = vadd.f32 %v2400_v21, %v2321_v14  ;;  %v2402_v23 = vpop.f32.mrb[11].mxu0 }
 0xad0   : > { %v2403_v34 = vadd.f32 %v2402_v23, %v2325_v17 }
 0xad1   : > { %v4517_v25 = vpack.c.bf16 %v2401_v22, %v2395_v20  ;;  %v6354_v26 = vpack.i.bf16 %v2401_v22, %v2395_v20 }
 0xad2   : > { %v4521_v27 = vpack.c.bf16 %v2403_v34, %v2397_v42  ;;  %v6356_v28 = vpack.i.bf16 %v2403_v34, %v2397_v42 }
 0xafc   : > { %v2176_v1 = vpop.xlane.xlu1 %2175 }
 0xafd   : > { %v2177_v2 = vmul.f32 0.0078125, %v2176_v1 }
 0xaff   : > { %v2178_v3 = vadd.f32 1e-06, %v2177_v2 }
 0xb01   : > { %4864 = vrsqrt.f32 %v2178_v3 }
 0xb0b   : > { %v4865_v7 = vpop.eup %4864 }
 0xb0c   : > { %v2180_v8 = vmul.f32 %v4865_v7, %v2173_v40  ;;  %v6382_v40 = vrot.slane %v1169_v39, %v6149_v33 }
 0xb0e   : > { %v2185_v10 = vmul.f32 %v2184_v6, %v2180_v8 }
 0xb10   : > { %v2190_v12 = vadd.f32 %v2189_v9, %v2185_v10 }
 0xb12   : > { %4287 = vmatmul.mubr.f32.vlgmr.msra.gmra.mrb[14].mxu1 %v2190_v12 }
 0xb13   : > { %4293 = vmatprep.mubr.msk.f32.mxu1 %vm5345_vm5, %v5344_v4  ;;  %4519 = vmatpush3.bf16.xpose.msk.msra.mxu1 %vm6350_vm10, %v4517_v25 }
 0xb14   : > { %4520 = vmatprep.subr.bf16.mxu1 %v5343_v16 }
 0xbe5   : > { %v2280_v30 = vpop.f32.mrb[14].mxu1 }
 0xbe6   : > { %v2281_v31 = vadd.f32 %v3965_v29, %v2280_v30  ;;  %v4288_v36 = vpop.f32.mrb[15].mxu1 }
 0xbe8   : > { %v6366_v37 = vmul.f32 0.17677669, %v2281_v31 }
 0xbea   : > { %2576 = vrot.lane.b32.xlu1 %v6366_v37, %s5346_s29  ;;  %4294 = vmatmul.mubr.msk.f32.vlgmr.msra.gmra.mrb[16].mxu1 %vm1401_vm6, %v6366_v37 }
 0xbeb   : > { %4522 = vmatpush3.bf16.msra.mxu1 %v4521_v27  ;;  %4300 = vmatprep.mubr.msk.f32.mxu1 %vm5345_vm5, %v5344_v4 }
 0xbec   : > { %4523 = vmatprep.subr.bf16.mxu1 %v5343_v16 }
 0xc5c   : > { %v2577_v57 = vpop.permute.xlu1 %2576 }
 0xcbd   : > { %v2487_v19 = vpop.f32.mrb[16].mxu1 }
 0xcbe   : > { %v2488_v41 = vadd.f32 %v2487_v19, %v6382_v40  ;;  %v4295_v44 = vpop.f32.mrb[17].mxu1 }
 0xcc0   : > { %v2492_v45 = vsel %vm2491_vm12, %v2488_v41, -inf }
 0xcc1   : > { %2493 = vmax.xlane.f32.xlu0 %v2492_v45 }
 0xd4e   : > { %v2494_v46 = vpop.xlane.xlu0 %2493 }
 0xd4f   : > { %v2495_v47 = vsub.f32 %v2488_v41, %v2494_v46 }
 0xd51   : > { %v2496_v48 = vmul.f32 1.442695, %v2495_v47 }
 0xd53   : > { %4866 = vpow2.f32 %v2496_v48 }
 0xd5d   : > { %v4867_v49 = vpop.eup %4866 }
 0xd5e   : > { %v2498_v50 = vsel %vm2491_vm12, %v4867_v49, 0.0 }
 0xd5f   : > { %2499 = vadd.xlane.f32.xlu0 %v2498_v50 }
 0xd75   : > { %4817 = vrot.lane.b32.xlu0 %v6354_v26, %s5346_s29 }
 0xdec   : > { %v2500_v51 = vpop.xlane.xlu0 %2499 }
 0xded   : > { %4868 = vrcp.f32 %v2500_v51 }
 0xdf0   : > { %v4818_v52 = vpop.permute.xlu0 %4817 }
 0xdf1   : > { %v4820_v53 = vunpack.i.h.bf16 %v4818_v52  ;;  %v4819_v11 = vunpack.i.l.bf16 %v4818_v52 }
 0xdf3   : > { %v4524_v56 = vpack.c.bf16 %v4820_v53, %v4819_v11 }
 0xdf7   : > { %v4869_v55 = vpop.eup %4868 }
 0xdf8   : > { %v2502_v54 = vmul.f32 %v4869_v55, %v4867_v49 }
 0xdfa   : > { %4301 = vmatmul.mubr.msk.f32.vlgmr.msra.gmra.mrb[18].mxu1 %vm2491_vm12, %v2502_v54 }
 0xdfb   : > { %4526 = vmatpush3.bf16.xpose.msk.msra.mxu1 %vm6350_vm10, %v4524_v56  ;;  %4307 = vmatprep.mubr.msk.f32.mxu1 %vm5345_vm5, %v5344_v4 }
 0xdfc   : > { %4527 = vmatprep.subr.bf16.mxu1 %v5343_v16 }
 0xe02   : > { %4308 = vmatmul.mubr.msk.f32.vlgmr.msra.gmra.mrb[20].mxu1 %vm1401_vm6, %v2577_v57 }
 0xe03   : > { %4314 = vmatprep.mubr.msk.f32.mxu1 %vm5345_vm5, %v5344_v4 }
 0xecd   : > { %v6398_v58 = vpop.f32.mrb[18].mxu1 }
 0xece   : > { %v4302_v59 = vpop.f32.mrb[19].mxu1 }
 0xed5   : > { %v2654_v60 = vpop.f32.mrb[20].mxu1 }
 0xed6   : > { %v2655_v61 = vadd.f32 %v2654_v60, %v6382_v40  ;;  %v4309_v62 = vpop.f32.mrb[21].mxu1 }
 0xed8   : > { %v2658_v63 = vsel %vm2491_vm12, %v2655_v61, -inf }
 0xed9   : > { %2659 = vmax.xlane.f32.xlu1 %v2658_v63 }
 0xeea   : > { %4827 = vrot.lane.b32.xlu1 %v6354_v26, %s5348_s14 }
 0xeee   : > { %2750 = vrot.lane.b32.xlu1 %v6366_v37, %s5348_s14 }
 0xf66   : > { %v2660_v0 = vpop.xlane.xlu1 %2659 }
 0xf67   : > { %v2661_v1 = vsub.f32 %v2655_v61, %v2660_v0 }
 0xf69   : > { %v2662_v2 = vmul.f32 1.442695, %v2661_v1  ;;  %v3109_v1 = vld [vmem:[%s6879_s15] sm:$0xff] }
 0xf6a   : > { %v4828_v12 = vpop.permute.xlu1 %4827 }
 0xf6b   : > { %4870 = vpow2.f32 %v2662_v2  ;;  %v4830_v14 = vunpack.i.h.bf16 %v4828_v12  ;;  %v4829_v15 = vunpack.i.l.bf16 %v4828_v12  ;;  %v3110_v2 = vld [vmem:[%s6879_s15 + $0x8] sm:$0xff]  ;;  %v3116_v12 = vld [vmem:[%s6879_s15 + $0x38] sm:$0xff] }
 0xf6d   : > { %v4531_v18 = vpack.c.bf16 %v4830_v14, %v4829_v15  ;;  %v3117_v14 = vld [vmem:[%s6879_s15 + $0x40] sm:$0xff]  ;;  %v3118_v15 = vld [vmem:[%s6879_s15 + $0x48] sm:$0xff] }
 0xf6e   : > { %v2751_v20 = vpop.permute.xlu1 %2750 }
 0xf75   : > { %v4871_v3 = vpop.eup %4870 }
 0xf76   : > { %v2664_v5 = vsel %vm2491_vm12, %v4871_v3, 0.0 }
 0xf77   : > { %2665 = vadd.xlane.f32.xlu0 %v2664_v5  ;;  %v4545_v5 = vpack.c.bf16 %v3110_v2, %v3109_v1  ;;  %v3236_v2 = vld [vmem:[%s6880_s27 + $0x60] sm:$0xff] }
 0xf79   : > { %4546 = vmatpush3.bf16.msra.mxu0 %v4545_v5 }
 0xf7a   : > { %4547 = vmatprep.subr.bf16.mxu0 %v5343_v16 }
 0xf8d   : > { %4822 = vrot.lane.b32.xlu0 %v6356_v28, %s5346_s29 }
0x1004   : > { %v2666_v6 = vpop.xlane.xlu0 %2665 }
0x1005   : > { %4872 = vrcp.f32 %v2666_v6  ;;  %v3112_v6 = vld [vmem:[%s6879_s15 + $0x18] sm:$0xff] }
0x1008   : > { %v4823_v7 = vpop.permute.xlu0 %4822 }
0x1009   : > { %v4825_v8 = vunpack.i.h.bf16 %v4823_v7  ;;  %v4824_v9 = vunpack.i.l.bf16 %v4823_v7 }
0x100b   : > { %v4528_v10 = vpack.c.bf16 %v4825_v8, %v4824_v9  ;;  %v3113_v8 = vld [vmem:[%s6879_s15 + $0x20] sm:$0xff]  ;;  %v3114_v9 = vld [vmem:[%s6879_s15 + $0x28] sm:$0xff] }
0x100d   : > { %4529 = vmatpush3.bf16.msra.mxu1 %v4528_v10  ;;  %v4551_v10 = vpack.c.bf16 %v3114_v9, %v3113_v8  ;;  %v3240_v9 = vld [vmem:[%s6880_s27 + $0x80] sm:$0xff] }
0x100e   : > { %4530 = vmatprep.subr.bf16.mxu1 %v5343_v16 }
0x100f   : > { %v4873_v13 = vpop.eup %4872 }
0x1010   : > { %v2668_v17 = vmul.f32 %v4873_v13, %v4871_v3  ;;  %v3111_v3 = vld [vmem:[%s6879_s15 + $0x10] sm:$0xff] }
0x1011   : > { %v4548_v7 = vpack.c.bf16 %v3112_v6, %v3111_v3  ;;  %v3238_v3 = vld [vmem:[%s6880_s27 + $0x70] sm:$0xff]  ;;  %v3241_v6 = vld [vmem:[%s6880_s27 + $0x88] sm:$0xff] }
0x1012   : > { %4315 = vmatmul.mubr.msk.f32.vlgmr.msra.gmra.mrb[22].mxu1 %vm2491_vm12, %v2668_v17  ;;  %v4557_v17 = vpack.c.bf16 %v3118_v15, %v3117_v14  ;;  %v4582_v5 = vpack.c.bf16 %v3238_v3, %v3236_v2  ;;  %v3244_v14 = vld [vmem:[%s6880_s27 + $0xa0] sm:$0xff] }
0x1013   : > { %4321 = vmatprep.mubr.msk.f32.mxu1 %vm5345_vm5, %v5344_v4  ;;  %4549 = vmatpush3.bf16.msra.mxu0 %v4548_v7  ;;  %v3243_v7 = vld [vmem:[%s6880_s27 + $0x98] sm:$0xff] }
0x1014   : > { %4550 = vmatprep.subr.bf16.mxu0 %v5343_v16  ;;  %v4584_v8 = vpack.c.bf16 %v3243_v7, %v3241_v6 }
0x1016   : > { %4533 = vmatpush3.bf16.xpose.msk.msra.mxu1 %vm6350_vm10, %v4531_v18  ;;  %v3119_v18 = vld [vmem:[%s6879_s15 + $0x50] sm:$0xff] }
0x1017   : > { %4534 = vmatprep.subr.bf16.mxu1 %v5343_v16  ;;  %4552 = vmatpush3.bf16.msra.mxu0 %v4551_v10  ;;  %v3242_v10 = vld [vmem:[%s6880_s27 + $0x90] sm:$0xff] }
0x1018   : > { %4553 = vmatprep.subr.bf16.mxu0 %v5343_v16 }
0x101d   : > { %4322 = vmatmul.mubr.msk.f32.vlgmr.msra.gmra.mrb[24].mxu1 %vm1401_vm6, %v2751_v20  ;;  %v3120_v20 = vld [vmem:[%s6879_s15 + $0x58] sm:$0xff] }
0x101e   : > { %4328 = vmatprep.mubr.msk.f32.mxu1 %vm5345_vm5, %v5344_v4 }
0x10e5   : > { %v2746_v42 = vpop.f32.mrb[22].mxu1 }
0x10e6   : > { %v4316_v21 = vpop.f32.mrb[23].mxu1 }
0x10e7   : > { %v3121_v21 = vld [vmem:[%s6879_s15 + $0x60] sm:$0xff] }
0x10f0   : > { %v2828_v22 = vpop.f32.mrb[24].mxu1 }
0x10f1   : > { %v2829_v23 = vadd.f32 %v2828_v22, %v6382_v40  ;;  %v4323_v34 = vpop.f32.mrb[25].mxu1  ;;  %v3122_v22 = vld [vmem:[%s6879_s15 + $0x68] sm:$0xff] }
0x10f2   : > { %v3123_v34 = vld [vmem:[%s6879_s15 + $0x70] sm:$0xff] }
0x10f3   : > { %v2832_v25 = vsel %vm2491_vm12, %v2829_v23, -inf }
0x10f4   : > { %2833 = vmax.xlane.f32.xlu1 %v2832_v25  ;;  %v3124_v25 = vld [vmem:[%s6879_s15 + $0x78] sm:$0xff] }
0x1105   : > { %4837 = vrot.lane.b32.xlu1 %v6354_v26, %s5347_s10 }
0x1109   : > { %2922 = vrot.lane.b32.xlu1 %v6366_v37, %s5347_s10 }
0x1181   : > { %v2834_v27 = vpop.xlane.xlu1 %2833 }
0x1182   : > { %v2835_v29 = vsub.f32 %v2829_v23, %v2834_v27  ;;  %v4563_v23 = vpack.c.bf16 %v3122_v22, %v3121_v21  ;;  %v4566_v27 = vpack.c.bf16 %v3124_v25, %v3123_v34  ;;  %v3248_v22 = vld [vmem:[%s6880_s27 + $0xc0] sm:$0xff]  ;;  %v3253_v34 = vld [vmem:[%s6880_s27 + $0xe8] sm:$0xff]  ;;  %v3255_v25 = vld [vmem:[%s6880_s27 + $0xf8] sm:$0xff] }
0x1184   : > { %v2836_v30 = vmul.f32 1.442695, %v2835_v29 }
0x1185   : > { %v4838_v44 = vpop.permute.xlu1 %4837 }
0x1186   : > { %4874 = vpow2.f32 %v2836_v30  ;;  %v4840_v45 = vunpack.i.h.bf16 %v4838_v44  ;;  %v4839_v46 = vunpack.i.l.bf16 %v4838_v44 }
0x1188   : > { %v4538_v48 = vpack.c.bf16 %v4840_v45, %v4839_v46  ;;  %v3225_v45 = vld [vmem:[%s6880_s27 + $0x8] sm:$0xff]  ;;  %v3227_v46 = vld [vmem:[%s6880_s27 + $0x18] sm:$0xff] }
0x1189   : > { %v2923_v49 = vpop.permute.xlu1 %2922 }
0x1190   : > { %v4875_v31 = vpop.eup %4874 }
0x1191   : > { %v2838_v36 = vsel %vm2491_vm12, %v4875_v31, 0.0 }
0x1192   : > { %2839 = vadd.xlane.f32.xlu0 %v2838_v36 }
0x11a8   : > { %4832 = vrot.lane.b32.xlu0 %v6356_v28, %s5348_s14 }
0x121f   : > { %v2840_v38 = vpop.xlane.xlu0 %2839 }
0x1220   : > { %4876 = vrcp.f32 %v2840_v38 }
0x1223   : > { %v4833_v39 = vpop.permute.xlu0 %4832 }
0x1224   : > { %v4835_v19 = vunpack.i.h.bf16 %v4833_v39  ;;  %v4834_v41 = vunpack.i.l.bf16 %v4833_v39 }
0x1226   : > { %v4535_v26 = vpack.c.bf16 %v4835_v19, %v4834_v41  ;;  %v3982_v41 = vld [vmem:[%s1128_s25] ss:$0 sm:$0xff]  ;;  %s6882_s25 = sld [smem:[#allocation58_spill]] }
0x1228   : > { %4536 = vmatpush3.bf16.msra.mxu1 %v4535_v26 }
0x1229   : > { %4537 = vmatprep.subr.bf16.mxu1 %v5343_v16 }
0x122a   : > { %v4877_v37 = vpop.eup %4876 }
0x122b   : > { %v2842_v47 = vmul.f32 %v4877_v37, %v4875_v31 }
0x122c   : > { %v3364_v2 = vld [vmem:[%s6882_s25 + $0x38] sm:$0xff]  ;;  %v3382_v6 = vld [vmem:[%s6882_s25 + $0xc8] sm:$0xff]  ;;  %v3365_v7 = vld [vmem:[%s6882_s25 + $0x40] sm:$0xff] }
0x122d   : > { %4329 = vmatmul.mubr.msk.f32.vlgmr.msra.gmra.mrb[26].mxu1 %vm2491_vm12, %v2842_v47  ;;  %v3224_v47 = vld [vmem:[%s6880_s27] sm:$0xff] }
0x122e   : > { %4335 = vmatprep.mubr.msk.f32.mxu1 %vm5345_vm5, %v5344_v4 }
0x1231   : > { %4540 = vmatpush3.bf16.xpose.msk.msra.mxu1 %vm6350_vm10, %v4538_v48  ;;  %v4568_v48 = vpack.c.bf16 %v3227_v46, %v3225_v45  ;;  %v3216_v46 = vsub.s32 4, %v6146_v32 }
0x1232   : > { %4541 = vmatprep.subr.bf16.mxu1 %v5343_v16 }
0x1238   : > { %4336 = vmatmul.mubr.msk.f32.vlgmr.msra.gmra.mrb[28].mxu1 %vm1401_vm6, %v2923_v49  ;;  %v3226_v49 = vld [vmem:[%s6880_s27 + $0x10] sm:$0xff] }
0x1239   : > { %4342 = vmatprep.mubr.msk.f32.mxu1 %vm5345_vm5, %v5344_v4 }
0x1300   : > { %v2918_v50 = vpop.f32.mrb[26].mxu1 }
0x1301   : > { %v4330_v51 = vpop.f32.mrb[27].mxu1 }
0x1302   : > { %v3231_v51 = vld [vmem:[%s6880_s27 + $0x38] sm:$0xff] }
0x130b   : > { %v3000_v52 = vpop.f32.mrb[28].mxu1 }
0x130c   : > { %v3001_v53 = vadd.f32 %v3000_v52, %v6382_v40  ;;  %v4337_v11 = vpop.f32.mrb[29].mxu1  ;;  %v4570_v52 = vpack.c.bf16 %v3226_v49, %v3224_v47  ;;  %v3221_v47 = vsub.s32 5, %v6146_v32  ;;  %v3360_v32 = vld [vmem:[%s6882_s25 + $0x18] sm:$0xff] }
0x130d   : > { %v3228_v11 = vld [vmem:[%s6880_s27 + $0x20] sm:$0xff] }
0x130e   : > { %v3004_v55 = vsel %vm2491_vm12, %v3001_v53, -inf }
0x130f   : > { %3005 = vmax.xlane.f32.xlu0 %v3004_v55  ;;  %v3230_v55 = vld [vmem:[%s6880_s27 + $0x30] sm:$0xff] }
0x1325   : > { %4842 = vrot.lane.b32.xlu0 %v6356_v28, %s5347_s10 }
0x1329   : > { %3099 = vrot.lane.b32.xlu0 %v2918_v50, %s5348_s14  ;;  %v3229_v50 = vld [vmem:[%s6880_s27 + $0x28] sm:$0xff] }
0x139c   : > { %v3006_v24 = vpop.xlane.xlu0 %3005 }
0x139d   : > { %v3007_v54 = vsub.f32 %v3001_v53, %v3006_v24  ;;  %v4572_v53 = vpack.c.bf16 %v3231_v51, %v3229_v50  ;;  %v3233_v24 = vld [vmem:[%s6880_s27 + $0x48] sm:$0xff] }
0x139f   : > { %v3008_v56 = vmul.f32 1.442695, %v3007_v54  ;;  %v3235_v54 = vld [vmem:[%s6880_s27 + $0x58] sm:$0xff] }
0x13a0   : > { %v4843_v57 = vpop.permute.xlu0 %4842 }
0x13a1   : > { %4878 = vpow2.f32 %v3008_v56  ;;  %v4845_v59 = vunpack.i.h.bf16 %v4843_v57  ;;  %v4844_v60 = vunpack.i.l.bf16 %v4843_v57  ;;  %v4576_v56 = vpack.c.bf16 %v3235_v54, %v3233_v24  ;;  %v3232_v57 = vld [vmem:[%s6880_s27 + $0x40] sm:$0xff]  ;;  %v3376_v24 = vld [vmem:[%s6882_s25 + $0x98] sm:$0xff] }
0x13a3   : > { %v4542_v40 = vpack.c.bf16 %v4845_v59, %v4844_v60  ;;  %v3234_v59 = vld [vmem:[%s6880_s27 + $0x50] sm:$0xff] }
0x13a4   : > { %v3100_v38 = vpop.permute.xlu0 %3099  ;;  %v4578_v60 = vpack.c.bf16 %v3234_v59, %v3232_v57  ;;  %v3377_v57 = vld [vmem:[%s6882_s25 + $0xa0] sm:$0xff]  ;;  %v3378_v59 = vld [vmem:[%s6882_s25 + $0xa8] sm:$0xff] }
0x13a5   : > { %4543 = vmatpush3.bf16.msra.mxu1 %v4542_v40 }
0x13a6   : > { %4569 = vmatprep.subr.bf16.mxu1 %v4568_v48  ;;  %v4888_v48 = vld [vmem:[%s6062_s30] sm:$0x3f] }
0x13a7   : > { %v3217_v49 = vrot.slane %v4888_v48, %v3216_v46 }
0x13ab   : > { %v4879_v61 = vpop.eup %4878 }
0x13ac   : > { %v3010_v62 = vsel %vm2491_vm12, %v4879_v61, 0.0 }
0x13ad   : > { %3011 = vadd.xlane.f32.xlu1 %v3010_v62 }
0x13be   : > { %3095 = vrot.lane.b32.xlu1 %v2746_v42, %s5347_s10  ;;  %v4560_v42 = vpack.c.bf16 %v3120_v20, %v3119_v18  ;;  %v3249_v18 = vld [vmem:[%s6880_s27 + $0xc8] sm:$0xff]  ;;  %v3251_v20 = vld [vmem:[%s6880_s27 + $0xd8] sm:$0xff]  ;;  %s6884_s10 = sld [smem:[#allocation36_spill]] }
0x13bf   : > { %v4592_v21 = vpack.c.bf16 %v3251_v20, %v3249_v18  ;;  %v3386_v18 = vld [vmem:[%s6882_s25 + $0xe8] sm:$0xff] }
0x13c4   : > { %p3984_p1 = scmp.ne.s32.totalorder %s6884_s10, 1 }
0x13c5   : > { %s6885_s14 = sld [smem:[#allocation78_spill]] (!%p3984_p1) }
0x143a   : > { %v3012_v28 = vpop.xlane.xlu1 %3011 }
0x143b   : > { %4880 = vrcp.f32 %v3012_v28 }
0x143e   : > { %v3096_v31 = vpop.permute.xlu1 %3095 }
0x143f   : > { %v3106_v36 = vsel %vm1401_vm6, %v6398_v58, %v3096_v31  ;;  %v3254_v31 = vld [vmem:[%s6880_s27 + $0xf0] sm:$0xff] }
0x1440   : > { %v3107_v39 = vsel %vm2072_vm8, %v3106_v36, %v3100_v38  ;;  %v3373_v38 = vld [vmem:[%s6882_s25 + $0x80] sm:$0xff] }
0x1445   : > { %v4881_v63 = vpop.eup %4880 }
0x1446   : > { %v3014_v0 = vmul.f32 %v4881_v63, %v4879_v61  ;;  %v3237_v63 = vld [vmem:[%s6880_s27 + $0x68] sm:$0xff] }
0x1448   : > { %4343 = vmatmul.mubr.msk.f32.vlgmr.msra.gmra.mrb[30].mxu1 %vm2491_vm12, %v3014_v0  ;;  %v3239_v0 = vld [vmem:[%s6880_s27 + $0x78] sm:$0xff] }
0x1449   : > { %3332 = vmatprep.mubr.f32.mxu1 %v5344_v4  ;;  %v3115_v4 = vld [vmem:[%s6879_s15 + $0x30] sm:$0xff]  ;;  %4571 = vmatpush1.bf16.msra.mxu1 %v4570_v52  ;;  %v4580_v1 = vpack.c.bf16 %v3239_v0, %v3237_v63  ;;  %v3222_v52 = vrot.slane %v4888_v48, %v3221_v47  ;;  %v3380_v63 = vld [vmem:[%s6882_s25 + $0xb8] sm:$0xff] }
0x144a   : > { %v4554_v13 = vpack.c.bf16 %v3116_v12, %v3115_v4  ;;  %4573 = vmatprep.subr.bf16.mxu1 %v4572_v53  ;;  %v4586_v4 = vpack.c.bf16 %v3242_v10, %v3240_v9  ;;  %v3245_v12 = vld [vmem:[%s6880_s27 + $0xa8] sm:$0xff]  ;;  %v3383_v10 = vld [vmem:[%s6882_s25 + $0xd0] sm:$0xff] }
0x144b   : > { %v3366_v9 = vld [vmem:[%s6882_s25 + $0x48] sm:$0xff] }
0x144c   : > { %4555 = vmatpush3.bf16.msra.mxu0 %v4554_v13  ;;  %v3247_v13 = vld [vmem:[%s6880_s27 + $0xb8] sm:$0xff] }
0x144d   : > { %4556 = vmatprep.subr.bf16.mxu0 %v5343_v16  ;;  %v4588_v15 = vpack.c.bf16 %v3247_v13, %v3245_v12  ;;  %v4618_v12 = vpack.c.bf16 %v3366_v9, %v3365_v7 }
0x1450   : > { %4558 = vmatpush3.bf16.msra.mxu0 %v4557_v17  ;;  %v3246_v17 = vld [vmem:[%s6880_s27 + $0xb0] sm:$0xff] }
0x1451   : > { %4559 = vmatprep.subr.bf16.mxu0 %v5343_v16 }
0x1454   : > { %4561 = vmatpush3.bf16.msra.mxu0 %v4560_v42  ;;  %v4590_v42 = vpack.c.bf16 %v3246_v17, %v3244_v14  ;;  %v3367_v14 = vld [vmem:[%s6882_s25 + $0x50] sm:$0xff]  ;;  %v3385_v17 = vld [vmem:[%s6882_s25 + $0xe0] sm:$0xff] }
0x1455   : > { %4562 = vmatprep.subr.bf16.mxu0 %v5343_v16 }
0x1458   : > { %4564 = vmatpush3.bf16.msra.mxu0 %v4563_v23  ;;  %v3250_v23 = vld [vmem:[%s6880_s27 + $0xd0] sm:$0xff] }
0x1459   : > { %4565 = vmatprep.subr.bf16.mxu0 %v5343_v16 }
0x145c   : > { %4567 = vmatpush3.bf16.msra.mxu0 %v4566_v27  ;;  %v4594_v27 = vpack.c.bf16 %v3250_v23, %v3248_v22  ;;  %v3370_v22 = vld [vmem:[%s6882_s25 + $0x68] sm:$0xff]  ;;  %v3387_v23 = vld [vmem:[%s6882_s25 + $0xf0] sm:$0xff] }
0x151b   : > { %v3090_v29 = vpop.f32.mrb[30].mxu1 }
0x151c   : > { %3103 = vrot.lane.b32.xlu1 %v3090_v29, %s5346_s29  ;;  %v4344_v30 = vpop.f32.mrb[31].mxu1  ;;  %v4596_v29 = vpack.c.bf16 %v3255_v25, %v3253_v34  ;;  %v3388_v34 = vld [vmem:[%s6882_s25 + $0xf8] sm:$0xff] }
0x151d   : > { %v3252_v30 = vld [vmem:[%s6880_s27 + $0xe0] sm:$0xff] }
0x151e   : > { %v4598_v36 = vpack.c.bf16 %v3254_v31, %v3252_v30  ;;  %v3372_v30 = vld [vmem:[%s6882_s25 + $0x78] sm:$0xff] }
0x158e   : > { %v3104_v19 = vpop.permute.xlu1 %3103 }
0x158f   : > { %v3108_v16 = vsel %vm2074_vm9, %v3107_v39, %v3104_v19  ;;  %v3374_v39 = vld [vmem:[%s6882_s25 + $0x88] sm:$0xff]  ;;  %v3357_v19 = vld [vmem:[%s6882_s25] sm:$0xff] }
0x1590   : > { %4378 = vmatmul.mubr.f32.vlgmr.msra.gmra.mrb[12].mxu0 %v3108_v16  ;;  %v4600_v16 = vpack.c.bf16 %v3374_v39, %v3373_v38 }
0x1592   : > { %4601 = vmatprep.subr.bf16.mxu0 %v4600_v16 }
0x1663   : > { %v3198_v26 = vpop.f32.mrb[12].mxu0 }
0x1664   : > { %v3199_v58 = vadd.f32 %v3982_v41, %v3198_v26  ;;  %v4379_v44 = vpop.f32.mrb[13].mxu0  ;;  %v3358_v41 = vld [vmem:[%s6882_s25 + $0x8] sm:$0xff] }
0x1665   : > { %v4602_v26 = vpack.c.bf16 %v3358_v41, %v3357_v19 }
0x1666   : > { %v6481_v37 = vadd.f32 %v3199_v58, %v6272_v43  ;;  %v4574_v43 = vpack.c.bf16 %v3230_v55, %v3228_v11  ;;  %v3375_v55 = vld [vmem:[%s6882_s25 + $0x90] sm:$0xff] }
0x1667   : > { %4603 = vmatpush3.bf16.msra.mxu0 %v4602_v26  ;;  %v4604_v54 = vpack.c.bf16 %v3376_v24, %v3375_v55 }
0x1668   : > { %3203 = vadd.xlane.f32.xlu0 %v6481_v37  ;;  %4575 = vmatpush1.bf16.msra.mxu1 %v4574_v43  ;;  %v3359_v43 = vld [vmem:[%s6882_s25 + $0x10] sm:$0xff] }
0x1669   : > { %4577 = vmatprep.subr.bf16.mxu1 %v4576_v56  ;;  %v4606_v56 = vpack.c.bf16 %v3360_v32, %v3359_v43  ;;  %4605 = vmatprep.subr.bf16.mxu0 %v4604_v54 }
0x166b   : > { %4607 = vmatpush3.bf16.msra.mxu0 %v4606_v56  ;;  %v3983_v56 = vld [vmem:[%s1139_s28] ss:$0 sm:$0xff] }
0x166c   : > { %4579 = vmatpush1.bf16.msra.mxu1 %v4578_v60  ;;  %v4608_v60 = vpack.c.bf16 %v3378_v59, %v3377_v57 }
0x166d   : > { %4581 = vmatprep.subr.bf16.mxu1 %v4580_v1  ;;  %v3363_v1 = vld [vmem:[%s6882_s25 + $0x30] sm:$0xff] }
0x166e   : > { %4609 = vmatprep.subr.bf16.mxu0 %v4608_v60  ;;  %v4614_v3 = vpack.c.bf16 %v3364_v2, %v3363_v1 }
0x1670   : > { %4583 = vmatpush1.bf16.msra.mxu1 %v4582_v5  ;;  %v3381_v5 = vld [vmem:[%s6882_s25 + $0xc0] sm:$0xff] }
0x1671   : > { %4585 = vmatprep.subr.bf16.mxu1 %v4584_v8  ;;  %v4616_v8 = vpack.c.bf16 %v3382_v6, %v3381_v5  ;;  %v3986_v6 = vld [vmem:[%s6885_s14 + $0x1] ss:$0 sm:$0xff] (!%p3984_p1) }
0x1674   : > { %4587 = vmatpush1.bf16.msra.mxu1 %v4586_v4  ;;  %v3384_v4 = vld [vmem:[%s6882_s25 + $0xd8] sm:$0xff] }
0x1675   : > { %4589 = vmatprep.subr.bf16.mxu1 %v4588_v15  ;;  %v4620_v13 = vpack.c.bf16 %v3384_v4, %v3383_v10  ;;  %v3368_v15 = vld [vmem:[%s6882_s25 + $0x58] sm:$0xff] }
0x1676   : > { %v4622_v20 = vpack.c.bf16 %v3368_v15, %v3367_v14 }
0x1678   : > { %4591 = vmatpush1.bf16.msra.mxu1 %v4590_v42  ;;  %v4624_v42 = vpack.c.bf16 %v3386_v18, %v3385_v17 }
0x1679   : > { %4593 = vmatprep.subr.bf16.mxu1 %v4592_v21  ;;  %v3369_v21 = vld [vmem:[%s6882_s25 + $0x60] sm:$0xff] }
0x167a   : > { %v4626_v25 = vpack.c.bf16 %v3370_v22, %v3369_v21 }
0x167c   : > { %4595 = vmatpush1.bf16.msra.mxu1 %v4594_v27  ;;  %v4628_v27 = vpack.c.bf16 %v3388_v34, %v3387_v23 }
0x167d   : > { %4597 = vmatprep.subr.bf16.mxu1 %v4596_v29  ;;  %v3371_v29 = vld [vmem:[%s6882_s25 + $0x70] sm:$0xff] }
0x167e   : > { %v4630_v31 = vpack.c.bf16 %v3372_v30, %v3371_v29 }
0x1680   : > { %4599 = vmatpush1.bf16.msra.mxu1 %v4598_v36  ;;  %v3256_v36 = vld [vmem:[%s6067_s1] sm:$0x3] }
0x1681   : > { %v3261_v38 = vrot.slane %v3256_v36, %v6149_v33  ;;  %v3265_v39 = vrot.slane %v3256_v36, %v6155_v35 }
0x16f5   : > { %v3204_v40 = vpop.xlane.xlu0 %3203 }
0x16f6   : > { %v3205_v61 = vmul.f32 0.0078125, %v3204_v40  ;;  %v3361_v40 = vld [vmem:[%s6882_s25 + $0x20] sm:$0xff] }
0x16f8   : > { %v3206_v62 = vsub.f32 %v6481_v37, %v3205_v61  ;;  %v3362_v61 = vld [vmem:[%s6882_s25 + $0x28] sm:$0xff] }
0x16fa   : > { %v3207_v28 = vmul.f32 %v3206_v62, %v3206_v62 }
0x16fc   : > { %3208 = vadd.xlane.f32.xlu1 %v3207_v28  ;;  %v3379_v28 = vld [vmem:[%s6882_s25 + $0xb0] sm:$0xff] }
0x16fd   : > { %v4612_v0 = vpack.c.bf16 %v3380_v63, %v3379_v28 }
0x1789   : > { %v3209_v58 = vpop.xlane.xlu1 %3208 }
0x178a   : > { %v3210_v44 = vmul.f32 0.0078125, %v3209_v58 }
0x178c   : > { %v3211_v45 = vadd.f32 1e-06, %v3210_v44 }
0x178e   : > { %4882 = vrsqrt.f32 %v3211_v45 }
0x1798   : > { %v4883_v50 = vpop.eup %4882 }
0x1799   : > { %v3213_v51 = vmul.f32 %v4883_v50, %v3206_v62  ;;  %v4610_v62 = vpack.c.bf16 %v3362_v61, %v3361_v40 }
0x179b   : > { %v3218_v53 = vmul.f32 %v3217_v49, %v3213_v51  ;;  %4611 = vmatpush3.bf16.msra.mxu0 %v4610_v62 }
0x179c   : > { %4613 = vmatprep.subr.bf16.mxu0 %v4612_v0 }
0x179d   : > { %v3223_v11 = vadd.f32 %v3222_v52, %v3218_v53 }
0x179f   : > { %3333 = vmatmul.mubr.f32.vlgmr.msra.gmra.mrb[32].mxu1 %v3223_v11  ;;  %4615 = vmatpush3.bf16.msra.mxu0 %v4614_v3 }
0x17a0   : > { %4617 = vmatprep.subr.bf16.mxu0 %v4616_v8 }
0x17a3   : > { %4619 = vmatpush3.bf16.msra.mxu0 %v4618_v12 }
0x17a4   : > { %4621 = vmatprep.subr.bf16.mxu0 %v4620_v13 }
0x17a7   : > { %4623 = vmatpush3.bf16.msra.mxu0 %v4622_v20 }
0x17a8   : > { %4625 = vmatprep.subr.bf16.mxu0 %v4624_v42 }
0x17ab   : > { %4627 = vmatpush3.bf16.msra.mxu0 %v4626_v25 }
0x17ac   : > { %4629 = vmatprep.subr.bf16.mxu0 %v4628_v27 }
0x17af   : > { %4631 = vmatpush3.bf16.msra.mxu0 %v4630_v31 }
0x1872   : > { %v3334_v19 = vpop.f32.mrb[32].mxu1 }
0x1873   : > { %v3335_v16 = vadd.f32 %v3334_v19, %v3261_v38  ;;  %v3336_v41 = vpop.f32.mrb[33].mxu1 }
0x1874   : > { %v3337_v26 = vadd.f32 %v3336_v41, %v3265_v39 }
0x1875   : > { %v3341_v58 = vmul.f32 0.044715, %v3335_v16  ;;  %v3339_v24 = vmul.f32 0.5, %v3335_v16 }
0x1876   : > { %v3342_v44 = vmul.f32 0.044715, %v3337_v26  ;;  %v3340_v11 = vmul.f32 0.5, %v3337_v26 }
0x1877   : > { %v3343_v45 = vmul.f32 %v3341_v58, %v3335_v16 }
0x1878   : > { %v3344_v46 = vmul.f32 %v3342_v44, %v3337_v26 }
0x1879   : > { %v3345_v47 = vmul.f32 %v3343_v45, %v3335_v16 }
0x187a   : > { %v3346_v48 = vmul.f32 %v3344_v46, %v3337_v26 }
0x187b   : > { %v3347_v49 = vadd.f32 %v3345_v47, %v3335_v16 }
0x187c   : > { %v3348_v50 = vadd.f32 %v3346_v48, %v3337_v26 }
0x187d   : > { %v3349_v51 = vmul.f32 0.7978846, %v3347_v49 }
0x187e   : > { %v3350_v52 = vmul.f32 0.7978846, %v3348_v50 }
0x187f   : > { %4884 = vtanh.f32 %v3349_v51 }
0x1880   : > { %4886 = vtanh.f32 %v3350_v52 }
0x1889   : > { %v4885_v33 = vpop.eup %4884 }
0x188a   : > { %v4887_v53 = vpop.eup %4886  ;;  %v3353_v35 = vadd.f32 1.0, %v4885_v33 }
0x188b   : > { %v3354_v55 = vadd.f32 1.0, %v4887_v53 }
0x188c   : > { %v3355_v43 = vmul.f32 %v3353_v35, %v3339_v24 }
0x188d   : > { %v3356_v54 = vmul.f32 %v3354_v55, %v3340_v11 }
0x188f   : > { %3460 = vmatprep.mubr.f32.mxu0 %v3356_v54 }
0x1890   : > { %3461 = vmatmul.mubr.f32.vlgmr.msra.gmra.mrb[14].mxu0 %v3355_v43 }
0x1963   : > { %v4141_v32 = vpop.f32.mrb[14].mxu0 }
0x1964   : > { %v4142_v57 = vpop.f32.mrb[15].mxu0 }
0x1965   : > { %v4143_v59 = vadd.f32 %v4142_v57, %v4141_v32  ;;  %3471 = sbr.rel (%p3984_p1) target bundleno = 6819 (0x1aa3), region = 140 }
0x1967   : > { %v3463_v60 = vadd.f32 %v4143_v59, %v3983_v56 }
0x1969   : > { %v3466_v40 = vadd.f32 %v3463_v60, %v6481_v37  ;;  %v3985_v37 = vld [vmem:[%s6885_s14] ss:$0 sm:$0xff] (!%p3984_p1) }
0x196b   : > { %3467 = vst [vmem:[#allocation2] sm:$0xff] %v3466_v40  ;;  %3474 = vadd.xlane.f32.xlu0 (!%p3984_p1), %v3466_v40 }
0x19f8   : > { %v3475_v61 = vpop.xlane.xlu0 %3474 }
0x19f9   : > { %v3476_v62 = vmul.f32 0.0078125, %v3475_v61 }
0x19fb   : > { %v3477_v28 = vsub.f32 %v3466_v40, %v3476_v62 }
0x19fd   : > { %v3478_v63 = vmul.f32 %v3477_v28, %v3477_v28 }
0x19ff   : > { %3479 = vadd.xlane.f32.xlu0 %v3478_v63 }
0x1a8c   : > { %v3480_v0 = vpop.xlane.xlu0 %3479 }
0x1a8d   : > { %v3481_v1 = vmul.f32 0.0078125, %v3480_v0 }
0x1a8f   : > { %v3482_v2 = vadd.f32 1e-06, %v3481_v1 }
0x1a91   : > { %4889 = vrsqrt.f32 %v3482_v2 }
0x1a9b   : > { %v4890_v3 = vpop.eup %4889 }
0x1a9c   : > { %v3484_v5 = vmul.f32 %v4890_v3, %v3477_v28 }
0x1a9e   : > { %v3489_v7 = vmul.f32 %v3985_v37, %v3484_v5 }
0x1aa0   : > { %v3494_v8 = vadd.f32 %v3986_v6, %v3489_v7 }
0x1aa2   : > { %3495 = vst [vmem:[%s6073_s26] sm:$0xff] %v3494_v8 }
0x1aa3 PF: > { %s6886_s23 = sld [smem:[#allocation37_spill]]  ;;  %s6888_s19 = sld [smem:[#allocation45_spill]] }
0x1aa4   : > { %s6887_s4 = sld [smem:[#allocation52_spill]]  ;;  %s6889_s8 = sld [smem:[#allocation79_spill]] }
0x1aa5   : > { %s3515_s16 = sshll.u32 %s6073_s26, 4  ;;  %s5349_s22 = smov [#allocation18]   ;;  %s3516_s16 = int_to_ptr.vmem [resolvable:$true] %s3515_s16 }
0x1aa6   : > { %s5131_s13 = scalar_lea.vmem %s3516_s16, 128  ;;  %s5135_s17 = sshll.u32 %s5349_s22, 4  ;;  %s5136_s17 = int_to_ptr.vmem [resolvable:$false] %s5135_s17 }
0x1aa7   : > { %p5132_p12 = scmp.ne.s32.totalorder %s3516_s16, %s5131_s13  ;;  %s5137_s15 = scalar_lea.vmem %s5136_s17, 256 }
0x1aa8   : > { %p5138_p5 = scmp.lt.s32.totalorder %s3516_s16, %s5136_s17  ;;  %p5139_p4 = scmp.lt.s32.totalorder %s5137_s15, %s5131_s13 }
0x1aa9   : > { %s3989_s6 = sshll.u32 %s6886_s23, 7  ;;  %p6890_p6 = scmp.ne.s32.totalorder %s6888_s19, 0 }
0x1aaa   : > { %s6573_s12 = scalar_lea.hbm %s6889_s8, %s3989_s6  ;;  %s3497_s18 = scalar_lea.sflag [#allocation6], %s6887_s4 }
0x1aab   : > { %p5133_p9 = pnand %p5132_p12, %p6890_p6  ;;  %p5140_p7 = por %p5139_p4, %p5138_p5 }
0x1aad   : > { %p5134_p0 = pneg %p5133_p9 }
0x1aaf   : > { %p5141_p8 = pnand %p5140_p7, %p5134_p0 }
0x1ab1   : > { %5144 = shalt.err (!%p5141_p8)
}
0x1ab2   : > { %s5145_s26 = scalar_lea.hbm %s6573_s12, 128  ;;  %s5149_s5 = scalar_lea.hbm %s6889_s8, 256 }
0x1ab3   : > { %p5146_p2 = scmp.ne.s32.totalorder %s6573_s12, %s5145_s26  ;;  %p5150_p13 = scmp.lt.u32.totalorder %s6573_s12, %s6889_s8 }
0x1ab4   : > { %p5151_p10 = scmp.lt.u32.totalorder %s5149_s5, %s5145_s26  ;;  %p5153_p12 = scmp.lt.u32.totalorder %s5145_s26, %s6573_s12 }
0x1ab5   : > { %p5147_p11 = pnand %p5146_p2, %p6890_p6 }
0x1ab6   : > { %p5152_p1 = por %p5151_p10, %p5150_p13 }
0x1ab7   : > { %p5148_p3 = pneg %p5147_p11 }
0x1ab8   : > { %p5154_p9 = por %p5153_p12, %p5152_p1 }
0x1aba   : > { %p5155_p0 = pnand %p5154_p9, %p5148_p3 }
0x1abc   : > { %5158 = shalt.err (!%p5155_p0)
}
0x1abd   : > { %s6891_s30 = sld [smem:[#allocation36_spill]]  ;;  %s6892_s1 = sld [smem:[#allocation29_spill]] }
0x1abe   : > { %s6893_s29 = sld [smem:[#allocation50_spill]]  ;;  %s3530_s9 = sshll.u32 %s1101_s7, 4  ;;  %s6598_s9 = int_to_ptr.vmem [resolvable:$true] %s3530_s9 }
0x1abf   : > { %4652 = dma.vmem_to_hbm [thread:$0]  (%p6890_p6), %s3516_s16, 128, %s6573_s12, %s3497_s18  }
0x1ac0   : > { %s6894_s19 = sld [smem:[#allocation80_spill]]  ;;  %s5159_s13 = scalar_lea.vmem %s6598_s9, 128 }
0x1ac1   : > { %p5160_p5 = scmp.ne.s32.totalorder %s6598_s9, %s5159_s13  ;;  %s5350_s2 = smov [#allocation19]  }
0x1ac2   : > { %s5163_s7 = sshll.u32 %s5350_s2, 4  ;;  %s5164_s7 = int_to_ptr.vmem [resolvable:$false] %s5163_s7 }
0x1ac3   : > { %s3990_s10 = sshll.u32 %s6891_s30, 1  ;;  %s6895_s20 = sand.u32 1, %s6892_s1  }
0x1ac4   : > { %s3526_s28 = sadd.s32 %s6886_s23, %s3990_s10  ;;  %s3502_s0 = scalar_lea.sflag [#allocation20], %s6895_s20 }
0x1ac5   : > { %s3991_s21 = sshll.u32 %s3526_s28, 7  ;;  %p6896_p4 = scmp.ne.s32.totalorder %s6893_s29, 0 }
0x1ac6   : > { %s3528_s6 = scalar_lea.hbm %s6894_s19, %s3991_s21  ;;  %s5165_s23 = scalar_lea.vmem %s5164_s7, 256 }
0x1ac7   : > { %p5161_p6 = pnand %p5160_p5, %p6896_p4  ;;  %p5166_p8 = scmp.lt.s32.totalorder %s6598_s9, %s5164_s7 }
0x1ac8   : > { %p5167_p2 = scmp.lt.s32.totalorder %s5165_s23, %s5159_s13 }
0x1ac9   : > { %p5162_p7 = pneg %p5161_p6 }
0x1aca   : > { %p5168_p11 = por %p5167_p2, %p5166_p8 }
0x1acc   : > { %p5169_p3 = pnand %p5168_p11, %p5162_p7 }
0x1ace   : > { %5172 = shalt.err (!%p5169_p3)
}
0x1acf   : > { %s5173_s12 = scalar_lea.hbm %s3528_s6, 128  ;;  %s5177_s22 = scalar_lea.hbm %s6894_s19, 512 }
0x1ad0   : > { %p5174_p13 = scmp.ne.s32.totalorder %s3528_s6, %s5173_s12  ;;  %p5178_p12 = scmp.lt.u32.totalorder %s3528_s6, %s6894_s19 }
0x1ad1   : > { %p5179_p9 = scmp.lt.u32.totalorder %s5177_s22, %s5173_s12  ;;  %p5181_p5 = scmp.lt.u32.totalorder %s5173_s12, %s3528_s6 }
0x1ad2   : > { %p5175_p10 = pnand %p5174_p13, %p6896_p4 }
0x1ad3   : > { %p5180_p0 = por %p5179_p9, %p5178_p12 }
0x1ad4   : > { %p5176_p1 = pneg %p5175_p10 }
0x1ad5   : > { %p5182_p6 = por %p5181_p5, %p5180_p0 }
0x1ad7   : > { %p5183_p7 = pnand %p5182_p6, %p5176_p1 }
0x1ad9   : > { %5186 = shalt.err (!%p5183_p7)
}
0x1ada   : > { %4653 = dma.vmem_to_hbm [thread:$0]  (%p6896_p4), %s6598_s9, 128, %s3528_s6, %s3502_s0  }
0x1adb PF: > { %s6897_s26 = sld [smem:[#allocation40_spill]]  ;;  %s6898_s27 = sld [smem:[#allocation33_spill]] }
0x1adc   : > { %s6899_s3 = sld [smem:[#allocation48_spill]] }
0x1ae1   : > { %p4689_p8 = scmp.ge.s32.totalorder %s6897_s26, 2  ;;  %s3542_s5 = sand.u32 1, %s6898_s27  }
0x1ae2   : > { %p6900_p2 = scmp.ne.s32.totalorder %s6899_s3, 0  ;;  %s3543_s11 = scalar_lea.sflag [#allocation6], %s3542_s5 }
0x1ae4   : > { %p4682_p11 = pnand %p4689_p8, %p6900_p2 }
0x1ae6   : > { %5264 = dma.done.wait (!%p4682_p11), %s3543_s11, 128  }
0x1ae7   : > { %5266 = vsyncadd (!%p4682_p11), %s3543_s11, 4294967168  ;;  %s6901_s25 = sld [smem:[#allocation28_spill]]  ;;  %s6902_s30 = sld [smem:[#allocation51_spill]] }
0x1aed   : > { %s3551_s1 = sand.u32 1, %s6901_s25   ;;  %p6903_p3 = scmp.ne.s32.totalorder %s6902_s30, 0 }
0x1aee   : > { %s3552_s10 = scalar_lea.sflag [#allocation20], %s3551_s1 }
0x1aef   : > { %p4685_p13 = pnand %p4689_p8, %p6903_p3 }
0x1af1   : > { %5268 = dma.done.wait (!%p4685_p13), %s3552_s10, 128  }
0x1af2   : > { %5270 = vsyncadd (!%p4685_p13), %s3552_s10, 4294967168  ;;  %s53_s1 = sadd.s32 1, %s6897_s26   ;;  %s6905_s2 = sld [smem:[#allocation29_spill]] }
0x1af3   : > { %p6629_p4 = scmp.ge.s32.totalorder %s53_s1, 6   ;;  %s6906_s25 = sld [smem:[#allocation30_spill]] }
0x1af4   : > { %s6907_s26 = sld [smem:[#allocation49_spill]]  ;;  %s6908_s27 = sld [smem:[#allocation31_spill]] }
0x1af5   : > { %s6909_s3 = sld [smem:[#allocation32_spill]]  ;;  %s6910_s28 = sld [smem:[#allocation46_spill]] }
0x1af6   : > { %s6911_s9 = sld [smem:[#allocation34_spill]]  ;;  %s6912_s0 = sld [smem:[#allocation35_spill]] }
0x1af7   : > { %s6913_s4 = sld [smem:[#allocation47_spill]]  ;;  %s6914_s30 = sld [smem:[#allocation38_spill]] }
0x1af8   : > { %s6915_s5 = sld [smem:[#allocation39_spill]]  ;;  %s6916_s22 = sld [smem:[#allocation42_spill]] }
0x1af9   : > { %s6917_s23 = sld [smem:[#allocation43_spill]]  ;;  %52 = sbr.rel (!%p6629_p4) target bundleno = 43 (0x2b), region = 288 }
0x1afc   : > { %s6919_s29 = smov %s6911_s9 }
0x1b00   :  { %3557 = vsyncpa [#allocation5], 1 }
0x1b01   :  { %3559 = vsyncpa [#allocation5 + $0x1], 1 }
0x1b02   :  { %3560 = vsyncpa [#allocation8], 1 }
0x1b03   :  { %3562 = vsyncpa [#allocation8 + $0x1], 1 }
0x1b04   :  { %3563 = vsyncpa [#allocation11], 1 }
0x1b05   :  { %3565 = vsyncpa [#allocation11 + $0x1], 1 }
0x1b06   :  { %3566 = vsyncpa [#allocation14], 1 }
0x1b07   :  { %3568 = vsyncpa [#allocation14 + $0x1], 1 }
0x1b08   :  { %3569 = vsyncpa [#allocation17], 1 }
0x1b09   :  { %3571 = vsyncpa [#allocation17 + $0x1], 1 }
0x1b0a   :  { %3572 = vsyncpa [#allocation6], 1 }
0x1b0b   :  { %3574 = vsyncpa [#allocation6 + $0x1], 1 }
0x1b0c   :  { %3575 = vsyncpa [#allocation20], 1 }
0x1b0d   :  { %3577 = vsyncpa [#allocation20 + $0x1], 1 }

</bundles_post_ra>
